<compile_context>
chip_gen: v7x
topology: tpu7x:2x2x1
jax: 0.10.0
libtpu: 0.0.40
codegen_flags: <defaults>
</compile_context>

<pallas_src>
import jax
import jax.numpy as jnp
import numpy as np
from jax import lax
from jax.experimental import pallas as pl
from jax.experimental.pallas import tpu as pltpu


# ---------------------------------------------------------------------------
# Tiling helpers
# ---------------------------------------------------------------------------
def _pick_rows_per_tile(ho, wo, target_rows):
    """Largest divisor rh of Ho with rh*Wo <= max(Wo, target_rows).
    Prefers >= 2 row-tiles when possible (keeps both v7x TensorCores busy even
    at batch 1).  Falls back to rh=1 (a perf cliff, not a bug) if Ho is prime
    and tiny targets are requested."""
    divs = [d for d in range(1, ho + 1) if ho % d == 0]
    best = max(d for d in divs if d * wo <= max(wo, target_rows))
    if best == ho and ho > 1:
        best = max(d for d in divs if d < ho)
    return best


def _pick_row_group(wo, cout):
    """Pack g consecutive output pixels into the lane dim so the stored tile is
    (close to) 128-lane dense.  Constraints: g | Wo, (Wo/g) % 8 == 0 (sublane
    tiling of the main/halo row blocks), g*Cout <= 128 (bounds the kron'd-MXU
    duplication)."""
    g = 1
    while True:
        g2 = g * 2
        if g2 * cout > 128 or wo % g2 != 0 or (wo // g2) % 8 != 0:
            break
        g = g2
    return g


# ---------------------------------------------------------------------------
# Pallas kernel: fused conv(3x3,s2,p1) + folded-BN shift + LeakyReLU
# (optionally also the final 1x1 conv + bias), on row-group-packed operands.
# ---------------------------------------------------------------------------
def _make_unit_kernel(tmp_rows, wop, leaky_slope, fused):
    """Operand shapes (g = row group, Kg = g*3*Cin, Ng = g*Cout, Nf = g*c_fin):
         y0 main : (tmp_rows, Kg) bf16   even padded rows (kh=0 taps)
         y0 halo : (wop,      Kg) bf16   the +1 image row needed by kh=2
         y1 main : (tmp_rows, Kg) bf16   odd  padded rows (kh=1 taps)
         w0/w1/w2: (Kg, Ng) bf16 block-diagonal, shift: (1, Ng) f32
         [w1x1: (Ng, Nf) f32, b1x1: (1, Nf) f32]
         out     : (tmp_rows, Nf)
       out[r] = act( y0[r]@W0 + y1[r]@W1 + y0[r + wop]@W2 + shift ) [@ W1x1 + b]
    """

    def kernel(*refs):
        if fused:
            (y0_ref, h_ref, y1_ref, w0_ref, w1_ref, w2_ref,
             sh_ref, wf_ref, bf_ref, o_ref) = refs
        else:
            y0_ref, h_ref, y1_ref, w0_ref, w1_ref, w2_ref, sh_ref, o_ref = refs

        a0 = y0_ref[...]                                   # (tmp_rows, Kg) bf16
        a1 = y1_ref[...]
        w2 = w2_ref[...]
        shift = sh_ref[...]                                # (1, Ng) f32

        acc = jnp.dot(a0, w0_ref[...], preferred_element_type=jnp.float32)
        acc = acc + jnp.dot(a1, w1_ref[...], preferred_element_type=jnp.float32)

        def _finish(v, r0, r1):
            v = v + shift
            v = jnp.where(v >= 0.0, v, leaky_slope * v)    # LeakyReLU(0.1)
            if fused:                                      # final 1x1 conv, f32
                v = jnp.dot(v, wf_ref[...],
                            preferred_element_type=jnp.float32) + bf_ref[...]
            o_ref[r0:r1, :] = v.astype(o_ref.dtype)        # lane-dense store

        if tmp_rows > wop:
            # Outputs whose kh=2 row still lives inside the main y0 tile.
            top = acc[: tmp_rows - wop, :] + jnp.dot(
                a0[wop:, :], w2, preferred_element_type=jnp.float32)
            _finish(top, 0, tmp_rows - wop)
        # Outputs whose kh=2 row is the halo tile.
        bot = acc[tmp_rows - wop:, :] + jnp.dot(
            h_ref[...], w2, preferred_element_type=jnp.float32)
        _finish(bot, tmp_rows - wop, tmp_rows)

    return kernel


# ---------------------------------------------------------------------------
# Host glue: cheap re-layout (pad + 3 kw taps + even/odd row split + free
# row-group packing) and BN folding.
# ---------------------------------------------------------------------------
def _relayout_input(x_nhwc, g):
    """(B,H,W,C) -> packed even/odd-row tap tensors (bf16):
         y0[b, r, k*3C + kw*C + c] == x_pad[b, 2*i,   2*w+kw, c]
         y1[b, r, k*3C + kw*C + c] == x_pad[b, 2*i+1, 2*w+kw, c]
       with flat pixel index m = i*Wo + w = r*g + k (g | Wo)."""
    B, H, W, C = x_nhwc.shape
    Ho, Wo = H // 2, W // 2
    xp = jnp.pad(x_nhwc, ((0, 0), (1, 1), (1, 1), (0, 0)))
    cols = jnp.concatenate(
        [xp[:, :, kw:kw + 2 * Wo:2, :] for kw in range(3)], axis=-1)  # (B,H+2,Wo,3C)
    y0 = cols[:, 0:H + 2:2].reshape(B, (Ho + 1) * Wo // g, 3 * C * g)
    y1 = cols[:, 1:H:2].reshape(B, Ho * Wo // g, 3 * C * g)
    return y0.astype(jnp.bfloat16), y1.astype(jnp.bfloat16)


def _fold_bn_weights(w_oihw, gamma, beta, mean, var, eps, g):
    """Fold eval-mode BN scale into the conv weights; build one (g*3Cin, g*Cout)
    block-diagonal matrix per kh tap plus the packed per-channel shift."""
    Cout, Cin = w_oihw.shape[0], w_oihw.shape[1]
    scale = gamma / jnp.sqrt(var + eps)
    shift = beta - mean * scale
    w_s = w_oihw * scale[:, None, None, None]              # (O, C, 3, 3)
    eye = jnp.eye(g, dtype=jnp.float32)

    def tap(kh):
        wk = jnp.transpose(w_s[:, :, kh, :], (2, 1, 0)).reshape(3 * Cin, Cout)
        return jnp.kron(eye, wk).astype(jnp.bfloat16)      # (g*3Cin, g*Cout)

    shift_g = jnp.tile(shift.reshape(1, Cout), (1, g)).astype(jnp.float32)
    return tap(0), tap(1), tap(2), shift_g


# ---------------------------------------------------------------------------
# One Conv2dUnit (optionally fused with the trailing 1x1 conv) as a pallas_call
# ---------------------------------------------------------------------------
def conv2d_unit(x_nhwc, w_oihw, gamma, beta, mean, var, *, eps=1e-5,
                leaky_slope=0.1, final_conv=None, tm_target_rows=4096):
    B, H, W, Cin = x_nhwc.shape
    Cout = w_oihw.shape[0]
    assert H % 2 == 0 and W % 2 == 0, "input H, W must be even"
    Ho, Wo = H // 2, W // 2
    assert Wo % 8 == 0, "W/2 must be a multiple of 8 for aligned TPU tiles"
    M = Ho * Wo

    fused = final_conv is not None
    if fused:
        wf, bfin = final_conv
        c_fin = wf.shape[0]
        out_dtype = jnp.float32
    else:
        c_fin = Cout
        out_dtype = jnp.bfloat16

    g = _pick_row_group(Wo, Cout)            # pixels packed per lane-row
    kg = 3 * Cin * g
    ng = Cout * g
    nf = c_fin * g
    wop = Wo // g                            # packed rows per output image row

    y0, y1 = _relayout_input(x_nhwc, g)      # packed taps, bf16
    w0, w1, w2, shift_g = _fold_bn_weights(w_oihw, gamma, beta, mean, var, eps, g)

    rh = _pick_rows_per_tile(Ho, Wo, tm_target_rows)   # whole image rows / tile
    tmp_rows = rh * wop                                # packed rows / tile
    n_tiles = Ho // rh

    in_arrays = [y0, y0, y1, w0, w1, w2, shift_g]
    in_specs = [
        pl.BlockSpec((None, tmp_rows, kg), lambda bi, mi: (bi, mi, 0)),          # y0 main
        pl.BlockSpec((None, wop, kg), lambda bi, mi: (bi, (mi + 1) * rh, 0)),    # y0 halo
        pl.BlockSpec((None, tmp_rows, kg), lambda bi, mi: (bi, mi, 0)),          # y1 main
        pl.BlockSpec((kg, ng), lambda bi, mi: (0, 0)),                           # W kh=0
        pl.BlockSpec((kg, ng), lambda bi, mi: (0, 0)),                           # W kh=1
        pl.BlockSpec((kg, ng), lambda bi, mi: (0, 0)),                           # W kh=2
        pl.BlockSpec((1, ng), lambda bi, mi: (0, 0)),                            # BN shift
    ]
    if fused:
        eye = jnp.eye(g, dtype=jnp.float32)
        w1x1 = wf.reshape(c_fin, Cout).T.astype(jnp.float32)        # (Cout, c_fin)
        wf_g = jnp.kron(eye, w1x1)                                  # (ng, nf) f32
        bf_g = jnp.tile(bfin.reshape(1, c_fin).astype(jnp.float32), (1, g))
        in_arrays += [wf_g, bf_g]
        in_specs += [pl.BlockSpec((ng, nf), lambda bi, mi: (0, 0)),
                     pl.BlockSpec((1, nf), lambda bi, mi: (0, 0))]

    flops = 2 * B * M * (9 * Cin) * Cout * g
    if fused:
        flops += 2 * B * M * Cout * c_fin * g
    bytes_accessed = ((y0.size + y1.size + B * n_tiles * wop * kg) * 2
                      + (w0.size + w1.size + w2.size) * 2
                      + B * (M // g) * nf * (4 if fused else 2))

    out = pl.pallas_call(
        _make_unit_kernel(tmp_rows, wop, leaky_slope, fused),
        out_shape=jax.ShapeDtypeStruct((B, M // g, nf), out_dtype),
        grid=(B, n_tiles),
        in_specs=in_specs,
        out_specs=pl.BlockSpec((None, tmp_rows, nf), lambda bi, mi: (bi, mi, 0)),
        compiler_params=pltpu.CompilerParams(
            dimension_semantics=("parallel", "parallel"),
            vmem_limit_bytes=64 * 1024 * 1024),
        cost_estimate=pl.CostEstimate(
            flops=int(flops), transcendentals=0,
            bytes_accessed=int(bytes_accessed)),
    )(*in_arrays)

    # Packed (B, M/g, g*c_fin) -> NHWC; reshapes are row-major-consistent (free).
    return out.reshape(B, Ho, Wo, c_fin)


# ---------------------------------------------------------------------------
# MaskEncoder forward (NCHW in / NCHW out, like PyTorch)
# ---------------------------------------------------------------------------
def mask_encoder_forward(mask_nchw, params, *, tm_targets=(16384, 4096, 1024)):
    x = jnp.transpose(mask_nchw, (0, 2, 3, 1)).astype(jnp.bfloat16)   # NCHW -> NHWC
    units = params["units"]
    for li, (w, g, b, m, v) in enumerate(units[:-1]):
        x = conv2d_unit(x, w, g, b, m, v, tm_target_rows=tm_targets[li])
    w3, g3, b3, m3, v3 = units[-1]
    x = conv2d_unit(x, w3, g3, b3, m3, v3, final_conv=params["final"],
                    tm_target_rows=tm_targets[len(units) - 1])        # f32
    return jnp.transpose(x, (0, 3, 1, 2))                             # NHWC -> NCHW


# ---------------------------------------------------------------------------
# Deterministic parameter construction
# ---------------------------------------------------------------------------
def make_params(initial_filters, key):
    i32 = initial_filters
    i64 = i32 * 2
    i128 = i32 * 4
    dims = [(1, i32), (i32, i64), (i64, i128)]
    keys = jax.random.split(key, 2 * len(dims) + 2)
    units = []
    for idx, (cin, cout) in enumerate(dims):
        w = 0.1 * jax.random.normal(keys[2 * idx], (cout, cin, 3, 3), jnp.float32)
        g = 1.0 + 0.1 * jax.random.normal(keys[2 * idx + 1], (cout,), jnp.float32)
        b = 0.05 * jnp.arange(cout, dtype=jnp.float32)
        m = 0.01 * jnp.arange(cout, dtype=jnp.float32)
        v = 1.0 + 0.02 * jnp.arange(cout, dtype=jnp.float32)
        units.append((w, g, b, m, v))
    w_f = 0.1 * jax.random.normal(keys[-2], (i128, i128, 1, 1), jnp.float32)
    b_f = 0.1 * jax.random.normal(keys[-1], (i128,), jnp.float32)
    return {"units": units, "final": (w_f, b_f)}


# ---------------------------------------------------------------------------
# Pure-JAX f32 reference (lax.conv) for the correctness check
# ---------------------------------------------------------------------------
def ref_forward(mask_nchw, params, eps=1e-5):
    x = mask_nchw
    for (w, g, b, m, v) in params["units"]:
        x = lax.conv_general_dilated(
            x, w, (2, 2), ((1, 1), (1, 1)),
            dimension_numbers=("NCHW", "OIHW", "NCHW"))
        scale = g / jnp.sqrt(v + eps)
        shift = b - m * scale
        x = x * scale[None, :, None, None] + shift[None, :, None, None]
        x = jnp.where(x >= 0, x, 0.1 * x)
    w_f, b_f = params["final"]
    x = lax.conv_general_dilated(
        x, w_f, (1, 1), ((0, 0), (0, 0)),
        dimension_numbers=("NCHW", "OIHW", "NCHW"))
    return x + b_f[None, :, None, None]


if __name__ == "__main__":
    key = jax.random.PRNGKey(0)
    k_in, k_p = jax.random.split(key)

    initial_filters = 8                     # i32=8, i64=16, i128=32
    B, H, W = 2, 32, 128                    # small stand-in for the real (160, 320)
    mask = jax.random.uniform(k_in, (B, 1, H, W), jnp.float32)

    params = make_params(initial_filters, k_p)

    # Small per-layer row targets so every layer runs >= 2 row-tiles per batch
    # at this tiny resolution (exercises the cross-tile halo + packed-store
    # paths); at real resolution keep the defaults.
    fwd = jax.jit(lambda m, p: mask_encoder_forward(m, p, tm_targets=(512, 128, 32)))
    out = jax.block_until_ready(fwd(mask, params))

    expected_shape = (B, 4 * initial_filters, H // 8, W // 8)
    assert out.shape == expected_shape, (out.shape, expected_shape)

    ref = jax.block_until_ready(ref_forward(mask, params))
    # bf16 activations/weights inside the kernels -> loosened tolerance vs f32 ref.
    np.testing.assert_allclose(np.asarray(out), np.asarray(ref), rtol=5e-2, atol=5e-2)

    print("KERNEL_OK")
</pallas_src>

<mosaic_0001>
module attributes {stable_mosaic.version = 11 : i64} {
  func.func @kernel(%arg0: i32, %arg1: i32, %arg2: memref<1x64x24xbf16, #tpu.memory_space<vmem>>, %arg3: memref<1x8x24xbf16, #tpu.memory_space<vmem>>, %arg4: memref<1x64x24xbf16, #tpu.memory_space<vmem>>, %arg5: memref<24x64xbf16, #tpu.memory_space<vmem>>, %arg6: memref<24x64xbf16, #tpu.memory_space<vmem>>, %arg7: memref<24x64xbf16, #tpu.memory_space<vmem>>, %arg8: memref<1x64xf32, #tpu.memory_space<vmem>>, %arg9: memref<1x64x64xbf16, #tpu.memory_space<vmem>>) attributes {dimension_semantics = [#tpu.dimension_semantics<parallel>, #tpu.dimension_semantics<parallel>], iteration_bounds = array<i64: 2, 2>, scalar_prefetch = 0 : i64, scratch_operands = 0 : i64, tpu.core_type = #tpu.core_type<tc>, window_params = [{transform_indices = @transform_0, window_bounds = array<i64: 1, 64, 24>}, {transform_indices = @transform_1, window_bounds = array<i64: 1, 8, 24>}, {transform_indices = @transform_2, window_bounds = array<i64: 1, 64, 24>}, {pipeline_mode = #tpu.pipeline_mode<synchronous>, transform_indices = @transform_3, window_bounds = array<i64: 24, 64>}, {pipeline_mode = #tpu.pipeline_mode<synchronous>, transform_indices = @transform_4, window_bounds = array<i64: 24, 64>}, {pipeline_mode = #tpu.pipeline_mode<synchronous>, transform_indices = @transform_5, window_bounds = array<i64: 24, 64>}, {pipeline_mode = #tpu.pipeline_mode<synchronous>, transform_indices = @transform_6, window_bounds = array<i64: 1, 64>}, {transform_indices = @transform_7, window_bounds = array<i64: 1, 64, 64>}]} {
    %c0 = arith.constant 0 : index
    %c0_0 = arith.constant 0 : index
    %c0_1 = arith.constant 0 : index
    %0 = vector.load %arg2[%c0, %c0_0, %c0_1] : memref<1x64x24xbf16, #tpu.memory_space<vmem>>, vector<1x64x24xbf16>
    %1 = vector.shape_cast %0 : vector<1x64x24xbf16> to vector<64x24xbf16>
    %c0_2 = arith.constant 0 : index
    %c0_3 = arith.constant 0 : index
    %c0_4 = arith.constant 0 : index
    %2 = vector.load %arg4[%c0_2, %c0_3, %c0_4] : memref<1x64x24xbf16, #tpu.memory_space<vmem>>, vector<1x64x24xbf16>
    %3 = vector.shape_cast %2 : vector<1x64x24xbf16> to vector<64x24xbf16>
    %c0_5 = arith.constant 0 : index
    %c0_6 = arith.constant 0 : index
    %4 = vector.load %arg7[%c0_5, %c0_6] : memref<24x64xbf16, #tpu.memory_space<vmem>>, vector<24x64xbf16>
    %c0_7 = arith.constant 0 : index
    %c0_8 = arith.constant 0 : index
    %5 = vector.load %arg8[%c0_7, %c0_8] : memref<1x64xf32, #tpu.memory_space<vmem>>, vector<1x64xf32>
    %c0_9 = arith.constant 0 : index
    %c0_10 = arith.constant 0 : index
    %6 = vector.load %arg5[%c0_9, %c0_10] : memref<24x64xbf16, #tpu.memory_space<vmem>>, vector<24x64xbf16>
    %cst = arith.constant dense<0.000000e+00> : vector<64x64xf32>
    %7 = tpu.matmul %1, %6, %cst {dimension_numbers = #tpu.dot_dimension_numbers<[1], [0], [0], [1], [0, 0, 1, 1], [], []>} : vector<64x24xbf16>, vector<24x64xbf16>, vector<64x64xf32> -> vector<64x64xf32>
    %c0_11 = arith.constant 0 : index
    %c0_12 = arith.constant 0 : index
    %8 = vector.load %arg6[%c0_11, %c0_12] : memref<24x64xbf16, #tpu.memory_space<vmem>>, vector<24x64xbf16>
    %cst_13 = arith.constant dense<0.000000e+00> : vector<64x64xf32>
    %9 = tpu.matmul %3, %8, %cst_13 {dimension_numbers = #tpu.dot_dimension_numbers<[1], [0], [0], [1], [0, 0, 1, 1], [], []>} : vector<64x24xbf16>, vector<24x64xbf16>, vector<64x64xf32> -> vector<64x64xf32>
    %10 = arith.addf %7, %9 : vector<64x64xf32>
    %11 = vector.extract_strided_slice %10 {offsets = [0, 0], sizes = [56, 64], strides = [1, 1]} : vector<64x64xf32> to vector<56x64xf32>
    %12 = vector.extract_strided_slice %1 {offsets = [8, 0], sizes = [56, 24], strides = [1, 1]} : vector<64x24xbf16> to vector<56x24xbf16>
    %cst_14 = arith.constant dense<0.000000e+00> : vector<56x64xf32>
    %13 = tpu.matmul %12, %4, %cst_14 {dimension_numbers = #tpu.dot_dimension_numbers<[1], [0], [0], [1], [0, 0, 1, 1], [], []>} : vector<56x24xbf16>, vector<24x64xbf16>, vector<56x64xf32> -> vector<56x64xf32>
    %14 = arith.addf %11, %13 : vector<56x64xf32>
    %15 = vector.broadcast %5 : vector<1x64xf32> to vector<56x64xf32>
    %16 = arith.addf %14, %15 : vector<56x64xf32>
    %cst_15 = arith.constant 0.000000e+00 : f32
    %17 = vector.broadcast %cst_15 : f32 to vector<56x64xf32>
    %18 = arith.cmpf oge, %16, %17 : vector<56x64xf32>
    %cst_16 = arith.constant 1.000000e-01 : f32
    %19 = vector.broadcast %cst_16 : f32 to vector<56x64xf32>
    %20 = arith.mulf %19, %16 : vector<56x64xf32>
    %21 = arith.select %18, %16, %20 : vector<56x64xi1>, vector<56x64xf32>
    %22 = arith.truncf %21 : vector<56x64xf32> to vector<56x64xbf16>
    %c0_17 = arith.constant 0 : index
    %c0_18 = arith.constant 0 : index
    %c0_19 = arith.constant 0 : index
    %23 = vector.load %arg9[%c0_17, %c0_18, %c0_19] : memref<1x64x64xbf16, #tpu.memory_space<vmem>>, vector<1x56x64xbf16>
    %24 = vector.shape_cast %23 : vector<1x56x64xbf16> to vector<56x64xbf16>
    %25 = vector.shape_cast %22 : vector<56x64xbf16> to vector<1x56x64xbf16>
    tpu.vector_store %arg9[%c0_17, %c0_18, %c0_19], %25 {strides = array<i32>} : memref<1x64x64xbf16, #tpu.memory_space<vmem>>, vector<1x56x64xbf16>,
    %26 = vector.extract_strided_slice %10 {offsets = [56, 0], sizes = [8, 64], strides = [1, 1]} : vector<64x64xf32> to vector<8x64xf32>
    %c0_20 = arith.constant 0 : index
    %c0_21 = arith.constant 0 : index
    %c0_22 = arith.constant 0 : index
    %27 = vector.load %arg3[%c0_20, %c0_21, %c0_22] : memref<1x8x24xbf16, #tpu.memory_space<vmem>>, vector<1x8x24xbf16>
    %28 = vector.shape_cast %27 : vector<1x8x24xbf16> to vector<8x24xbf16>
    %cst_23 = arith.constant dense<0.000000e+00> : vector<8x64xf32>
    %29 = tpu.matmul %28, %4, %cst_23 {dimension_numbers = #tpu.dot_dimension_numbers<[1], [0], [0], [1], [0, 0, 1, 1], [], []>} : vector<8x24xbf16>, vector<24x64xbf16>, vector<8x64xf32> -> vector<8x64xf32>
    %30 = arith.addf %26, %29 : vector<8x64xf32>
    %31 = vector.broadcast %5 : vector<1x64xf32> to vector<8x64xf32>
    %32 = arith.addf %30, %31 : vector<8x64xf32>
    %cst_24 = arith.constant 0.000000e+00 : f32
    %33 = vector.broadcast %cst_24 : f32 to vector<8x64xf32>
    %34 = arith.cmpf oge, %32, %33 : vector<8x64xf32>
    %cst_25 = arith.constant 1.000000e-01 : f32
    %35 = vector.broadcast %cst_25 : f32 to vector<8x64xf32>
    %36 = arith.mulf %35, %32 : vector<8x64xf32>
    %37 = arith.select %34, %32, %36 : vector<8x64xi1>, vector<8x64xf32>
    %38 = arith.truncf %37 : vector<8x64xf32> to vector<8x64xbf16>
    %c0_26 = arith.constant 0 : index
    %c56 = arith.constant 56 : index
    %c0_27 = arith.constant 0 : index
    %39 = vector.load %arg9[%c0_26, %c56, %c0_27] : memref<1x64x64xbf16, #tpu.memory_space<vmem>>, vector<1x8x64xbf16>
    %40 = vector.shape_cast %39 : vector<1x8x64xbf16> to vector<8x64xbf16>
    %41 = vector.shape_cast %38 : vector<8x64xbf16> to vector<1x8x64xbf16>
    tpu.vector_store %arg9[%c0_26, %c56, %c0_27], %41 {strides = array<i32>} : memref<1x64x64xbf16, #tpu.memory_space<vmem>>, vector<1x8x64xbf16>,
    return
  }
  func.func @transform_0(%arg0: i32, %arg1: i32) -> (i32, i32, i32) {
    %c0_i32 = arith.constant 0 : i32
    %c0_i32_0 = arith.constant 0 : i32
    return %arg0, %arg1, %c0_i32 : i32, i32, i32
  }
  func.func @transform_1(%arg0: i32, %arg1: i32) -> (i32, i32, i32) {
    %c1_i32 = arith.constant 1 : i32
    %0 = arith.addi %arg1, %c1_i32 : i32
    %c8_i32 = arith.constant 8 : i32
    %1 = arith.muli %0, %c8_i32 : i32
    %c0_i32 = arith.constant 0 : i32
    %c0_i32_0 = arith.constant 0 : i32
    return %arg0, %1, %c0_i32 : i32, i32, i32
  }
  func.func @transform_2(%arg0: i32, %arg1: i32) -> (i32, i32, i32) {
    %c0_i32 = arith.constant 0 : i32
    %c0_i32_0 = arith.constant 0 : i32
    return %arg0, %arg1, %c0_i32 : i32, i32, i32
  }
  func.func @transform_3(%arg0: i32, %arg1: i32) -> (i32, i32) {
    %c0_i32 = arith.constant 0 : i32
    %c0_i32_0 = arith.constant 0 : i32
    %c0_i32_1 = arith.constant 0 : i32
    return %c0_i32, %c0_i32_0 : i32, i32
  }
  func.func @transform_4(%arg0: i32, %arg1: i32) -> (i32, i32) {
    %c0_i32 = arith.constant 0 : i32
    %c0_i32_0 = arith.constant 0 : i32
    %c0_i32_1 = arith.constant 0 : i32
    return %c0_i32, %c0_i32_0 : i32, i32
  }
  func.func @transform_5(%arg0: i32, %arg1: i32) -> (i32, i32) {
    %c0_i32 = arith.constant 0 : i32
    %c0_i32_0 = arith.constant 0 : i32
    %c0_i32_1 = arith.constant 0 : i32
    return %c0_i32, %c0_i32_0 : i32, i32
  }
  func.func @transform_6(%arg0: i32, %arg1: i32) -> (i32, i32) {
    %c0_i32 = arith.constant 0 : i32
    %c0_i32_0 = arith.constant 0 : i32
    %c0_i32_1 = arith.constant 0 : i32
    return %c0_i32, %c0_i32_0 : i32, i32
  }
  func.func @transform_7(%arg0: i32, %arg1: i32) -> (i32, i32, i32) {
    %c0_i32 = arith.constant 0 : i32
    %c0_i32_0 = arith.constant 0 : i32
    return %arg0, %arg1, %c0_i32 : i32, i32, i32
  }
}

module attributes {stable_mosaic.version = 11 : i64} {
  func.func @kernel(%arg0: i32, %arg1: i32, %arg2: memref<1x32x96xbf16, #tpu.memory_space<vmem>>, %arg3: memref<1x8x96xbf16, #tpu.memory_space<vmem>>, %arg4: memref<1x32x96xbf16, #tpu.memory_space<vmem>>, %arg5: memref<96x64xbf16, #tpu.memory_space<vmem>>, %arg6: memref<96x64xbf16, #tpu.memory_space<vmem>>, %arg7: memref<96x64xbf16, #tpu.memory_space<vmem>>, %arg8: memref<1x64xf32, #tpu.memory_space<vmem>>, %arg9: memref<1x32x64xbf16, #tpu.memory_space<vmem>>) attributes {dimension_semantics = [#tpu.dimension_semantics<parallel>, #tpu.dimension_semantics<parallel>], iteration_bounds = array<i64: 2, 2>, scalar_prefetch = 0 : i64, scratch_operands = 0 : i64, tpu.core_type = #tpu.core_type<tc>, window_params = [{transform_indices = @transform_0, window_bounds = array<i64: 1, 32, 96>}, {transform_indices = @transform_1, window_bounds = array<i64: 1, 8, 96>}, {transform_indices = @transform_2, window_bounds = array<i64: 1, 32, 96>}, {pipeline_mode = #tpu.pipeline_mode<synchronous>, transform_indices = @transform_3, window_bounds = array<i64: 96, 64>}, {pipeline_mode = #tpu.pipeline_mode<synchronous>, transform_indices = @transform_4, window_bounds = array<i64: 96, 64>}, {pipeline_mode = #tpu.pipeline_mode<synchronous>, transform_indices = @transform_5, window_bounds = array<i64: 96, 64>}, {pipeline_mode = #tpu.pipeline_mode<synchronous>, transform_indices = @transform_6, window_bounds = array<i64: 1, 64>}, {transform_indices = @transform_7, window_bounds = array<i64: 1, 32, 64>}]} {
    %c0 = arith.constant 0 : index
    %c0_0 = arith.constant 0 : index
    %c0_1 = arith.constant 0 : index
    %0 = vector.load %arg2[%c0, %c0_0, %c0_1] : memref<1x32x96xbf16, #tpu.memory_space<vmem>>, vector<1x32x96xbf16>
    %1 = vector.shape_cast %0 : vector<1x32x96xbf16> to vector<32x96xbf16>
    %c0_2 = arith.constant 0 : index
    %c0_3 = arith.constant 0 : index
    %c0_4 = arith.constant 0 : index
    %2 = vector.load %arg4[%c0_2, %c0_3, %c0_4] : memref<1x32x96xbf16, #tpu.memory_space<vmem>>, vector<1x32x96xbf16>
    %3 = vector.shape_cast %2 : vector<1x32x96xbf16> to vector<32x96xbf16>
    %c0_5 = arith.constant 0 : index
    %c0_6 = arith.constant 0 : index
    %4 = vector.load %arg7[%c0_5, %c0_6] : memref<96x64xbf16, #tpu.memory_space<vmem>>, vector<96x64xbf16>
    %c0_7 = arith.constant 0 : index
    %c0_8 = arith.constant 0 : index
    %5 = vector.load %arg8[%c0_7, %c0_8] : memref<1x64xf32, #tpu.memory_space<vmem>>, vector<1x64xf32>
    %c0_9 = arith.constant 0 : index
    %c0_10 = arith.constant 0 : index
    %6 = vector.load %arg5[%c0_9, %c0_10] : memref<96x64xbf16, #tpu.memory_space<vmem>>, vector<96x64xbf16>
    %cst = arith.constant dense<0.000000e+00> : vector<32x64xf32>
    %7 = tpu.matmul %1, %6, %cst {dimension_numbers = #tpu.dot_dimension_numbers<[1], [0], [0], [1], [0, 0, 1, 1], [], []>} : vector<32x96xbf16>, vector<96x64xbf16>, vector<32x64xf32> -> vector<32x64xf32>
    %c0_11 = arith.constant 0 : index
    %c0_12 = arith.constant 0 : index
    %8 = vector.load %arg6[%c0_11, %c0_12] : memref<96x64xbf16, #tpu.memory_space<vmem>>, vector<96x64xbf16>
    %cst_13 = arith.constant dense<0.000000e+00> : vector<32x64xf32>
    %9 = tpu.matmul %3, %8, %cst_13 {dimension_numbers = #tpu.dot_dimension_numbers<[1], [0], [0], [1], [0, 0, 1, 1], [], []>} : vector<32x96xbf16>, vector<96x64xbf16>, vector<32x64xf32> -> vector<32x64xf32>
    %10 = arith.addf %7, %9 : vector<32x64xf32>
    %11 = vector.extract_strided_slice %10 {offsets = [0, 0], sizes = [24, 64], strides = [1, 1]} : vector<32x64xf32> to vector<24x64xf32>
    %12 = vector.extract_strided_slice %1 {offsets = [8, 0], sizes = [24, 96], strides = [1, 1]} : vector<32x96xbf16> to vector<24x96xbf16>
    %cst_14 = arith.constant dense<0.000000e+00> : vector<24x64xf32>
    %13 = tpu.matmul %12, %4, %cst_14 {dimension_numbers = #tpu.dot_dimension_numbers<[1], [0], [0], [1], [0, 0, 1, 1], [], []>} : vector<24x96xbf16>, vector<96x64xbf16>, vector<24x64xf32> -> vector<24x64xf32>
    %14 = arith.addf %11, %13 : vector<24x64xf32>
    %15 = vector.broadcast %5 : vector<1x64xf32> to vector<24x64xf32>
    %16 = arith.addf %14, %15 : vector<24x64xf32>
    %cst_15 = arith.constant 0.000000e+00 : f32
    %17 = vector.broadcast %cst_15 : f32 to vector<24x64xf32>
    %18 = arith.cmpf oge, %16, %17 : vector<24x64xf32>
    %cst_16 = arith.constant 1.000000e-01 : f32
    %19 = vector.broadcast %cst_16 : f32 to vector<24x64xf32>
    %20 = arith.mulf %19, %16 : vector<24x64xf32>
    %21 = arith.select %18, %16, %20 : vector<24x64xi1>, vector<24x64xf32>
    %22 = arith.truncf %21 : vector<24x64xf32> to vector<24x64xbf16>
    %c0_17 = arith.constant 0 : index
    %c0_18 = arith.constant 0 : index
    %c0_19 = arith.constant 0 : index
    %23 = vector.load %arg9[%c0_17, %c0_18, %c0_19] : memref<1x32x64xbf16, #tpu.memory_space<vmem>>, vector<1x24x64xbf16>
    %24 = vector.shape_cast %23 : vector<1x24x64xbf16> to vector<24x64xbf16>
    %25 = vector.shape_cast %22 : vector<24x64xbf16> to vector<1x24x64xbf16>
    tpu.vector_store %arg9[%c0_17, %c0_18, %c0_19], %25 {strides = array<i32>} : memref<1x32x64xbf16, #tpu.memory_space<vmem>>, vector<1x24x64xbf16>,
    %26 = vector.extract_strided_slice %10 {offsets = [24, 0], sizes = [8, 64], strides = [1, 1]} : vector<32x64xf32> to vector<8x64xf32>
    %c0_20 = arith.constant 0 : index
    %c0_21 = arith.constant 0 : index
    %c0_22 = arith.constant 0 : index
    %27 = vector.load %arg3[%c0_20, %c0_21, %c0_22] : memref<1x8x96xbf16, #tpu.memory_space<vmem>>, vector<1x8x96xbf16>
    %28 = vector.shape_cast %27 : vector<1x8x96xbf16> to vector<8x96xbf16>
    %cst_23 = arith.constant dense<0.000000e+00> : vector<8x64xf32>
    %29 = tpu.matmul %28, %4, %cst_23 {dimension_numbers = #tpu.dot_dimension_numbers<[1], [0], [0], [1], [0, 0, 1, 1], [], []>} : vector<8x96xbf16>, vector<96x64xbf16>, vector<8x64xf32> -> vector<8x64xf32>
    %30 = arith.addf %26, %29 : vector<8x64xf32>
    %31 = vector.broadcast %5 : vector<1x64xf32> to vector<8x64xf32>
    %32 = arith.addf %30, %31 : vector<8x64xf32>
    %cst_24 = arith.constant 0.000000e+00 : f32
    %33 = vector.broadcast %cst_24 : f32 to vector<8x64xf32>
    %34 = arith.cmpf oge, %32, %33 : vector<8x64xf32>
    %cst_25 = arith.constant 1.000000e-01 : f32
    %35 = vector.broadcast %cst_25 : f32 to vector<8x64xf32>
    %36 = arith.mulf %35, %32 : vector<8x64xf32>
    %37 = arith.select %34, %32, %36 : vector<8x64xi1>, vector<8x64xf32>
    %38 = arith.truncf %37 : vector<8x64xf32> to vector<8x64xbf16>
    %c0_26 = arith.constant 0 : index
    %c24 = arith.constant 24 : index
    %c0_27 = arith.constant 0 : index
    %39 = vector.load %arg9[%c0_26, %c24, %c0_27] : memref<1x32x64xbf16, #tpu.memory_space<vmem>>, vector<1x8x64xbf16>
    %40 = vector.shape_cast %39 : vector<1x8x64xbf16> to vector<8x64xbf16>
    %41 = vector.shape_cast %38 : vector<8x64xbf16> to vector<1x8x64xbf16>
    tpu.vector_store %arg9[%c0_26, %c24, %c0_27], %41 {strides = array<i32>} : memref<1x32x64xbf16, #tpu.memory_space<vmem>>, vector<1x8x64xbf16>,
    return
  }
  func.func @transform_0(%arg0: i32, %arg1: i32) -> (i32, i32, i32) {
    %c0_i32 = arith.constant 0 : i32
    %c0_i32_0 = arith.constant 0 : i32
    return %arg0, %arg1, %c0_i32 : i32, i32, i32
  }
  func.func @transform_1(%arg0: i32, %arg1: i32) -> (i32, i32, i32) {
    %c1_i32 = arith.constant 1 : i32
    %0 = arith.addi %arg1, %c1_i32 : i32
    %c4_i32 = arith.constant 4 : i32
    %1 = arith.muli %0, %c4_i32 : i32
    %c0_i32 = arith.constant 0 : i32
    %c0_i32_0 = arith.constant 0 : i32
    return %arg0, %1, %c0_i32 : i32, i32, i32
  }
  func.func @transform_2(%arg0: i32, %arg1: i32) -> (i32, i32, i32) {
    %c0_i32 = arith.constant 0 : i32
    %c0_i32_0 = arith.constant 0 : i32
    return %arg0, %arg1, %c0_i32 : i32, i32, i32
  }
  func.func @transform_3(%arg0: i32, %arg1: i32) -> (i32, i32) {
    %c0_i32 = arith.constant 0 : i32
    %c0_i32_0 = arith.constant 0 : i32
    %c0_i32_1 = arith.constant 0 : i32
    return %c0_i32, %c0_i32_0 : i32, i32
  }
  func.func @transform_4(%arg0: i32, %arg1: i32) -> (i32, i32) {
    %c0_i32 = arith.constant 0 : i32
    %c0_i32_0 = arith.constant 0 : i32
    %c0_i32_1 = arith.constant 0 : i32
    return %c0_i32, %c0_i32_0 : i32, i32
  }
  func.func @transform_5(%arg0: i32, %arg1: i32) -> (i32, i32) {
    %c0_i32 = arith.constant 0 : i32
    %c0_i32_0 = arith.constant 0 : i32
    %c0_i32_1 = arith.constant 0 : i32
    return %c0_i32, %c0_i32_0 : i32, i32
  }
  func.func @transform_6(%arg0: i32, %arg1: i32) -> (i32, i32) {
    %c0_i32 = arith.constant 0 : i32
    %c0_i32_0 = arith.constant 0 : i32
    %c0_i32_1 = arith.constant 0 : i32
    return %c0_i32, %c0_i32_0 : i32, i32
  }
  func.func @transform_7(%arg0: i32, %arg1: i32) -> (i32, i32, i32) {
    %c0_i32 = arith.constant 0 : i32
    %c0_i32_0 = arith.constant 0 : i32
    return %arg0, %arg1, %c0_i32 : i32, i32, i32
  }
}

module attributes {stable_mosaic.version = 11 : i64} {
  func.func @kernel(%arg0: i32, %arg1: i32, %arg2: memref<1x16x96xbf16, #tpu.memory_space<vmem>>, %arg3: memref<1x8x96xbf16, #tpu.memory_space<vmem>>, %arg4: memref<1x16x96xbf16, #tpu.memory_space<vmem>>, %arg5: memref<96x64xbf16, #tpu.memory_space<vmem>>, %arg6: memref<96x64xbf16, #tpu.memory_space<vmem>>, %arg7: memref<96x64xbf16, #tpu.memory_space<vmem>>, %arg8: memref<1x64xf32, #tpu.memory_space<vmem>>, %arg9: memref<64x64xf32, #tpu.memory_space<vmem>>, %arg10: memref<1x64xf32, #tpu.memory_space<vmem>>, %arg11: memref<1x16x64xf32, #tpu.memory_space<vmem>>) attributes {dimension_semantics = [#tpu.dimension_semantics<parallel>, #tpu.dimension_semantics<parallel>], iteration_bounds = array<i64: 2, 2>, scalar_prefetch = 0 : i64, scratch_operands = 0 : i64, tpu.core_type = #tpu.core_type<tc>, window_params = [{transform_indices = @transform_0, window_bounds = array<i64: 1, 16, 96>}, {transform_indices = @transform_1, window_bounds = array<i64: 1, 8, 96>}, {transform_indices = @transform_2, window_bounds = array<i64: 1, 16, 96>}, {pipeline_mode = #tpu.pipeline_mode<synchronous>, transform_indices = @transform_3, window_bounds = array<i64: 96, 64>}, {pipeline_mode = #tpu.pipeline_mode<synchronous>, transform_indices = @transform_4, window_bounds = array<i64: 96, 64>}, {pipeline_mode = #tpu.pipeline_mode<synchronous>, transform_indices = @transform_5, window_bounds = array<i64: 96, 64>}, {pipeline_mode = #tpu.pipeline_mode<synchronous>, transform_indices = @transform_6, window_bounds = array<i64: 1, 64>}, {pipeline_mode = #tpu.pipeline_mode<synchronous>, transform_indices = @transform_7, window_bounds = array<i64: 64, 64>}, {pipeline_mode = #tpu.pipeline_mode<synchronous>, transform_indices = @transform_8, window_bounds = array<i64: 1, 64>}, {transform_indices = @transform_9, window_bounds = array<i64: 1, 16, 64>}]} {
    %c0 = arith.constant 0 : index
    %c0_0 = arith.constant 0 : index
    %c0_1 = arith.constant 0 : index
    %0 = vector.load %arg2[%c0, %c0_0, %c0_1] : memref<1x16x96xbf16, #tpu.memory_space<vmem>>, vector<1x16x96xbf16>
    %1 = vector.shape_cast %0 : vector<1x16x96xbf16> to vector<16x96xbf16>
    %c0_2 = arith.constant 0 : index
    %c0_3 = arith.constant 0 : index
    %c0_4 = arith.constant 0 : index
    %2 = vector.load %arg4[%c0_2, %c0_3, %c0_4] : memref<1x16x96xbf16, #tpu.memory_space<vmem>>, vector<1x16x96xbf16>
    %3 = vector.shape_cast %2 : vector<1x16x96xbf16> to vector<16x96xbf16>
    %c0_5 = arith.constant 0 : index
    %c0_6 = arith.constant 0 : index
    %4 = vector.load %arg7[%c0_5, %c0_6] : memref<96x64xbf16, #tpu.memory_space<vmem>>, vector<96x64xbf16>
    %c0_7 = arith.constant 0 : index
    %c0_8 = arith.constant 0 : index
    %5 = vector.load %arg8[%c0_7, %c0_8] : memref<1x64xf32, #tpu.memory_space<vmem>>, vector<1x64xf32>
    %c0_9 = arith.constant 0 : index
    %c0_10 = arith.constant 0 : index
    %6 = vector.load %arg5[%c0_9, %c0_10] : memref<96x64xbf16, #tpu.memory_space<vmem>>, vector<96x64xbf16>
    %cst = arith.constant dense<0.000000e+00> : vector<16x64xf32>
    %7 = tpu.matmul %1, %6, %cst {dimension_numbers = #tpu.dot_dimension_numbers<[1], [0], [0], [1], [0, 0, 1, 1], [], []>} : vector<16x96xbf16>, vector<96x64xbf16>, vector<16x64xf32> -> vector<16x64xf32>
    %c0_11 = arith.constant 0 : index
    %c0_12 = arith.constant 0 : index
    %8 = vector.load %arg6[%c0_11, %c0_12] : memref<96x64xbf16, #tpu.memory_space<vmem>>, vector<96x64xbf16>
    %cst_13 = arith.constant dense<0.000000e+00> : vector<16x64xf32>
    %9 = tpu.matmul %3, %8, %cst_13 {dimension_numbers = #tpu.dot_dimension_numbers<[1], [0], [0], [1], [0, 0, 1, 1], [], []>} : vector<16x96xbf16>, vector<96x64xbf16>, vector<16x64xf32> -> vector<16x64xf32>
    %10 = arith.addf %7, %9 : vector<16x64xf32>
    %11 = vector.extract_strided_slice %10 {offsets = [0, 0], sizes = [8, 64], strides = [1, 1]} : vector<16x64xf32> to vector<8x64xf32>
    %12 = vector.extract_strided_slice %1 {offsets = [8, 0], sizes = [8, 96], strides = [1, 1]} : vector<16x96xbf16> to vector<8x96xbf16>
    %cst_14 = arith.constant dense<0.000000e+00> : vector<8x64xf32>
    %13 = tpu.matmul %12, %4, %cst_14 {dimension_numbers = #tpu.dot_dimension_numbers<[1], [0], [0], [1], [0, 0, 1, 1], [], []>} : vector<8x96xbf16>, vector<96x64xbf16>, vector<8x64xf32> -> vector<8x64xf32>
    %14 = arith.addf %11, %13 : vector<8x64xf32>
    %15 = vector.broadcast %5 : vector<1x64xf32> to vector<8x64xf32>
    %16 = arith.addf %14, %15 : vector<8x64xf32>
    %cst_15 = arith.constant 0.000000e+00 : f32
    %17 = vector.broadcast %cst_15 : f32 to vector<8x64xf32>
    %18 = arith.cmpf oge, %16, %17 : vector<8x64xf32>
    %cst_16 = arith.constant 1.000000e-01 : f32
    %19 = vector.broadcast %cst_16 : f32 to vector<8x64xf32>
    %20 = arith.mulf %19, %16 : vector<8x64xf32>
    %21 = arith.select %18, %16, %20 : vector<8x64xi1>, vector<8x64xf32>
    %c0_17 = arith.constant 0 : index
    %c0_18 = arith.constant 0 : index
    %22 = vector.load %arg9[%c0_17, %c0_18] : memref<64x64xf32, #tpu.memory_space<vmem>>, vector<64x64xf32>
    %cst_19 = arith.constant dense<0.000000e+00> : vector<8x64xf32>
    %23 = tpu.matmul %21, %22, %cst_19 {dimension_numbers = #tpu.dot_dimension_numbers<[1], [0], [0], [1], [0, 0, 1, 1], [], []>} : vector<8x64xf32>, vector<64x64xf32>, vector<8x64xf32> -> vector<8x64xf32>
    %c0_20 = arith.constant 0 : index
    %c0_21 = arith.constant 0 : index
    %24 = vector.load %arg10[%c0_20, %c0_21] : memref<1x64xf32, #tpu.memory_space<vmem>>, vector<1x64xf32>
    %25 = vector.broadcast %24 : vector<1x64xf32> to vector<8x64xf32>
    %26 = arith.addf %23, %25 : vector<8x64xf32>
    %c0_22 = arith.constant 0 : index
    %c0_23 = arith.constant 0 : index
    %c0_24 = arith.constant 0 : index
    %27 = vector.load %arg11[%c0_22, %c0_23, %c0_24] : memref<1x16x64xf32, #tpu.memory_space<vmem>>, vector<1x8x64xf32>
    %28 = vector.shape_cast %27 : vector<1x8x64xf32> to vector<8x64xf32>
    %29 = vector.shape_cast %26 : vector<8x64xf32> to vector<1x8x64xf32>
    tpu.vector_store %arg11[%c0_22, %c0_23, %c0_24], %29 {strides = array<i32>} : memref<1x16x64xf32, #tpu.memory_space<vmem>>, vector<1x8x64xf32>,
    %30 = vector.extract_strided_slice %10 {offsets = [8, 0], sizes = [8, 64], strides = [1, 1]} : vector<16x64xf32> to vector<8x64xf32>
    %c0_25 = arith.constant 0 : index
    %c0_26 = arith.constant 0 : index
    %c0_27 = arith.constant 0 : index
    %31 = vector.load %arg3[%c0_25, %c0_26, %c0_27] : memref<1x8x96xbf16, #tpu.memory_space<vmem>>, vector<1x8x96xbf16>
    %32 = vector.shape_cast %31 : vector<1x8x96xbf16> to vector<8x96xbf16>
    %cst_28 = arith.constant dense<0.000000e+00> : vector<8x64xf32>
    %33 = tpu.matmul %32, %4, %cst_28 {dimension_numbers = #tpu.dot_dimension_numbers<[1], [0], [0], [1], [0, 0, 1, 1], [], []>} : vector<8x96xbf16>, vector<96x64xbf16>, vector<8x64xf32> -> vector<8x64xf32>
    %34 = arith.addf %30, %33 : vector<8x64xf32>
    %35 = vector.broadcast %5 : vector<1x64xf32> to vector<8x64xf32>
    %36 = arith.addf %34, %35 : vector<8x64xf32>
    %cst_29 = arith.constant 0.000000e+00 : f32
    %37 = vector.broadcast %cst_29 : f32 to vector<8x64xf32>
    %38 = arith.cmpf oge, %36, %37 : vector<8x64xf32>
    %cst_30 = arith.constant 1.000000e-01 : f32
    %39 = vector.broadcast %cst_30 : f32 to vector<8x64xf32>
    %40 = arith.mulf %39, %36 : vector<8x64xf32>
    %41 = arith.select %38, %36, %40 : vector<8x64xi1>, vector<8x64xf32>
    %c0_31 = arith.constant 0 : index
    %c0_32 = arith.constant 0 : index
    %42 = vector.load %arg9[%c0_31, %c0_32] : memref<64x64xf32, #tpu.memory_space<vmem>>, vector<64x64xf32>
    %cst_33 = arith.constant dense<0.000000e+00> : vector<8x64xf32>
    %43 = tpu.matmul %41, %42, %cst_33 {dimension_numbers = #tpu.dot_dimension_numbers<[1], [0], [0], [1], [0, 0, 1, 1], [], []>} : vector<8x64xf32>, vector<64x64xf32>, vector<8x64xf32> -> vector<8x64xf32>
    %c0_34 = arith.constant 0 : index
    %c0_35 = arith.constant 0 : index
    %44 = vector.load %arg10[%c0_34, %c0_35] : memref<1x64xf32, #tpu.memory_space<vmem>>, vector<1x64xf32>
    %45 = vector.broadcast %44 : vector<1x64xf32> to vector<8x64xf32>
    %46 = arith.addf %43, %45 : vector<8x64xf32>
    %c0_36 = arith.constant 0 : index
    %c8 = arith.constant 8 : index
    %c0_37 = arith.constant 0 : index
    %47 = vector.load %arg11[%c0_36, %c8, %c0_37] : memref<1x16x64xf32, #tpu.memory_space<vmem>>, vector<1x8x64xf32>
    %48 = vector.shape_cast %47 : vector<1x8x64xf32> to vector<8x64xf32>
    %49 = vector.shape_cast %46 : vector<8x64xf32> to vector<1x8x64xf32>
    tpu.vector_store %arg11[%c0_36, %c8, %c0_37], %49 {strides = array<i32>} : memref<1x16x64xf32, #tpu.memory_space<vmem>>, vector<1x8x64xf32>,
    return
  }
  func.func @transform_0(%arg0: i32, %arg1: i32) -> (i32, i32, i32) {
    %c0_i32 = arith.constant 0 : i32
    %c0_i32_0 = arith.constant 0 : i32
    return %arg0, %arg1, %c0_i32 : i32, i32, i32
  }
  func.func @transform_1(%arg0: i32, %arg1: i32) -> (i32, i32, i32) {
    %c1_i32 = arith.constant 1 : i32
    %0 = arith.addi %arg1, %c1_i32 : i32
    %c2_i32 = arith.constant 2 : i32
    %1 = arith.muli %0, %c2_i32 : i32
    %c0_i32 = arith.constant 0 : i32
    %c0_i32_0 = arith.constant 0 : i32
    return %arg0, %1, %c0_i32 : i32, i32, i32
  }
  func.func @transform_2(%arg0: i32, %arg1: i32) -> (i32, i32, i32) {
    %c0_i32 = arith.constant 0 : i32
    %c0_i32_0 = arith.constant 0 : i32
    return %arg0, %arg1, %c0_i32 : i32, i32, i32
  }
  func.func @transform_3(%arg0: i32, %arg1: i32) -> (i32, i32) {
    %c0_i32 = arith.constant 0 : i32
    %c0_i32_0 = arith.constant 0 : i32
    %c0_i32_1 = arith.constant 0 : i32
    return %c0_i32, %c0_i32_0 : i32, i32
  }
  func.func @transform_4(%arg0: i32, %arg1: i32) -> (i32, i32) {
    %c0_i32 = arith.constant 0 : i32
    %c0_i32_0 = arith.constant 0 : i32
    %c0_i32_1 = arith.constant 0 : i32
    return %c0_i32, %c0_i32_0 : i32, i32
  }
  func.func @transform_5(%arg0: i32, %arg1: i32) -> (i32, i32) {
    %c0_i32 = arith.constant 0 : i32
    %c0_i32_0 = arith.constant 0 : i32
    %c0_i32_1 = arith.constant 0 : i32
    return %c0_i32, %c0_i32_0 : i32, i32
  }
  func.func @transform_6(%arg0: i32, %arg1: i32) -> (i32, i32) {
    %c0_i32 = arith.constant 0 : i32
    %c0_i32_0 = arith.constant 0 : i32
    %c0_i32_1 = arith.constant 0 : i32
    return %c0_i32, %c0_i32_0 : i32, i32
  }
  func.func @transform_7(%arg0: i32, %arg1: i32) -> (i32, i32) {
    %c0_i32 = arith.constant 0 : i32
    %c0_i32_0 = arith.constant 0 : i32
    %c0_i32_1 = arith.constant 0 : i32
    return %c0_i32, %c0_i32_0 : i32, i32
  }
  func.func @transform_8(%arg0: i32, %arg1: i32) -> (i32, i32) {
    %c0_i32 = arith.constant 0 : i32
    %c0_i32_0 = arith.constant 0 : i32
    %c0_i32_1 = arith.constant 0 : i32
    return %c0_i32, %c0_i32_0 : i32, i32
  }
  func.func @transform_9(%arg0: i32, %arg1: i32) -> (i32, i32, i32) {
    %c0_i32 = arith.constant 0 : i32
    %c0_i32_0 = arith.constant 0 : i32
    return %arg0, %arg1, %c0_i32 : i32, i32, i32
  }
}

</mosaic_0001>

<bundles_post_ra>
// kernel: _lambda_.3
= control target key start
LH: loop header
LB: loop body
LE: loop exit
PB: predicated region body
PF: predicated region fallthrough
CT: control target
= control target key end

     0   :  { %s2388_s0 = inlined_call_operand.hbm [shape: bf16[2,136,24], index: 0, kind: input, shape index: {}, may-alias: {0,1}]   ;;  %s2389_s1 = inlined_call_operand.hbm [shape: bf16[2,136,24], index: 1, kind: input, shape index: {}, may-alias: {0,1}]   ;;  %s2390_s2 = inlined_call_operand.hbm [shape: bf16[2,128,24], index: 2, kind: input, shape index: {}]   ;;  %s2391_s3 = inlined_call_operand.hbm [shape: bf16[24,64], index: 3, kind: input, shape index: {}]   ;;  %s2392_s4 = inlined_call_operand.hbm [shape: bf16[24,64], index: 4, kind: input, shape index: {}]   ;;  %s2393_s5 = inlined_call_operand.hbm [shape: bf16[24,64], index: 5, kind: input, shape index: {}]   ;;  %s2394_s6 = inlined_call_operand.hbm [shape: f32[1,64], index: 6, kind: input, shape index: {}]   ;;  %s2395_s7 = inlined_call_operand.hbm [shape: bf16[2,128,64], index: 7, kind: output, shape index: {}]  }
   0x1   :  { %2420 = sst [smem:[#allocation35_spill]] %s2390_s2 }
   0x2   :  { %2421 = sst [smem:[#allocation36_spill]] %s2395_s7 }
   0x3   :  { %12 = vsyncpa [#allocation3], 0 }
   0x4   :  { %14 = vsyncpa [#allocation3 + $0x1], 0 }
   0x5   :  { %15 = vsyncpa [#allocation6], 0 }
   0x6   :  { %17 = vsyncpa [#allocation6 + $0x1], 0 }
   0x7   :  { %18 = vsyncpa [#allocation9], 0 }
   0x8   :  { %19 = vsyncpa [#allocation12], 0 }
   0x9   :  { %20 = vsyncpa [#allocation4], 0 }
   0xa   :  { %22 = vsyncpa [#allocation4 + $0x1], 0  ;;  %s1872_s24 = smov 0   ;;  %s1874_s25 = smov 0  }
   0xb   :  { %s1876_s26 = smov 0   ;;  %s1878_s27 = smov 0  }
   0xc   :  { %s1880_s28 = smov 0   ;;  %s1882_s29 = smov 0  }
   0xd   :  { %s1884_s30 = smov 0   ;;  %s1886_s8 = smov 0  }
   0xe   :  { %s1888_s9 = smov 0   ;;  %s1890_s10 = smov 0  }
   0xf   :  { %s1892_s11 = smov 0  }
  0x10 LB: > { %2422 = sst [smem:[#allocation21_spill]] %s1776_s25  ;;  %s1928_s12 = sadd.s32 4294967295, %s1812_s11   ;;  %s1812_s11 = sphi %s1892_s11, %s28_s11   ;;  %s1808_s10 = sphi %s1890_s10, %s2483_s10   ;;  %s1804_s9 = sphi %s1888_s9, %s2475_s9   ;;  %s1800_s8 = sphi %s1886_s8, %s2482_s8   ;;  %s1796_s30 = sphi %s1884_s30, %s2474_s30   ;;  %s1792_s29 = sphi %s1882_s29, %s2481_s29   ;;  %s1788_s28 = sphi %s1880_s28, %s2480_s28   ;;  %s1784_s27 = sphi %s1878_s27, %s2479_s27   ;;  %s1780_s26 = sphi %s1876_s26, %s2478_s26   ;;  %s1776_s25 = sphi %s1874_s25, %s2477_s25   ;;  %s1772_s24 = sphi %s1872_s24, %s2471_s24  }
  0x11   : > { %2423 = sst [smem:[#allocation22_spill]] %s1784_s27  ;;  %s37_s14 = sadd.s32 1, %s1804_s9 }
  0x12   : > { %2424 = sst [smem:[#allocation23_spill]] %s1796_s30  ;;  %s40_s15 = sadd.s32 1, %s1808_s10 }
  0x13   : > { %2425 = sst [smem:[#allocation24_spill]] %s1800_s8  ;;  %p38_p0 = scmp.ge.s32.totalorder %s37_s14, 2 }
  0x14   : > { %2426 = sst [smem:[#allocation25_spill]] %s1804_s9  ;;  %s49_s16 = sadd.s32 1, %s1792_s29 }
  0x15   : > { %2427 = sst [smem:[#allocation26_spill]] %s1928_s12  ;;  %p56_p1 = scmp.ne.s32.totalorder %s1792_s29, %s1788_s28 }
  0x16   : > { %p57_p2 = scmp.eq.s32.totalorder %s1812_s11, 0  ;;  %s2485_s14 = smov (%p38_p0, %s37_s14), 0 }
  0x17   : > { %2428 = sst [smem:[#allocation27_spill]] %s2485_s14  ;;  %s2487_s15 = smov (!%p38_p0, %s40_s15), %s1808_s10 }
  0x18   : > { %s45_s17 = ssub.s32 %s1804_s9, %s2485_s14  ;;  %p1947_p3 = por %p57_p2, %p56_p1 }
  0x19   : > { %p42_p4 = scmp.ge.s32.totalorder %s2487_s15, 2  ;;  %p2400_p5 = scmp.ne.s32.totalorder %s1788_s28, %s1784_s27 }
  0x1a   : > { %s2429_s18 = scalar_select %p1947_p3, 1, 0 }
  0x1b   : > { %p2408_p6 = scmp.eq.s32.totalorder %s1928_s12, 0  ;;  %s1955_s19 = sshll.u32 %s1804_s9, 3 }
  0x1c   : > { %s2489_s15 = smov (%p42_p4, %s2487_s15), 0  ;;  %s1215_s21 = sadd.s32 8, %s1955_s19 }
  0x1d   : > { %2430 = sst [smem:[#allocation28_spill]] %s2489_s15  ;;  %p1964_p7 = por %p2408_p6, %p2400_p5 }
  0x1e   : > { %s44_s22 = ssub.s32 %s1808_s10, %s2489_s15  ;;  %s1216_s23 = sshll.u32 %s2485_s14, 3 }
  0x1f   : > { %s2431_s20 = scalar_select %p1964_p7, 1, 0 }
  0x20   : > { %s46_s13 = sor.u32 %s45_s17, %s44_s22  ;;  %s1217_s9 = sadd.s32 8, %s1216_s23 }
  0x21   : > { %2432 = sst [smem:[#allocation29_spill]] %s2431_s20  ;;  %p47_p8 = scmp.eq.s32.totalorder %s46_s13, 0 }
  0x22   : > { %s77_s7 = ssub.s32 %s1215_s21, %s1217_s9  ;;  %s81_s30 = sadd.s32 1, %s1780_s26 }
  0x23   : > { %s78_s8 = sor.u32 %s77_s7, %s44_s22  ;;  %p88_p10 = scmp.ne.s32.totalorder %s1780_s26, %s1776_s25 }
  0x24   : > { %s1974_s2 = scalar_select %p47_p8, %s1792_s29, %s49_s16  }
  0x25   : > { %p79_p9 = scmp.eq.s32.totalorder %s78_s8, 0  ;;  %p94_p11 = scmp.ne.s32.totalorder %s1776_s25, %s1772_s24 }
  0x26   : > { %2433 = sst [smem:[#allocation30_spill]] %s1974_s2  ;;  %p232_p12 = scmp.eq.s32.totalorder %s1928_s12, 3 }
  0x27   : > { %s1982_s15 = scalar_select %p79_p9, %s1780_s26, %s81_s30  }
  0x28   : > { %p1986_p13 = por %p88_p10, %p57_p2  ;;  %p1992_p0 = por %p94_p11, %p2408_p6 }
  0x29   : > { %2434 = sst [smem:[#allocation31_spill]] %s1982_s15  ;;  %p1999_p4 = por %p232_p12, %p56_p1 }
  0x2a   : > { %s2435_s17 = scalar_select %p1986_p13, 1, 0 }
  0x2b   : > { %s2436_s13 = scalar_select %p1992_p0, 1, 0 }
  0x2c   : > { %s2438_s7 = scalar_select %p1999_p4, 1, 0 }
  0x2d   : > { %2437 = sst [smem:[#allocation32_spill]] %s2436_s13  ;;  %s2440_s8 = sadd.s32 4294967294, %s1812_s11  }
  0x2e   : > { %2439 = sst [smem:[#allocation33_spill]] %s2438_s7  ;;  %p238_p8 = scmp.eq.s32.totalorder %s2440_s8, 3 }
  0x2f   : > { %p1140_p5 = scmp.ge.s32.totalorder %s1812_s11, 1  ;;  %p245_p9 = scmp.lt.s32.totalorder %s1812_s11, 5 }
  0x30   : > { %p2441_p7 = scmp.ne.s32.totalorder %s1788_s28, %s1784_s27  ;;  %s1814_s9 = smov [#allocation8]  }
  0x31   : > { %p2014_p2 = pnand %p1140_p5, %p245_p9  ;;  %s257_s16 = sshll.u32 %s1814_s9, 4  ;;  %s2020_s16 = int_to_ptr.vmem [resolvable:$true] %s257_s16 }
  0x32   : > { %p2010_p3 = por %p238_p8, %p2441_p7  ;;  %s1815_s22 = smov [#allocation11]  }
  0x33   : > { %s2444_s30 = scalar_select %p2014_p2, 1, 0 }
  0x34   : > { %s2442_s24 = scalar_select %p2010_p3, 1, 0 }
  0x35   : > { %p1329_p1 = pneg %p2014_p2  ;;  %s283_s23 = sshll.u32 %s1815_s22, 4  ;;  %s2028_s23 = int_to_ptr.vmem [resolvable:$true] %s283_s23 }
  0x36   : > { %2443 = sst [smem:[#allocation34_spill]] %s2442_s24  ;;  %s1816_s8 = smov [#allocation10]  }
  0x37   : > { %p2024_p10 = pnand %p1329_p1, %p2408_p6  ;;  %s2030_s14 = sshll.u32 %s1816_s8, 4  ;;  %s271_s14 = int_to_ptr.vmem [resolvable:$true] %s2030_s14 }
  0x38   : > { %s1475_s9 = scalar_lea.hbm %s2391_s3, 192 }
  0x39   : > { %p1476_p5 = scmp.ne.s32.totalorder %s2391_s3, %s1475_s9  ;;  %p2040_p7 = pneg %p2024_p10 }
  0x3a   : > { %p1482_p8 = scmp.lt.u32.totalorder %s1475_s9, %s2391_s3 }
  0x3b   : > { %p1478_p11 = pnand %p2040_p7, %p1476_p5 }
  0x3d   : > { %p1479_p12 = pneg %p1478_p11 }
  0x3f   : > { %p1484_p9 = pnand %p1482_p8, %p1479_p12 }
  0x41   : > { %1487 = shalt.err (!%p1484_p9)
}
  0x42   : > { %s1488_s2 = scalar_lea.vmem %s2020_s16, 192  ;;  %p1496_p4 = scmp.lt.s32.totalorder %s2020_s16, %s2020_s16 }
  0x43   : > { %p1489_p1 = scmp.ne.s32.totalorder %s2020_s16, %s1488_s2  ;;  %p1497_p0 = scmp.lt.s32.totalorder %s1488_s2, %s1488_s2 }
  0x45   : > { %p1491_p6 = pnand %p1489_p1, %p2040_p7  ;;  %p1498_p5 = por %p1497_p0, %p1496_p4 }
  0x47   : > { %p1492_p3 = pneg %p1491_p6 }
  0x49   : > { %p1499_p11 = pnand %p1498_p5, %p1492_p3 }
  0x4b   : > { %1502 = shalt.err (!%p1499_p11)
}
  0x4c   : > { %s1817_s27 = smov 64   ;;  %s1818_s15 = smov 4  }
  0x4d   : > { %1332 = dma.hbm_to_vmem [thread:$0]  (!%p2024_p10), %s2391_s3, 192, %s2020_s16, [#allocation9], %s1817_s27, %s1817_s27, %s1818_s15  }
  0x4e   : > { %s1503_s2 = scalar_lea.hbm %s2393_s5, 192 }
  0x4f   : > { %p1504_p3 = scmp.ne.s32.totalorder %s2393_s5, %s1503_s2  ;;  %p1510_p4 = scmp.lt.u32.totalorder %s1503_s2, %s2393_s5 }
  0x51   : > { %p1506_p6 = pnand %p1504_p3, %p2040_p7 }
  0x53   : > { %p1507_p0 = pneg %p1506_p6 }
  0x55   : > { %p1512_p12 = pnand %p1510_p4, %p1507_p0 }
  0x57   : > { %1515 = shalt.err (!%p1512_p12)
}
  0x58   : > { %s1516_s16 = scalar_lea.vmem %s2028_s23, 192  ;;  %p1524_p5 = scmp.lt.s32.totalorder %s2028_s23, %s2028_s23 }
  0x59   : > { %p1517_p8 = scmp.ne.s32.totalorder %s2028_s23, %s1516_s16  ;;  %p1525_p11 = scmp.lt.s32.totalorder %s1516_s16, %s1516_s16 }
  0x5b   : > { %p1519_p9 = pnand %p1517_p8, %p2040_p7  ;;  %p1526_p3 = por %p1525_p11, %p1524_p5 }
  0x5d   : > { %p1520_p1 = pneg %p1519_p9 }
  0x5f   : > { %p1527_p6 = pnand %p1526_p3, %p1520_p1 }
  0x61   : > { %1530 = shalt.err (!%p1527_p6)
}
  0x62   : > { %1338 = dma.hbm_to_vmem [thread:$0]  (!%p2024_p10), %s2393_s5, 192, %s2028_s23, [#allocation12], %s1817_s27, %s1817_s27, %s1818_s15  }
  0x63   : > { %s1531_s24 = scalar_lea.hbm %s2392_s4, 192 }
  0x64   : > { %p1532_p0 = scmp.ne.s32.totalorder %s2392_s4, %s1531_s24  ;;  %p1538_p8 = scmp.lt.u32.totalorder %s1531_s24, %s2392_s4 }
  0x66   : > { %p1534_p4 = pnand %p1532_p0, %p2040_p7 }
  0x68   : > { %p1535_p12 = pneg %p1534_p4 }
  0x6a   : > { %p1540_p9 = pnand %p1538_p8, %p1535_p12 }
  0x6c   : > { %1543 = shalt.err (!%p1540_p9)
}
  0x6d   : > { %s1544_s16 = scalar_lea.vmem %s271_s14, 192  ;;  %p1552_p3 = scmp.lt.s32.totalorder %s271_s14, %s271_s14 }
  0x6e   : > { %p1545_p1 = scmp.ne.s32.totalorder %s271_s14, %s1544_s16  ;;  %p1553_p6 = scmp.lt.s32.totalorder %s1544_s16, %s1544_s16 }
  0x70   : > { %p1547_p5 = pnand %p1545_p1, %p2040_p7  ;;  %p1554_p2 = por %p1553_p6, %p1552_p3 }
  0x72   : > { %p1548_p11 = pneg %p1547_p5 }
  0x74   : > { %p1555_p13 = pnand %p1554_p2, %p1548_p11 }
  0x76   : > { %1558 = shalt.err (!%p1555_p13)
}
  0x77   : > { %1335 = dma.hbm_to_vmem [thread:$0]  (!%p2024_p10), %s2392_s4, 192, %s271_s14, [#allocation9], %s1817_s27, %s1817_s27, %s1818_s15  }
  0x78   : > { %s1819_s12 = smov [#allocation13]   ;;  %s1559_s9 = scalar_lea.hbm %s2394_s6, 16 }
  0x79   : > { %s297_s20 = sshll.u32 %s1819_s12, 4  ;;  %p1560_p13 = scmp.ne.s32.totalorder %s2394_s6, %s1559_s9  ;;  %s298_s20 = int_to_ptr.vmem [resolvable:$true] %s297_s20 }
  0x7a   : > { %p1566_p4 = scmp.lt.u32.totalorder %s1559_s9, %s2394_s6 }
  0x7b   : > { %p1562_p2 = pnand %p1560_p13, %p2040_p7 }
  0x7d   : > { %p1563_p0 = pneg %p1562_p2 }
  0x7f   : > { %p1568_p12 = pnand %p1566_p4, %p1563_p0 }
  0x81   : > { %1571 = shalt.err (!%p1568_p12)
}
  0x82   : > { %s1572_s14 = scalar_lea.vmem %s298_s20, 16  ;;  %s1579_s27 = scalar_lea.vmem %s298_s20, 32 }
  0x83   : > { %p1573_p8 = scmp.ne.s32.totalorder %s298_s20, %s1572_s14  ;;  %p1580_p5 = scmp.lt.s32.totalorder %s298_s20, %s298_s20 }
  0x84   : > { %p1581_p11 = scmp.lt.s32.totalorder %s1579_s27, %s1572_s14 }
  0x85   : > { %p1575_p9 = pnand %p1573_p8, %p2040_p7 }
  0x86   : > { %p1582_p3 = por %p1581_p11, %p1580_p5 }
  0x87   : > { %p1576_p1 = pneg %p1575_p9 }
  0x89   : > { %p1583_p6 = pnand %p1582_p3, %p1576_p1 }
  0x8b   : > { %1586 = shalt.err (!%p1583_p6)
}
  0x8c   : > { %1341 = dma.hbm_to_vmem [thread:$0]  (!%p2024_p10), %s2394_s6, 16, %s298_s20, [#allocation12]  }
  0x8d   : > { %p1145_p13 = scmp.ge.s32.totalorder %s1812_s11, 4 }
  0x8e   : > { %p2447_p2 = scmp.ne.s32.totalorder (!%p1145_p13), %s2429_s18, 0 }
  0x8f   : > { %304 = sbr.rel (%p1145_p13) target bundleno = 240 (0xf0), region = 32 }
  0x96   : > { %307 = sbr.rel (!%p2447_p2) target bundleno = 179 (0xb3), region = 36  ;;  %s308_s7 = sand.u32 (%p2447_p2), 1, %s1792_s29  }
  0x97   : > { %s1146_s25 = sshll.u32 (%p2447_p2), %s308_s7, 5  ;;  %s2134_s12 = scalar_lea.sflag (%p2447_p2), [#allocation3], %s308_s7 }
  0x98   : > { %s312_s13 = scalar_lea.vmem (%p2447_p2), [#allocation2], %s1146_s25  ;;  %s1305_s24 = smul.u32 (%p2447_p2), 17, %s1808_s10 }
  0x99   : > { %s327_s21 = sshll.u32 (%p2447_p2), %s312_s13, 4  ;;  %s1591_s15 = scalar_lea.hbm (%p2447_p2), %s2388_s0, 2176  ;;  %s2138_s21 = int_to_ptr.vmem [resolvable:$true] %s327_s21 }
  0x9a   : > { %s323_s9 = sadd.s32 (%p2447_p2), %s1305_s24, %s1955_s19 }
  0x9b   : > { %s1150_s20 = sshll.u32 (%p2447_p2), %s323_s9, 6 }
  0x9c   : > { %s325_s2 = scalar_lea.hbm (%p2447_p2), %s2388_s0, %s1150_s20 }
  0x9d   : > { %s1587_s16 = scalar_lea.hbm %s325_s2, 512  ;;  %p1592_p7 = scmp.lt.u32.totalorder %s325_s2, %s2388_s0 }
  0x9e   : > { %p1588_p10 = scmp.ne.s32.totalorder %s325_s2, %s1587_s16  ;;  %p1593_p0 = scmp.lt.u32.totalorder %s1591_s15, %s1587_s16 }
  0x9f   : > { %p1595_p12 = scmp.lt.u32.totalorder %s1587_s16, %s325_s2 }
  0xa0   : > { %p1594_p4 = por %p1593_p0, %p1592_p7 }
  0xa2   : > { %p1596_p8 = por %p1595_p12, %p1594_p4 }
  0xa4   : > { %p1597_p9 = pnand %p1596_p8, %p1588_p10 }
  0xa6   : > { %1600 = shalt.err (!%p1597_p9)
}
  0xa7   : > { %s1601_s25 = scalar_lea.vmem %s2138_s21, 512  ;;  %s1820_s13 = smov [#allocation2]  }
  0xa8   : > { %p1602_p1 = scmp.ne.s32.totalorder %s2138_s21, %s1601_s25  ;;  %s1605_s24 = sshll.u32 %s1820_s13, 4  ;;  %s1606_s24 = int_to_ptr.vmem [resolvable:$false] %s1605_s24 }
  0xa9   : > { %s1607_s9 = scalar_lea.vmem %s1606_s24, 1024  ;;  %p1608_p5 = scmp.lt.s32.totalorder %s2138_s21, %s1606_s24 }
  0xaa   : > { %p1609_p11 = scmp.lt.s32.totalorder %s1607_s9, %s1601_s25 }
  0xac   : > { %p1610_p3 = por %p1609_p11, %p1608_p5 }
  0xae   : > { %p1611_p6 = pnand %p1610_p3, %p1602_p1 }
  0xb0   : > { %1614 = shalt.err (!%p1611_p6)
}
  0xb1   : > { %s1821_s20 = smov 64   ;;  %s1822_s22 = smov 4  }
  0xb2   : > { %333 = dma.hbm_to_vmem [thread:$0]  %s325_s2, 512, %s2138_s21, %s2134_s12, %s1821_s20, %s1821_s20, %s1822_s22  }
  0xb3 PF: > { %s337_s8 = sand.u32 1, %s1812_s11   ;;  %s339_s16 = sand.u32 1, %s1780_s26  }
  0xb4   : > { %s1153_s14 = sshll.u32 %s339_s16, 2  ;;  %s1002_s27 = smul.u32 17, %s1808_s10 }
  0xb5   : > { %s341_s15 = scalar_lea.vmem [#allocation5], %s1153_s14  ;;  %s361_s7 = sand.u32 1, %s1792_s29  }
  0xb6   : > { %s352_s23 = sshll.u32 %s341_s15, 4  ;;  %s1003_s25 = sadd.s32 %s1955_s19, %s1002_s27  ;;  %s2159_s23 = int_to_ptr.vmem [resolvable:$true] %s352_s23 }
  0xb7   : > { %s1155_s13 = sshll.u32 %s1003_s25, 6  ;;  %s2161_s12 = sshll.u32 %s361_s7, 5 }
  0xb8   : > { %s1005_s24 = scalar_lea.hbm %s2389_s1, %s1155_s13  ;;  %s1158_s20 = sshll.u32 %s1808_s10, 4 }
  0xb9   : > { %s2166_s9 = scalar_lea.hbm %s1005_s24, 512  ;;  %s2169_s22 = scalar_lea.sflag [#allocation6], %s337_s8 }
  0xba   : > { %s1643_s16 = scalar_lea.hbm %s1005_s24, 576  ;;  %p2448_p2 = scmp.ne.s32.totalorder %s2435_s17, 0 }
  0xbb   : > { %p1616_p13 = scmp.ne.s32.totalorder %s2166_s9, %s1643_s16  ;;  %s1619_s15 = scalar_lea.hbm %s2389_s1, 2176 }
  0xbc   : > { %p1620_p0 = scmp.lt.u32.totalorder %s2166_s9, %s2389_s1  ;;  %p1621_p4 = scmp.lt.u32.totalorder %s1619_s15, %s1643_s16 }
  0xbd   : > { %p1617_p10 = pnand %p1616_p13, %p2448_p2  ;;  %p1623_p8 = scmp.lt.u32.totalorder %s1643_s16, %s2166_s9 }
  0xbe   : > { %p1622_p12 = por %p1621_p4, %p1620_p0 }
  0xbf   : > { %p1618_p7 = pneg %p1617_p10 }
  0xc0   : > { %p1624_p9 = por %p1623_p8, %p1622_p12 }
  0xc2   : > { %p1625_p1 = pnand %p1624_p9, %p1618_p7 }
  0xc4   : > { %1628 = shalt.err (!%p1625_p1)
}
  0xc5   : > { %s1629_s8 = scalar_lea.vmem %s2159_s23, 64  ;;  %s1823_s13 = smov [#allocation5]  }
  0xc6   : > { %p1630_p5 = scmp.ne.s32.totalorder %s2159_s23, %s1629_s8  ;;  %s1633_s21 = sshll.u32 %s1823_s13, 4  ;;  %s1634_s21 = int_to_ptr.vmem [resolvable:$false] %s1633_s21 }
  0xc7   : > { %s1635_s2 = scalar_lea.vmem %s1634_s21, 128  ;;  %p1636_p6 = scmp.lt.s32.totalorder %s2159_s23, %s1634_s21 }
  0xc8   : > { %p1631_p11 = pnand %p1630_p5, %p2448_p2  ;;  %p1637_p13 = scmp.lt.s32.totalorder %s1635_s2, %s1629_s8 }
  0xca   : > { %p1632_p3 = pneg %p1631_p11  ;;  %p1638_p10 = por %p1637_p13, %p1636_p6 }
  0xcc   : > { %p1639_p0 = pnand %p1638_p10, %p1632_p3 }
  0xce   : > { %1642 = shalt.err (!%p1639_p0)
}
  0xcf   : > { %1314 = dma.hbm_to_vmem [thread:$0]  (%p2448_p2), %s2166_s9, 64, %s2159_s23, %s2169_s22  }
  0xd0   : > { %s369_s24 = sadd.s32 %s1955_s19, %s1158_s20  ;;  %s363_s16 = scalar_lea.vmem [#allocation7], %s2161_s12 }
  0xd1   : > { %s372_s14 = sshll.u32 %s363_s16, 4  ;;  %s1159_s27 = sshll.u32 %s369_s24, 6  ;;  %s2196_s14 = int_to_ptr.vmem [resolvable:$true] %s372_s14 }
  0xd2   : > { %s2449_s25 = sld [smem:[#allocation35_spill]]  ;;  %p2451_p4 = scmp.ne.s32.totalorder %s2429_s18, 0 }
  0xd8   : > { %s2450_s13 = smov %s2449_s25  ;;  %s2201_s8 = scalar_lea.hbm %s2449_s25, %s1159_s27 }
  0xd9   : > { %s1644_s17 = scalar_lea.hbm %s2201_s8, 512  ;;  %s1648_s12 = scalar_lea.hbm %s2450_s13, 2048 }
  0xda   : > { %p1645_p7 = scmp.ne.s32.totalorder %s2201_s8, %s1644_s17  ;;  %p1649_p8 = scmp.lt.u32.totalorder %s2201_s8, %s2450_s13 }
  0xdb   : > { %p1650_p9 = scmp.lt.u32.totalorder %s1648_s12, %s1644_s17  ;;  %p1652_p5 = scmp.lt.u32.totalorder %s1644_s17, %s2201_s8 }
  0xdc   : > { %p1646_p2 = pnand %p1645_p7, %p2451_p4 }
  0xdd   : > { %p1651_p1 = por %p1650_p9, %p1649_p8 }
  0xde   : > { %p1647_p12 = pneg %p1646_p2 }
  0xdf   : > { %p1653_p11 = por %p1652_p5, %p1651_p1 }
  0xe1   : > { %p1654_p3 = pnand %p1653_p11, %p1647_p12 }
  0xe3   : > { %1657 = shalt.err (!%p1654_p3)
}
  0xe4   : > { %s1658_s21 = scalar_lea.vmem %s2196_s14, 512  ;;  %s1824_s2 = smov [#allocation7]  }
  0xe5   : > { %p1659_p6 = scmp.ne.s32.totalorder %s2196_s14, %s1658_s21  ;;  %s1662_s24 = sshll.u32 %s1824_s2, 4  ;;  %s1663_s24 = int_to_ptr.vmem [resolvable:$false] %s1662_s24 }
  0xe6   : > { %s1664_s16 = scalar_lea.vmem %s1663_s24, 1024  ;;  %p1665_p0 = scmp.lt.s32.totalorder %s2196_s14, %s1663_s24 }
  0xe7   : > { %p1660_p13 = pnand %p1659_p6, %p2451_p4  ;;  %p1666_p7 = scmp.lt.s32.totalorder %s1664_s16, %s1658_s21 }
  0xe9   : > { %p1661_p10 = pneg %p1660_p13  ;;  %p1667_p2 = por %p1666_p7, %p1665_p0 }
  0xeb   : > { %p1668_p8 = pnand %p1667_p2, %p1661_p10 }
  0xed   : > { %1671 = shalt.err (!%p1668_p8)
}
  0xee   : > { %s1825_s27 = smov 64   ;;  %s1826_s15 = smov 4  }
  0xef   : > { %1315 = dma.hbm_to_vmem [thread:$0]  (%p2451_p4), %s2201_s8, 512, %s2196_s14, %s2169_s22, %s1825_s27, %s1825_s27, %s1826_s15  }
  0xf0 PF: > { %p2452_p12 = scmp.ne.s32.totalorder %s2444_s30, 0 }
  0xf1   : > { %s2453_s7 = sld [smem:[#allocation29_spill]] (!%p2452_p12)  ;;  %s2228_s25 = sand.u32 (!%p2452_p12), 1, %s1788_s28  }
  0xf2   : > { %384 = sbr.rel (%p2452_p12) target bundleno = 541 (0x21d), region = 48  ;;  %s2231_s17 = sshll.u32 (!%p2452_p12), %s2228_s25, 5 }
  0xf3   : > { %s387_s19 = scalar_lea.sflag (!%p2452_p12), [#allocation3], %s2228_s25  ;;  %s2235_s23 = scalar_lea.vmem (!%p2452_p12), [#allocation2], %s2231_s17 }
  0xf7   : > { %p2454_p9 = scmp.ne.s32.totalorder (!%p2452_p12), %s2453_s7, 0 }
  0xf9   : > { %1745 = dma.done.wait (%p2454_p9), %s387_s19, 512  }
  0xfa   : > { %1747 = vsyncadd (%p2454_p9), %s387_s19, 4294966784  ;;  %s2455_s18 = sld [smem:[#allocation26_spill]]  ;;  %s2456_s30 = sld [smem:[#allocation21_spill]] }
  0xfb   : > { %s2457_s22 = sld [smem:[#allocation32_spill]] }
 0x100   : > { %s395_s14 = sand.u32 1, %s2455_s18   ;;  %s397_s8 = sand.u32 1, %s2456_s30  }
 0x101   : > { %s2243_s12 = sshll.u32 %s397_s8, 2  ;;  %s396_s9 = scalar_lea.sflag [#allocation6], %s395_s14 }
 0x102   : > { %s399_s20 = scalar_lea.vmem [#allocation5], %s2243_s12  ;;  %p2458_p4 = scmp.ne.s32.totalorder %s2457_s22, 0 }
 0x104   : > { %1749 = dma.done.wait (%p2458_p4), %s396_s9, 64  }
 0x105   : > { %1751 = vsyncadd (%p2458_p4), %s396_s9, 4294967232  ;;  %s2251_s21 = scalar_lea.vmem [#allocation7], %s2231_s17 }
 0x106   : > { %1753 = dma.done.wait (%p2454_p9), %s396_s9, 512  }
 0x107   : > { %1755 = vsyncadd (%p2454_p9), %s396_s9, 4294966784  ;;  %p2459_p1 = scmp.eq.s32.totalorder %s2455_s18, 0 }
 0x109   : > { %1757 = dma.done.wait (%p2459_p1), [#allocation9], 384   ;;  %p2460_p5 = pmov %p2459_p1 }
 0x10a   : > { %p2461_p11 = pmov %p2459_p1 }
 0x10b   : > { %1759 = vsyncadd (%p2460_p5), [#allocation9], 4294966912 }
 0x10c   : > { %1761 = dma.done.wait (%p2461_p11), [#allocation12], 208   ;;  %p2462_p3 = pmov %p2459_p1 }
 0x10d   : > { %vm543_vm0 = vcmask 1043456   ;;  %v1457_v0 = vld [vmem:[#allocation10] sm:$0xff]   ;;  %vm530_vm1 = vcmask 195584   ;;  %v1458_v1 = vld [vmem:[#allocation8] sm:$0xff]   ;;  %v1459_v2 = vld [vmem:[#allocation10 + $0x8] ss:$0 sps:$4 sm:$0xff]  }
 0x10e   : > { %1763 = vsyncadd (%p2462_p3), [#allocation12], 4294967088  ;;  %1246 = vmatprep.subr.bf16.mxu1 %v1457_v0  ;;  %1258 = vmatprep.subr.bf16.mxu0 %v1458_v1  ;;  %v1460_v3 = vld [vmem:[#allocation8 + $0x8] ss:$0 sps:$4 sm:$0xff]   ;;  %v545_v4 = vsel %vm543_vm0, %v1459_v2, 0  ;;  %v1461_v5 = vld [vmem:[%s2251_s21] sm:$0xff]  }
 0x10f   : > { %1247 = vmatpush3.bf16.msra.mxu1 %v1457_v0  ;;  %1259 = vmatpush3.bf16.msra.mxu0 %v1458_v1  ;;  %v475_v6 = vld [vmem:[%s2235_s23] sm:$0xf]  ;;  %v476_v7 = vld [vmem:[%s2235_s23 + $0x4] sm:$0xf]  ;;  %v654_v8 = vsel %vm543_vm0, %v1460_v3, 0  ;;  %v1466_v12 = vld [vmem:[%s2251_s21 + $0x8] sm:$0xff]  }
 0x110   : > { %1302 = vmatprep.subr.msk.bf16.mxu1 %vm543_vm0, %v1459_v2  ;;  %1303 = vmatprep.subr.msk.bf16.mxu0 %vm543_vm0, %v1460_v3  ;;  %v477_v9 = vld [vmem:[%s2235_s23 + $0x8] sm:$0xf]  ;;  %v478_v10 = vld [vmem:[%s2235_s23 + $0xc] sm:$0xf]  ;;  %v1179_v11 = vcombine.low %v475_v6, %v476_v7  ;;  %v479_v13 = vld [vmem:[%s2235_s23 + $0x10] sm:$0xf] }
 0x111   : > { %1250 = vmatprep.mubr.msk.bf16.mxu1 %vm530_vm1, %v1461_v5  ;;  %v1180_v14 = vcombine.low %v477_v9, %v478_v10  ;;  %v1467_v15 = vld [vmem:[#allocation11] sm:$0xff]   ;;  %v1468_v16 = vld [vmem:[%s2251_s21 + $0x10] sm:$0xff]   ;;  %v1827_v17 = vmov 0.0   ;;  %v480_v18 = vld [vmem:[%s2235_s23 + $0x14] sm:$0xf]  ;;  %v1189_v26 = vcombine.low %v476_v7, %v477_v9  ;;  %vm1828_vm2 = vmmov 0  }
 0x112   : > { %1262 = vmatprep.mubr.msk.bf16.mxu0 %vm530_vm1, %v1179_v11  ;;  %v1181_v19 = vcombine.low %v479_v13, %v480_v18  ;;  %v1472_v20 = vld [vmem:[#allocation11 + $0x8] ss:$0 sps:$4 sm:$0xff]   ;;  %v481_v21 = vld [vmem:[%s2235_s23 + $0x18] sm:$0xf]  ;;  %v482_v22 = vld [vmem:[%s2235_s23 + $0x1c] sm:$0xf]  ;;  %v1190_v27 = vcombine.low %v478_v10, %v479_v13 }
 0x113   : > { %1249 = vmatpush3.bf16.msra.mxu1 %v545_v4  ;;  %1261 = vmatpush3.bf16.msra.mxu0 %v654_v8  ;;  %v747_v23 = vsel %vm543_vm0, %v1472_v20, 0  ;;  %v1470_v24 = vld [vmem:[%s2251_s21 + $0x18] sm:$0xff]   ;;  %v1182_v25 = vcombine.low %v481_v21, %v482_v22  ;;  %v1191_v29 = vcombine.low %v480_v18, %v481_v21  ;;  %v1192_v30 = vcombine.low %v482_v22, %v482_v22  ;;  %v1199_v47 = vld [vmem:[#allocation13] ss:$0 sm:$0xff]  ;;  %s2463_s2 = sld [smem:[#allocation23_spill]]  ;;  %s2464_s24 = sld [smem:[#allocation24_spill]] }
 0x114   : > { %1282 = vmatprep.subr.bf16.mxu1 %v1827_v17  ;;  %1270 = vmatprep.subr.bf16.mxu0 %v1467_v15  ;;  %v891_v28 = vld [vmem:[%s399_s20] sm:$0xf]  ;;  %vm883_vm5 = vcmask 519168   ;;  %s2299_s16 = scalar_lea.vmem [#allocation14], %s2231_s17  ;;  %s2465_s23 = sld [smem:[#allocation33_spill]] }
 0x115   : > { %s958_s19 = sshll.u32 %s2299_s16, 4  ;;  %s2466_s22 = sld [smem:[#allocation36_spill]]  ;;  %s2321_s19 = int_to_ptr.vmem [resolvable:$true] %s958_s19 }
 0x116   : > { %1251 = vmatmul.mubr.msk.bf16.vlgmr.msra.gmra.mrb[0].mxu1 %vm530_vm1, %v1466_v12  ;;  %1263 = vmatmul.mubr.msk.bf16.vlgmr.msra.gmra.mrb[0].mxu0 %vm530_vm1, %v1180_v14  ;;  %s943_s8 = scalar_lea.sflag [#allocation4], %s2228_s25  ;;  %s1672_s12 = scalar_lea.vmem %s2321_s19, 512 }
 0x117   : > { %1254 = vmatprep.mubr.msk.bf16.mxu1 %vm530_vm1, %v1468_v16  ;;  %1271 = vmatpush3.bf16.msra.mxu0 %v1467_v15  ;;  %p1673_p6 = scmp.ne.s32.totalorder %s2321_s19, %s1672_s12  ;;  %s1829_s9 = smov [#allocation14]  }
 0x118   : > { %1266 = vmatprep.mubr.msk.bf16.mxu0 %vm530_vm1, %v1181_v19  ;;  %1304 = vmatprep.subr.msk.bf16.mxu0 %vm543_vm0, %v1472_v20  ;;  %s1676_s20 = sshll.u32 %s1829_s9, 4  ;;  %s1677_s20 = int_to_ptr.vmem [resolvable:$false] %s1676_s20 }
 0x119   : > { %1283 = vmatpush3.bf16.msra.mxu1 %v1467_v15  ;;  %s1209_s27 = sshll.u32 %s2463_s2, 3  ;;  %s1210_s15 = sshll.u32 %s2464_s24, 4 }
 0x11a   : > { %1284 = vmatprep.subr.bf16.mxu1 %v1827_v17  ;;  %s955_s7 = sadd.s32 %s1210_s15, %s1209_s27  ;;  %p2467_p13 = scmp.ne.s32.totalorder %s2465_s23, 0 }
 0x11b   : > { %1273 = vmatpush3.bf16.msra.mxu0 %v747_v23  ;;  %s1211_s17 = sshll.u32 %s955_s7, 6  ;;  %s1678_s21 = scalar_lea.vmem %s1677_s20, 1024 }
 0x11c   : > { %s2319_s14 = scalar_lea.hbm %s2466_s22, %s1211_s17  ;;  %p1674_p10 = pnand %p1673_p6, %p2467_p13 }
 0x11d   : > { %1285 = vmatpush3.bf16.msra.mxu1 %v747_v23  ;;  %p1679_p7 = scmp.lt.s32.totalorder %s2321_s19, %s1677_s20  ;;  %p1680_p2 = scmp.lt.s32.totalorder %s1678_s21, %s1672_s12 }
 0x11e   : > { %1255 = vmatmul.mubr.msk.bf16.gmra.mrb[4].mxu1 %vm530_vm1, %v1470_v24  ;;  %1267 = vmatmul.mubr.msk.bf16.gmra.mrb[4].mxu0 %vm530_vm1, %v1182_v25  ;;  %p1675_p0 = pneg %p1674_p10 }
 0x11f   : > { %1286 = vmatprep.mubr.msk.bf16.mxu1 %vm1828_vm2, %v1827_v17  ;;  %1274 = vmatprep.mubr.msk.bf16.mxu0 %vm530_vm1, %v1189_v26  ;;  %p1681_p8 = por %p1680_p2, %p1679_p7 }
 0x121   : > { %p1682_p12 = pnand %p1681_p8, %p1675_p0 }
 0x126   : > { %1287 = vmatmul.mubr.msk.bf16.vlgmr.msra.gmra.mrb[8].mxu1 %vm530_vm1, %v891_v28  ;;  %1275 = vmatmul.mubr.msk.bf16.vlgmr.msra.gmra.mrb[0].mxu0 %vm530_vm1, %v1190_v27 }
 0x127   : > { %1278 = vmatprep.mubr.msk.bf16.mxu0 %vm530_vm1, %v1191_v29 }
 0x12e   : > { %1279 = vmatmul.mubr.msk.bf16.gmra.mrb[8].mxu0 %vm530_vm1, %v1192_v30 }
 0x1e9   : > { %v1252_v31 = vpop.f32.mrb[0].mxu1 }
 0x1ea   : > { %v581_v32 = vpop.f32.mrb[1].mxu1 }
 0x1eb   : > { %v1253_v33 = vpop.f32.mrb[2].mxu1 }
 0x1ec   : > { %v584_v34 = vpop.f32.mrb[3].mxu1 }
 0x1f1   : > { %v1256_v35 = vpop.f32.mrb[4].mxu1  ;;  %v1268_v36 = vpop.f32.mrb[4].mxu0 }
 0x1f2   : > { %v597_v37 = vpop.f32.mrb[5].mxu1  ;;  %v715_v38 = vadd.f32 %v1268_v36, %v1256_v35  ;;  %v706_v39 = vpop.f32.mrb[5].mxu0 }
 0x1f3   : > { %v1257_v40 = vpop.f32.mrb[6].mxu1  ;;  %v707_v41 = vadd.f32 %v706_v39, %v597_v37  ;;  %v1269_v42 = vpop.f32.mrb[6].mxu0 }
 0x1f4   : > { %v600_v43 = vpop.f32.mrb[7].mxu1  ;;  %v718_v44 = vadd.f32 %v1269_v42, %v1257_v40  ;;  %v709_v45 = vpop.f32.mrb[7].mxu0 }
 0x1f5   : > { %v710_v46 = vadd.f32 %v709_v45, %v600_v43 }
 0x1f9   : > { %v929_v48 = vpop.f32.mrb[8].mxu1  ;;  %v1276_v49 = vpop.f32.mrb[0].mxu0 }
 0x1fa   : > { %v935_v50 = vadd.f32 %v929_v48, %v718_v44  ;;  %v1288_v51 = vpop.f32.mrb[9].mxu1  ;;  %v1290_v52 = vadd.f32 %v1276_v49, %v1252_v31  ;;  %v783_v53 = vpop.f32.mrb[1].mxu0 }
 0x1fb   : > { %v932_v54 = vpop.f32.mrb[10].mxu1  ;;  %v1291_v56 = vadd.f32 %v783_v53, %v581_v32  ;;  %v1277_v57 = vpop.f32.mrb[2].mxu0 }
 0x1fc   : > { %v936_v55 = vadd.f32 %v1199_v47, %v935_v50  ;;  %v1289_v58 = vpop.f32.mrb[11].mxu1  ;;  %v828_v59 = vadd.f32 %v1290_v52, %v1199_v47  ;;  %v1292_v60 = vadd.f32 %v1277_v57, %v1253_v33  ;;  %v786_v61 = vpop.f32.mrb[3].mxu0 }
 0x1fd   : > { %v826_v63 = vadd.f32 %v1291_v56, %v1199_v47  ;;  %v1293_v0 = vadd.f32 %v786_v61, %v584_v34 }
 0x1fe   : > { %vm937_vm3 = vcmp.ge.f32.partialorder %v936_v55, 0.0  ;;  %v938_v62 = vmul.f32 0.1, %v936_v55  ;;  %vm835_vm4 = vcmp.ge.f32.partialorder %v828_v59, 0.0  ;;  %v842_v1 = vmul.f32 0.1, %v828_v59 }
 0x1ff   : > { %v829_v2 = vadd.f32 %v1292_v60, %v1199_v47  ;;  %vm833_vm6 = vcmp.ge.f32.partialorder %v826_v63, 0.0  ;;  %v840_v4 = vmul.f32 0.1, %v826_v63  ;;  %v827_v5 = vadd.f32 %v1293_v0, %v1199_v47 }
 0x200   : > { %v939_v3 = vsel %vm937_vm3, %v936_v55, %v938_v62  ;;  %v849_v6 = vsel %vm835_vm4, %v828_v59, %v842_v1 }
 0x201   : > { %v940_v7 = vpack.c.bf16 %v939_v3, %v939_v3  ;;  %vm836_vm7 = vcmp.ge.f32.partialorder %v829_v2, 0.0  ;;  %v843_v8 = vmul.f32 0.1, %v829_v2  ;;  %v1220_v9 = vpack.c.bf16 %v849_v6, %v849_v6  ;;  %v1280_v12 = vpop.f32.mrb[8].mxu0 }
 0x202   : > { %v847_v10 = vsel %vm833_vm6, %v826_v63, %v840_v4  ;;  %vm834_vm8 = vcmp.ge.f32.partialorder %v827_v5, 0.0  ;;  %v841_v11 = vmul.f32 0.1, %v827_v5  ;;  %v819_v15 = vadd.f32 %v1280_v12, %v715_v38  ;;  %v799_v16 = vpop.f32.mrb[9].mxu0 }
 0x203   : > { %941 = vst.msk [vmem:[%s2299_s16 + $0x1c] sm:$0xf] %vm883_vm5, %v940_v7  ;;  %v1218_v13 = vpack.c.bf16 %v847_v10, %v847_v10  ;;  %v850_v14 = vsel %vm836_vm7, %v829_v2, %v843_v8  ;;  %886 = vst.msk [vmem:[%s2299_s16 + $0x8] sm:$0xf] %vm883_vm5, %v1220_v9  ;;  %v817_v19 = vadd.f32 %v799_v16, %v707_v41  ;;  %v1281_v20 = vpop.f32.mrb[10].mxu0 }
 0x204   : > { %v1221_v17 = vpack.c.bf16 %v850_v14, %v850_v14  ;;  %v848_v18 = vsel %vm834_vm8, %v827_v5, %v841_v11  ;;  %v832_v22 = vadd.f32 %v1199_v47, %v819_v15  ;;  %v802_v23 = vpop.f32.mrb[11].mxu0 }
 0x205   : > { %884 = vst.msk [vmem:[%s2299_s16] sm:$0xf] %vm883_vm5, %v1218_v13  ;;  %v1219_v21 = vpack.c.bf16 %v848_v18, %v848_v18  ;;  %v830_v24 = vadd.f32 %v1199_v47, %v817_v19  ;;  %v818_v25 = vadd.f32 %v802_v23, %v710_v46 }
 0x206   : > { %887 = vst.msk [vmem:[%s2299_s16 + $0xc] sm:$0xf] %vm883_vm5, %v1221_v17  ;;  %vm839_vm9 = vcmp.ge.f32.partialorder %v832_v22, 0.0  ;;  %v846_v26 = vmul.f32 0.1, %v832_v22 }
 0x207   : > { %885 = vst.msk [vmem:[%s2299_s16 + $0x4] sm:$0xf] %vm883_vm5, %v1219_v21  ;;  %vm837_vm10 = vcmp.ge.f32.partialorder %v830_v24, 0.0  ;;  %v844_v27 = vmul.f32 0.1, %v830_v24  ;;  %v831_v28 = vadd.f32 %v1199_v47, %v818_v25 }
 0x208   : > { %v853_v29 = vsel %vm839_vm9, %v832_v22, %v846_v26 }
 0x209   : > { %v1224_v30 = vpack.c.bf16 %v853_v29, %v853_v29  ;;  %v851_v31 = vsel %vm837_vm10, %v830_v24, %v844_v27  ;;  %vm838_vm11 = vcmp.ge.f32.partialorder %v831_v28, 0.0  ;;  %v845_v32 = vmul.f32 0.1, %v831_v28 }
 0x20a   : > { %v1222_v33 = vpack.c.bf16 %v851_v31, %v851_v31 }
 0x20b   : > { %890 = vst.msk [vmem:[%s2299_s16 + $0x18] sm:$0xf] %vm883_vm5, %v1224_v30  ;;  %v852_v34 = vsel %vm838_vm11, %v831_v28, %v845_v32 }
 0x20c   : > { %888 = vst.msk [vmem:[%s2299_s16 + $0x10] sm:$0xf] %vm883_vm5, %v1222_v33  ;;  %v1223_v35 = vpack.c.bf16 %v852_v34, %v852_v34 }
 0x20e   : > { %889 = vst.msk [vmem:[%s2299_s16 + $0x14] sm:$0xf] %vm883_vm5, %v1223_v35 }
 0x20f   : > { %1685 = shalt.err (!%p1682_p12)
}
 0x210   : > { %s1686_s2 = scalar_lea.hbm %s2319_s14, 512  ;;  %s1690_s27 = scalar_lea.hbm %s2466_s22, 2048 }
 0x211   : > { %p1687_p9 = scmp.ne.s32.totalorder %s2319_s14, %s1686_s2  ;;  %p1691_p5 = scmp.lt.u32.totalorder %s2319_s14, %s2466_s22 }
 0x212   : > { %p1692_p11 = scmp.lt.u32.totalorder %s1690_s27, %s1686_s2  ;;  %p1694_p6 = scmp.lt.u32.totalorder %s1686_s2, %s2319_s14 }
 0x213   : > { %p1688_p4 = pnand %p1687_p9, %p2467_p13 }
 0x214   : > { %p1693_p3 = por %p1692_p11, %p1691_p5 }
 0x215   : > { %p1689_p1 = pneg %p1688_p4 }
 0x216   : > { %p1695_p10 = por %p1694_p6, %p1693_p3 }
 0x218   : > { %p1696_p0 = pnand %p1695_p10, %p1689_p1 }
 0x21a   : > { %1699 = shalt.err (!%p1696_p0)
}
 0x21b   : > { %s1830_s17 = smov 64   ;;  %s1831_s18 = smov 4  }
 0x21c   : > { %1327 = dma.vmem_to_hbm [thread:$0]  (%p2467_p13), %s2321_s19, 512, %s2319_s14, %s943_s8, %s1830_s17, %s1830_s17, %s1831_s18  }
 0x21d PF: > { %s2468_s30 = sld [smem:[#allocation22_spill]]  ;;  %s2469_s12 = sld [smem:[#allocation34_spill]] }
 0x21e   : > { %p1354_p7 = scmp.ge.s32.totalorder %s1812_s11, 2 }
 0x223   : > { %s973_s9 = sand.u32 1, %s2468_s30   ;;  %p2470_p2 = scmp.ne.s32.totalorder %s2469_s12, 0 }
 0x224   : > { %s974_s20 = scalar_lea.sflag [#allocation4], %s973_s9 }
 0x225   : > { %p1343_p8 = pnand %p1354_p7, %p2470_p2 }
 0x227   : > { %1765 = dma.done.wait (!%p1343_p8), %s974_s20, 512  }
 0x228   : > { %1767 = vsyncadd (!%p1343_p8), %s974_s20, 4294966784  ;;  %s28_s11 = sadd.s32 1, %s1812_s11   ;;  %s2471_s24 = sld [smem:[#allocation21_spill]] }
 0x229   : > { %p25_p12 = scmp.ge.s32.totalorder %s28_s11, 6   ;;  %s2472_s21 = sld [smem:[#allocation31_spill]] }
 0x22a   : > { %s2473_s19 = sld [smem:[#allocation30_spill]]  ;;  %s2474_s30 = sld [smem:[#allocation25_spill]] }
 0x22b   : > { %s2475_s9 = sld [smem:[#allocation27_spill]]  ;;  %s2476_s23 = sld [smem:[#allocation28_spill]] }
 0x22c   : > { %s2477_s25 = smov %s1780_s26  ;;  %s2479_s27 = smov %s1788_s28 }
 0x22d   : > { %s2480_s28 = smov %s1792_s29  ;;  %s2482_s8 = smov %s1808_s10 }
 0x22e   :  { %27 = sbr.rel (!%p25_p12) target bundleno = 16 (0x10), region = 133 }
 0x22f   : > { %s2478_s26 = smov %s2472_s21 }
 0x230   : > { %s2481_s29 = smov %s2473_s19 }
 0x231   : > { %s2483_s10 = smov %s2476_s23 }
 0x235   :  { %979 = vsyncpa [#allocation3], 1 }
 0x236   :  { %981 = vsyncpa [#allocation3 + $0x1], 1 }
 0x237   :  { %982 = vsyncpa [#allocation6], 1 }
 0x238   :  { %984 = vsyncpa [#allocation6 + $0x1], 1 }
 0x239   :  { %985 = vsyncpa [#allocation9], 1 }
 0x23a   :  { %986 = vsyncpa [#allocation12], 1 }
 0x23b   :  { %987 = vsyncpa [#allocation4], 1 }
 0x23c   :  { %989 = vsyncpa [#allocation4 + $0x1], 1 }

// kernel: _lambda_.4
= control target key start
LH: loop header
LB: loop body
LE: loop exit
PB: predicated region body
PF: predicated region fallthrough
CT: control target
= control target key end

     0   :  { %s2334_s0 = inlined_call_operand.hbm [shape: bf16[2,72,96], index: 0, kind: input, shape index: {}, may-alias: {0,1}]   ;;  %s2335_s1 = inlined_call_operand.hbm [shape: bf16[2,72,96], index: 1, kind: input, shape index: {}, may-alias: {0,1}]   ;;  %s2336_s2 = inlined_call_operand.hbm [shape: bf16[2,64,96], index: 2, kind: input, shape index: {}]   ;;  %s2337_s3 = inlined_call_operand.hbm [shape: bf16[96,64], index: 3, kind: input, shape index: {}]   ;;  %s2338_s4 = inlined_call_operand.hbm [shape: bf16[96,64], index: 4, kind: input, shape index: {}]   ;;  %s2339_s5 = inlined_call_operand.hbm [shape: bf16[96,64], index: 5, kind: input, shape index: {}]   ;;  %s2340_s6 = inlined_call_operand.hbm [shape: f32[1,64], index: 6, kind: input, shape index: {}]   ;;  %s2341_s7 = inlined_call_operand.hbm [shape: bf16[2,64,64], index: 7, kind: output, shape index: {}]  }
   0x1   :  { %2366 = sst [smem:[#allocation35_spill]] %s2336_s2 }
   0x2   :  { %2367 = sst [smem:[#allocation36_spill]] %s2341_s7 }
   0x3   :  { %12 = vsyncpa [#allocation3], 0 }
   0x4   :  { %14 = vsyncpa [#allocation3 + $0x1], 0 }
   0x5   :  { %15 = vsyncpa [#allocation6], 0 }
   0x6   :  { %17 = vsyncpa [#allocation6 + $0x1], 0 }
   0x7   :  { %18 = vsyncpa [#allocation9], 0 }
   0x8   :  { %19 = vsyncpa [#allocation12], 0 }
   0x9   :  { %20 = vsyncpa [#allocation4], 0 }
   0xa   :  { %22 = vsyncpa [#allocation4 + $0x1], 0  ;;  %s1851_s24 = smov 0   ;;  %s1853_s25 = smov 0  }
   0xb   :  { %s1855_s26 = smov 0   ;;  %s1857_s27 = smov 0  }
   0xc   :  { %s1859_s28 = smov 0   ;;  %s1861_s29 = smov 0  }
   0xd   :  { %s1863_s30 = smov 0   ;;  %s1865_s8 = smov 0  }
   0xe   :  { %s1867_s9 = smov 0   ;;  %s1869_s10 = smov 0  }
   0xf   :  { %s1871_s11 = smov 0  }
  0x10 LB: > { %2368 = sst [smem:[#allocation21_spill]] %s1755_s25  ;;  %s1907_s12 = sadd.s32 4294967295, %s1791_s11   ;;  %s1791_s11 = sphi %s1871_s11, %s28_s11   ;;  %s1787_s10 = sphi %s1869_s10, %s2429_s10   ;;  %s1783_s9 = sphi %s1867_s9, %s2421_s9   ;;  %s1779_s8 = sphi %s1865_s8, %s2428_s8   ;;  %s1775_s30 = sphi %s1863_s30, %s2420_s30   ;;  %s1771_s29 = sphi %s1861_s29, %s2427_s29   ;;  %s1767_s28 = sphi %s1859_s28, %s2426_s28   ;;  %s1763_s27 = sphi %s1857_s27, %s2425_s27   ;;  %s1759_s26 = sphi %s1855_s26, %s2424_s26   ;;  %s1755_s25 = sphi %s1853_s25, %s2423_s25   ;;  %s1751_s24 = sphi %s1851_s24, %s2417_s24  }
  0x11   : > { %2369 = sst [smem:[#allocation22_spill]] %s1763_s27  ;;  %s37_s14 = sadd.s32 1, %s1783_s9 }
  0x12   : > { %2370 = sst [smem:[#allocation23_spill]] %s1775_s30  ;;  %s40_s15 = sadd.s32 1, %s1787_s10 }
  0x13   : > { %2371 = sst [smem:[#allocation24_spill]] %s1779_s8  ;;  %p38_p0 = scmp.ge.s32.totalorder %s37_s14, 2 }
  0x14   : > { %2372 = sst [smem:[#allocation25_spill]] %s1783_s9  ;;  %s49_s16 = sadd.s32 1, %s1771_s29 }
  0x15   : > { %2373 = sst [smem:[#allocation26_spill]] %s1907_s12  ;;  %p56_p1 = scmp.ne.s32.totalorder %s1771_s29, %s1767_s28 }
  0x16   : > { %p57_p2 = scmp.eq.s32.totalorder %s1791_s11, 0  ;;  %s2431_s14 = smov (%p38_p0, %s37_s14), 0 }
  0x17   : > { %2374 = sst [smem:[#allocation27_spill]] %s2431_s14  ;;  %s2433_s15 = smov (!%p38_p0, %s40_s15), %s1787_s10 }
  0x18   : > { %s45_s17 = ssub.s32 %s1783_s9, %s2431_s14  ;;  %p1926_p3 = por %p57_p2, %p56_p1 }
  0x19   : > { %p42_p4 = scmp.ge.s32.totalorder %s2433_s15, 2  ;;  %p2346_p5 = scmp.ne.s32.totalorder %s1767_s28, %s1763_s27 }
  0x1a   : > { %s2375_s18 = scalar_select %p1926_p3, 1, 0 }
  0x1b   : > { %p2354_p6 = scmp.eq.s32.totalorder %s1907_s12, 0  ;;  %s1934_s19 = sshll.u32 %s1783_s9, 2 }
  0x1c   : > { %s2435_s15 = smov (%p42_p4, %s2433_s15), 0  ;;  %s1173_s21 = sadd.s32 4, %s1934_s19 }
  0x1d   : > { %2376 = sst [smem:[#allocation28_spill]] %s2435_s15  ;;  %p1943_p7 = por %p2354_p6, %p2346_p5 }
  0x1e   : > { %s44_s22 = ssub.s32 %s1787_s10, %s2435_s15  ;;  %s1174_s23 = sshll.u32 %s2431_s14, 2 }
  0x1f   : > { %s2377_s20 = scalar_select %p1943_p7, 1, 0 }
  0x20   : > { %s46_s13 = sor.u32 %s45_s17, %s44_s22  ;;  %s1175_s9 = sadd.s32 4, %s1174_s23 }
  0x21   : > { %2378 = sst [smem:[#allocation29_spill]] %s2377_s20  ;;  %p47_p8 = scmp.eq.s32.totalorder %s46_s13, 0 }
  0x22   : > { %s77_s7 = ssub.s32 %s1173_s21, %s1175_s9  ;;  %s81_s30 = sadd.s32 1, %s1759_s26 }
  0x23   : > { %s78_s8 = sor.u32 %s77_s7, %s44_s22  ;;  %p88_p10 = scmp.ne.s32.totalorder %s1759_s26, %s1755_s25 }
  0x24   : > { %s1953_s2 = scalar_select %p47_p8, %s1771_s29, %s49_s16  }
  0x25   : > { %p79_p9 = scmp.eq.s32.totalorder %s78_s8, 0  ;;  %p94_p11 = scmp.ne.s32.totalorder %s1755_s25, %s1751_s24 }
  0x26   : > { %2379 = sst [smem:[#allocation30_spill]] %s1953_s2  ;;  %p232_p12 = scmp.eq.s32.totalorder %s1907_s12, 3 }
  0x27   : > { %s1961_s15 = scalar_select %p79_p9, %s1759_s26, %s81_s30  }
  0x28   : > { %p1965_p13 = por %p88_p10, %p57_p2  ;;  %p1971_p0 = por %p94_p11, %p2354_p6 }
  0x29   : > { %2380 = sst [smem:[#allocation31_spill]] %s1961_s15  ;;  %p1978_p4 = por %p232_p12, %p56_p1 }
  0x2a   : > { %s2381_s17 = scalar_select %p1965_p13, 1, 0 }
  0x2b   : > { %s2382_s13 = scalar_select %p1971_p0, 1, 0 }
  0x2c   : > { %s2384_s7 = scalar_select %p1978_p4, 1, 0 }
  0x2d   : > { %2383 = sst [smem:[#allocation32_spill]] %s2382_s13  ;;  %s2386_s8 = sadd.s32 4294967294, %s1791_s11  }
  0x2e   : > { %2385 = sst [smem:[#allocation33_spill]] %s2384_s7  ;;  %p238_p8 = scmp.eq.s32.totalorder %s2386_s8, 3 }
  0x2f   : > { %p1102_p5 = scmp.ge.s32.totalorder %s1791_s11, 1  ;;  %p245_p9 = scmp.lt.s32.totalorder %s1791_s11, 5 }
  0x30   : > { %p2387_p7 = scmp.ne.s32.totalorder %s1767_s28, %s1763_s27  ;;  %s1793_s9 = smov [#allocation8]  }
  0x31   : > { %p1993_p2 = pnand %p1102_p5, %p245_p9  ;;  %s257_s16 = sshll.u32 %s1793_s9, 4  ;;  %s1999_s16 = int_to_ptr.vmem [resolvable:$true] %s257_s16 }
  0x32   : > { %p1989_p3 = por %p238_p8, %p2387_p7  ;;  %s1794_s22 = smov [#allocation11]  }
  0x33   : > { %s2390_s30 = scalar_select %p1993_p2, 1, 0 }
  0x34   : > { %s2388_s24 = scalar_select %p1989_p3, 1, 0 }
  0x35   : > { %p1302_p1 = pneg %p1993_p2  ;;  %s283_s23 = sshll.u32 %s1794_s22, 4  ;;  %s2007_s23 = int_to_ptr.vmem [resolvable:$true] %s283_s23 }
  0x36   : > { %2389 = sst [smem:[#allocation34_spill]] %s2388_s24  ;;  %s1795_s8 = smov [#allocation10]  }
  0x37   : > { %p2003_p10 = pnand %p1302_p1, %p2354_p6  ;;  %s2009_s14 = sshll.u32 %s1795_s8, 4  ;;  %s271_s14 = int_to_ptr.vmem [resolvable:$true] %s2009_s14 }
  0x38   : > { %s1454_s9 = scalar_lea.hbm %s2337_s3, 768 }
  0x39   : > { %p1455_p5 = scmp.ne.s32.totalorder %s2337_s3, %s1454_s9  ;;  %p2019_p7 = pneg %p2003_p10 }
  0x3a   : > { %p1461_p8 = scmp.lt.u32.totalorder %s1454_s9, %s2337_s3 }
  0x3b   : > { %p1457_p11 = pnand %p2019_p7, %p1455_p5 }
  0x3d   : > { %p1458_p12 = pneg %p1457_p11 }
  0x3f   : > { %p1463_p9 = pnand %p1461_p8, %p1458_p12 }
  0x41   : > { %1466 = shalt.err (!%p1463_p9)
}
  0x42   : > { %s1467_s2 = scalar_lea.vmem %s1999_s16, 768  ;;  %p1475_p4 = scmp.lt.s32.totalorder %s1999_s16, %s1999_s16 }
  0x43   : > { %p1468_p1 = scmp.ne.s32.totalorder %s1999_s16, %s1467_s2  ;;  %p1476_p0 = scmp.lt.s32.totalorder %s1467_s2, %s1467_s2 }
  0x45   : > { %p1470_p6 = pnand %p1468_p1, %p2019_p7  ;;  %p1477_p5 = por %p1476_p0, %p1475_p4 }
  0x47   : > { %p1471_p3 = pneg %p1470_p6 }
  0x49   : > { %p1478_p11 = pnand %p1477_p5, %p1471_p3 }
  0x4b   : > { %1481 = shalt.err (!%p1478_p11)
}
  0x4c   : > { %s1796_s27 = smov 64   ;;  %s1797_s15 = smov 4  }
  0x4d   : > { %1305 = dma.hbm_to_vmem [thread:$0]  (!%p2003_p10), %s2337_s3, 768, %s1999_s16, [#allocation9], %s1796_s27, %s1796_s27, %s1797_s15  }
  0x4e   : > { %s1482_s2 = scalar_lea.hbm %s2339_s5, 768 }
  0x4f   : > { %p1483_p3 = scmp.ne.s32.totalorder %s2339_s5, %s1482_s2  ;;  %p1489_p4 = scmp.lt.u32.totalorder %s1482_s2, %s2339_s5 }
  0x51   : > { %p1485_p6 = pnand %p1483_p3, %p2019_p7 }
  0x53   : > { %p1486_p0 = pneg %p1485_p6 }
  0x55   : > { %p1491_p12 = pnand %p1489_p4, %p1486_p0 }
  0x57   : > { %1494 = shalt.err (!%p1491_p12)
}
  0x58   : > { %s1495_s16 = scalar_lea.vmem %s2007_s23, 768  ;;  %p1503_p5 = scmp.lt.s32.totalorder %s2007_s23, %s2007_s23 }
  0x59   : > { %p1496_p8 = scmp.ne.s32.totalorder %s2007_s23, %s1495_s16  ;;  %p1504_p11 = scmp.lt.s32.totalorder %s1495_s16, %s1495_s16 }
  0x5b   : > { %p1498_p9 = pnand %p1496_p8, %p2019_p7  ;;  %p1505_p3 = por %p1504_p11, %p1503_p5 }
  0x5d   : > { %p1499_p1 = pneg %p1498_p9 }
  0x5f   : > { %p1506_p6 = pnand %p1505_p3, %p1499_p1 }
  0x61   : > { %1509 = shalt.err (!%p1506_p6)
}
  0x62   : > { %1311 = dma.hbm_to_vmem [thread:$0]  (!%p2003_p10), %s2339_s5, 768, %s2007_s23, [#allocation12], %s1796_s27, %s1796_s27, %s1797_s15  }
  0x63   : > { %s1510_s24 = scalar_lea.hbm %s2338_s4, 768 }
  0x64   : > { %p1511_p0 = scmp.ne.s32.totalorder %s2338_s4, %s1510_s24  ;;  %p1517_p8 = scmp.lt.u32.totalorder %s1510_s24, %s2338_s4 }
  0x66   : > { %p1513_p4 = pnand %p1511_p0, %p2019_p7 }
  0x68   : > { %p1514_p12 = pneg %p1513_p4 }
  0x6a   : > { %p1519_p9 = pnand %p1517_p8, %p1514_p12 }
  0x6c   : > { %1522 = shalt.err (!%p1519_p9)
}
  0x6d   : > { %s1523_s16 = scalar_lea.vmem %s271_s14, 768  ;;  %p1531_p3 = scmp.lt.s32.totalorder %s271_s14, %s271_s14 }
  0x6e   : > { %p1524_p1 = scmp.ne.s32.totalorder %s271_s14, %s1523_s16  ;;  %p1532_p6 = scmp.lt.s32.totalorder %s1523_s16, %s1523_s16 }
  0x70   : > { %p1526_p5 = pnand %p1524_p1, %p2019_p7  ;;  %p1533_p2 = por %p1532_p6, %p1531_p3 }
  0x72   : > { %p1527_p11 = pneg %p1526_p5 }
  0x74   : > { %p1534_p13 = pnand %p1533_p2, %p1527_p11 }
  0x76   : > { %1537 = shalt.err (!%p1534_p13)
}
  0x77   : > { %1308 = dma.hbm_to_vmem [thread:$0]  (!%p2003_p10), %s2338_s4, 768, %s271_s14, [#allocation9], %s1796_s27, %s1796_s27, %s1797_s15  }
  0x78   : > { %s1798_s12 = smov [#allocation13]   ;;  %s1538_s9 = scalar_lea.hbm %s2340_s6, 16 }
  0x79   : > { %s297_s20 = sshll.u32 %s1798_s12, 4  ;;  %p1539_p13 = scmp.ne.s32.totalorder %s2340_s6, %s1538_s9  ;;  %s298_s20 = int_to_ptr.vmem [resolvable:$true] %s297_s20 }
  0x7a   : > { %p1545_p4 = scmp.lt.u32.totalorder %s1538_s9, %s2340_s6 }
  0x7b   : > { %p1541_p2 = pnand %p1539_p13, %p2019_p7 }
  0x7d   : > { %p1542_p0 = pneg %p1541_p2 }
  0x7f   : > { %p1547_p12 = pnand %p1545_p4, %p1542_p0 }
  0x81   : > { %1550 = shalt.err (!%p1547_p12)
}
  0x82   : > { %s1551_s14 = scalar_lea.vmem %s298_s20, 16  ;;  %s1558_s27 = scalar_lea.vmem %s298_s20, 32 }
  0x83   : > { %p1552_p8 = scmp.ne.s32.totalorder %s298_s20, %s1551_s14  ;;  %p1559_p5 = scmp.lt.s32.totalorder %s298_s20, %s298_s20 }
  0x84   : > { %p1560_p11 = scmp.lt.s32.totalorder %s1558_s27, %s1551_s14 }
  0x85   : > { %p1554_p9 = pnand %p1552_p8, %p2019_p7 }
  0x86   : > { %p1561_p3 = por %p1560_p11, %p1559_p5 }
  0x87   : > { %p1555_p1 = pneg %p1554_p9 }
  0x89   : > { %p1562_p6 = pnand %p1561_p3, %p1555_p1 }
  0x8b   : > { %1565 = shalt.err (!%p1562_p6)
}
  0x8c   : > { %1314 = dma.hbm_to_vmem [thread:$0]  (!%p2003_p10), %s2340_s6, 16, %s298_s20, [#allocation12]  }
  0x8d   : > { %p1107_p13 = scmp.ge.s32.totalorder %s1791_s11, 4 }
  0x8e   : > { %p2393_p2 = scmp.ne.s32.totalorder (!%p1107_p13), %s2375_s18, 0 }
  0x8f   : > { %304 = sbr.rel (%p1107_p13) target bundleno = 240 (0xf0), region = 32 }
  0x96   : > { %307 = sbr.rel (!%p2393_p2) target bundleno = 179 (0xb3), region = 36  ;;  %s308_s7 = sand.u32 (%p2393_p2), 1, %s1771_s29  }
  0x97   : > { %s1108_s25 = sshll.u32 (%p2393_p2), %s308_s7, 4  ;;  %s2113_s12 = scalar_lea.sflag (%p2393_p2), [#allocation3], %s308_s7 }
  0x98   : > { %s312_s13 = scalar_lea.vmem (%p2393_p2), [#allocation2], %s1108_s25  ;;  %s1278_s24 = smul.u32 (%p2393_p2), 9, %s1787_s10 }
  0x99   : > { %s327_s21 = sshll.u32 (%p2393_p2), %s312_s13, 4  ;;  %s1570_s15 = scalar_lea.hbm (%p2393_p2), %s2334_s0, 1152  ;;  %s2117_s21 = int_to_ptr.vmem [resolvable:$true] %s327_s21 }
  0x9a   : > { %s323_s9 = sadd.s32 (%p2393_p2), %s1278_s24, %s1934_s19 }
  0x9b   : > { %s1112_s20 = sshll.u32 (%p2393_p2), %s323_s9, 6 }
  0x9c   : > { %s325_s2 = scalar_lea.hbm (%p2393_p2), %s2334_s0, %s1112_s20 }
  0x9d   : > { %s1566_s16 = scalar_lea.hbm %s325_s2, 256  ;;  %p1571_p7 = scmp.lt.u32.totalorder %s325_s2, %s2334_s0 }
  0x9e   : > { %p1567_p10 = scmp.ne.s32.totalorder %s325_s2, %s1566_s16  ;;  %p1572_p0 = scmp.lt.u32.totalorder %s1570_s15, %s1566_s16 }
  0x9f   : > { %p1574_p12 = scmp.lt.u32.totalorder %s1566_s16, %s325_s2 }
  0xa0   : > { %p1573_p4 = por %p1572_p0, %p1571_p7 }
  0xa2   : > { %p1575_p8 = por %p1574_p12, %p1573_p4 }
  0xa4   : > { %p1576_p9 = pnand %p1575_p8, %p1567_p10 }
  0xa6   : > { %1579 = shalt.err (!%p1576_p9)
}
  0xa7   : > { %s1580_s25 = scalar_lea.vmem %s2117_s21, 256  ;;  %s1799_s13 = smov [#allocation2]  }
  0xa8   : > { %p1581_p1 = scmp.ne.s32.totalorder %s2117_s21, %s1580_s25  ;;  %s1584_s24 = sshll.u32 %s1799_s13, 4  ;;  %s1585_s24 = int_to_ptr.vmem [resolvable:$false] %s1584_s24 }
  0xa9   : > { %s1586_s9 = scalar_lea.vmem %s1585_s24, 512  ;;  %p1587_p5 = scmp.lt.s32.totalorder %s2117_s21, %s1585_s24 }
  0xaa   : > { %p1588_p11 = scmp.lt.s32.totalorder %s1586_s9, %s1580_s25 }
  0xac   : > { %p1589_p3 = por %p1588_p11, %p1587_p5 }
  0xae   : > { %p1590_p6 = pnand %p1589_p3, %p1581_p1 }
  0xb0   : > { %1593 = shalt.err (!%p1590_p6)
}
  0xb1   : > { %s1800_s20 = smov 64   ;;  %s1801_s22 = smov 4  }
  0xb2   : > { %333 = dma.hbm_to_vmem [thread:$0]  %s325_s2, 256, %s2117_s21, %s2113_s12, %s1800_s20, %s1800_s20, %s1801_s22  }
  0xb3 PF: > { %s337_s8 = sand.u32 1, %s1791_s11   ;;  %s339_s16 = sand.u32 1, %s1759_s26  }
  0xb4   : > { %s1115_s14 = sshll.u32 %s339_s16, 2  ;;  %s964_s27 = smul.u32 9, %s1787_s10 }
  0xb5   : > { %s341_s15 = scalar_lea.vmem [#allocation5], %s1115_s14  ;;  %s361_s7 = sand.u32 1, %s1771_s29  }
  0xb6   : > { %s352_s23 = sshll.u32 %s341_s15, 4  ;;  %s965_s25 = sadd.s32 %s1934_s19, %s964_s27  ;;  %s2138_s23 = int_to_ptr.vmem [resolvable:$true] %s352_s23 }
  0xb7   : > { %s1117_s13 = sshll.u32 %s965_s25, 6  ;;  %s2140_s12 = sshll.u32 %s361_s7, 4 }
  0xb8   : > { %s967_s24 = scalar_lea.hbm %s2335_s1, %s1117_s13  ;;  %s1120_s20 = sshll.u32 %s1787_s10, 3 }
  0xb9   : > { %s2145_s9 = scalar_lea.hbm %s967_s24, 256  ;;  %s2148_s22 = scalar_lea.sflag [#allocation6], %s337_s8 }
  0xba   : > { %s1622_s16 = scalar_lea.hbm %s967_s24, 320  ;;  %p2394_p2 = scmp.ne.s32.totalorder %s2381_s17, 0 }
  0xbb   : > { %p1595_p13 = scmp.ne.s32.totalorder %s2145_s9, %s1622_s16  ;;  %s1598_s15 = scalar_lea.hbm %s2335_s1, 1152 }
  0xbc   : > { %p1599_p0 = scmp.lt.u32.totalorder %s2145_s9, %s2335_s1  ;;  %p1600_p4 = scmp.lt.u32.totalorder %s1598_s15, %s1622_s16 }
  0xbd   : > { %p1596_p10 = pnand %p1595_p13, %p2394_p2  ;;  %p1602_p8 = scmp.lt.u32.totalorder %s1622_s16, %s2145_s9 }
  0xbe   : > { %p1601_p12 = por %p1600_p4, %p1599_p0 }
  0xbf   : > { %p1597_p7 = pneg %p1596_p10 }
  0xc0   : > { %p1603_p9 = por %p1602_p8, %p1601_p12 }
  0xc2   : > { %p1604_p1 = pnand %p1603_p9, %p1597_p7 }
  0xc4   : > { %1607 = shalt.err (!%p1604_p1)
}
  0xc5   : > { %s1608_s8 = scalar_lea.vmem %s2138_s23, 64  ;;  %s1802_s13 = smov [#allocation5]  }
  0xc6   : > { %p1609_p5 = scmp.ne.s32.totalorder %s2138_s23, %s1608_s8  ;;  %s1612_s21 = sshll.u32 %s1802_s13, 4  ;;  %s1613_s21 = int_to_ptr.vmem [resolvable:$false] %s1612_s21 }
  0xc7   : > { %s1614_s2 = scalar_lea.vmem %s1613_s21, 128  ;;  %p1615_p6 = scmp.lt.s32.totalorder %s2138_s23, %s1613_s21 }
  0xc8   : > { %p1610_p11 = pnand %p1609_p5, %p2394_p2  ;;  %p1616_p13 = scmp.lt.s32.totalorder %s1614_s2, %s1608_s8 }
  0xca   : > { %p1611_p3 = pneg %p1610_p11  ;;  %p1617_p10 = por %p1616_p13, %p1615_p6 }
  0xcc   : > { %p1618_p0 = pnand %p1617_p10, %p1611_p3 }
  0xce   : > { %1621 = shalt.err (!%p1618_p0)
}
  0xcf   : > { %1287 = dma.hbm_to_vmem [thread:$0]  (%p2394_p2), %s2145_s9, 64, %s2138_s23, %s2148_s22  }
  0xd0   : > { %s369_s24 = sadd.s32 %s1934_s19, %s1120_s20  ;;  %s363_s16 = scalar_lea.vmem [#allocation7], %s2140_s12 }
  0xd1   : > { %s372_s14 = sshll.u32 %s363_s16, 4  ;;  %s1121_s27 = sshll.u32 %s369_s24, 6  ;;  %s2175_s14 = int_to_ptr.vmem [resolvable:$true] %s372_s14 }
  0xd2   : > { %s2395_s25 = sld [smem:[#allocation35_spill]]  ;;  %p2397_p4 = scmp.ne.s32.totalorder %s2375_s18, 0 }
  0xd8   : > { %s2396_s13 = smov %s2395_s25  ;;  %s2180_s8 = scalar_lea.hbm %s2395_s25, %s1121_s27 }
  0xd9   : > { %s1623_s17 = scalar_lea.hbm %s2180_s8, 256  ;;  %s1627_s12 = scalar_lea.hbm %s2396_s13, 1024 }
  0xda   : > { %p1624_p7 = scmp.ne.s32.totalorder %s2180_s8, %s1623_s17  ;;  %p1628_p8 = scmp.lt.u32.totalorder %s2180_s8, %s2396_s13 }
  0xdb   : > { %p1629_p9 = scmp.lt.u32.totalorder %s1627_s12, %s1623_s17  ;;  %p1631_p5 = scmp.lt.u32.totalorder %s1623_s17, %s2180_s8 }
  0xdc   : > { %p1625_p2 = pnand %p1624_p7, %p2397_p4 }
  0xdd   : > { %p1630_p1 = por %p1629_p9, %p1628_p8 }
  0xde   : > { %p1626_p12 = pneg %p1625_p2 }
  0xdf   : > { %p1632_p11 = por %p1631_p5, %p1630_p1 }
  0xe1   : > { %p1633_p3 = pnand %p1632_p11, %p1626_p12 }
  0xe3   : > { %1636 = shalt.err (!%p1633_p3)
}
  0xe4   : > { %s1637_s21 = scalar_lea.vmem %s2175_s14, 256  ;;  %s1803_s2 = smov [#allocation7]  }
  0xe5   : > { %p1638_p6 = scmp.ne.s32.totalorder %s2175_s14, %s1637_s21  ;;  %s1641_s24 = sshll.u32 %s1803_s2, 4  ;;  %s1642_s24 = int_to_ptr.vmem [resolvable:$false] %s1641_s24 }
  0xe6   : > { %s1643_s16 = scalar_lea.vmem %s1642_s24, 512  ;;  %p1644_p0 = scmp.lt.s32.totalorder %s2175_s14, %s1642_s24 }
  0xe7   : > { %p1639_p13 = pnand %p1638_p6, %p2397_p4  ;;  %p1645_p7 = scmp.lt.s32.totalorder %s1643_s16, %s1637_s21 }
  0xe9   : > { %p1640_p10 = pneg %p1639_p13  ;;  %p1646_p2 = por %p1645_p7, %p1644_p0 }
  0xeb   : > { %p1647_p8 = pnand %p1646_p2, %p1640_p10 }
  0xed   : > { %1650 = shalt.err (!%p1647_p8)
}
  0xee   : > { %s1804_s27 = smov 64   ;;  %s1805_s15 = smov 4  }
  0xef   : > { %1288 = dma.hbm_to_vmem [thread:$0]  (%p2397_p4), %s2180_s8, 256, %s2175_s14, %s2148_s22, %s1804_s27, %s1804_s27, %s1805_s15  }
  0xf0 PF: > { %p2398_p12 = scmp.ne.s32.totalorder %s2390_s30, 0 }
  0xf1   : > { %s2399_s7 = sld [smem:[#allocation29_spill]] (!%p2398_p12)  ;;  %s2207_s25 = sand.u32 (!%p2398_p12), 1, %s1767_s28  }
  0xf2   : > { %384 = sbr.rel (%p2398_p12) target bundleno = 557 (0x22d), region = 48  ;;  %s2210_s17 = sshll.u32 (!%p2398_p12), %s2207_s25, 4 }
  0xf3   : > { %s387_s19 = scalar_lea.sflag (!%p2398_p12), [#allocation3], %s2207_s25  ;;  %s2214_s23 = scalar_lea.vmem (!%p2398_p12), [#allocation2], %s2210_s17 }
  0xf7   : > { %p2400_p9 = scmp.ne.s32.totalorder (!%p2398_p12), %s2399_s7, 0 }
  0xf9   : > { %1724 = dma.done.wait (%p2400_p9), %s387_s19, 256  }
  0xfa   : > { %1726 = vsyncadd (%p2400_p9), %s387_s19, 4294967040  ;;  %s2401_s18 = sld [smem:[#allocation26_spill]]  ;;  %s2402_s30 = sld [smem:[#allocation21_spill]] }
  0xfb   : > { %s2403_s22 = sld [smem:[#allocation32_spill]] }
 0x100   : > { %s395_s14 = sand.u32 1, %s2401_s18   ;;  %s397_s8 = sand.u32 1, %s2402_s30  }
 0x101   : > { %s2222_s12 = sshll.u32 %s397_s8, 2  ;;  %s396_s9 = scalar_lea.sflag [#allocation6], %s395_s14 }
 0x102   : > { %s399_s20 = scalar_lea.vmem [#allocation5], %s2222_s12  ;;  %p2404_p4 = scmp.ne.s32.totalorder %s2403_s22, 0 }
 0x104   : > { %1728 = dma.done.wait (%p2404_p4), %s396_s9, 64  }
 0x105   : > { %1730 = vsyncadd (%p2404_p4), %s396_s9, 4294967232  ;;  %s408_s21 = scalar_lea.vmem [#allocation7], %s2210_s17 }
 0x106   : > { %1732 = dma.done.wait (%p2400_p9), %s396_s9, 256  }
 0x107   : > { %1734 = vsyncadd (%p2400_p9), %s396_s9, 4294967040  ;;  %p2405_p1 = scmp.eq.s32.totalorder %s2401_s18, 0 }
 0x109   : > { %1736 = dma.done.wait (%p2405_p1), [#allocation9], 1536   ;;  %p2406_p5 = pmov %p2405_p1 }
 0x10a   : > { %p2407_p11 = pmov %p2405_p1 }
 0x10b   : > { %1738 = vsyncadd (%p2406_p5), [#allocation9], 4294965760 }
 0x10c   : > { %1740 = dma.done.wait (%p2407_p11), [#allocation12], 784   ;;  %p2408_p3 = pmov %p2405_p1 }
 0x10d   : > { %v1430_v0 = vld [vmem:[#allocation10] sm:$0xff]   ;;  %v1431_v1 = vld [vmem:[#allocation11] sm:$0xff]   ;;  %v1432_v2 = vld [vmem:[#allocation10 + $0x8] sm:$0xff]   ;;  %vm566_vm0 = vcmask 785408   ;;  %v1806_v23 = vmov 0.0   ;;  %vm1807_vm1 = vmmov 0  }
 0x10e   : > { %1742 = vsyncadd (%p2408_p3), [#allocation12], 4294966512  ;;  %1210 = vmatprep.subr.bf16.mxu0 %v1430_v0  ;;  %1242 = vmatprep.subr.bf16.mxu1 %v1431_v1  ;;  %v1433_v3 = vld [vmem:[#allocation11 + $0x8] sm:$0xff]   ;;  %v1434_v4 = vld [vmem:[#allocation10 + $0x10] sm:$0xff]   ;;  %s2409_s2 = sld [smem:[#allocation23_spill]]  ;;  %s2410_s24 = sld [smem:[#allocation24_spill]] }
 0x10f   : > { %1211 = vmatpush3.bf16.msra.mxu0 %v1430_v0  ;;  %1243 = vmatpush3.bf16.msra.mxu1 %v1431_v1  ;;  %v1435_v5 = vld [vmem:[#allocation11 + $0x10] sm:$0xff]   ;;  %v1436_v6 = vld [vmem:[#allocation10 + $0x18] sm:$0xff]   ;;  %v1437_v7 = vld [vmem:[#allocation11 + $0x18] sm:$0xff]   ;;  %vm849_vm4 = vcmask 519168   ;;  %s464_s19 = scalar_lea.vmem [#allocation14], %s2210_s17  ;;  %s2411_s18 = sld [smem:[#allocation33_spill]] }
 0x110   : > { %1212 = vmatprep.subr.bf16.mxu0 %v1432_v2  ;;  %1244 = vmatprep.subr.bf16.mxu1 %v1433_v3  ;;  %v1438_v8 = vld [vmem:[#allocation10 + $0x20] sm:$0xff]   ;;  %v1439_v10 = vld [vmem:[#allocation11 + $0x20] sm:$0xff]   ;;  %v476_v11 = vld [vmem:[%s2214_s23 + $0x4] sm:$0xf]  ;;  %s2412_s14 = sld [smem:[#allocation36_spill]]  ;;  %s905_s17 = scalar_lea.sflag [#allocation4], %s2207_s25 }
 0x111   : > { %v1442_v9 = vld [vmem:[%s408_s21] sm:$0xff]   ;;  %v1440_v14 = vld [vmem:[#allocation10 + $0x28] sm:$0xff]   ;;  %v1441_v15 = vld [vmem:[#allocation11 + $0x28] sm:$0xff]   ;;  %s1808_s9 = smov [#allocation14]  }
 0x112   : > { %1222 = vmatprep.mubr.msk.bf16.mxu0 %vm566_vm0, %v1442_v9  ;;  %v477_v12 = vld [vmem:[%s2214_s23 + $0x8] sm:$0xf]  ;;  %v478_v17 = vld [vmem:[%s2214_s23 + $0xc] sm:$0xf]  ;;  %v475_v18 = vld [vmem:[%s2214_s23] sm:$0xf] }
 0x113   : > { %1213 = vmatpush3.bf16.msra.mxu0 %v1432_v2  ;;  %1245 = vmatpush3.bf16.msra.mxu1 %v1433_v3  ;;  %v1151_v13 = vcombine.low %v476_v11, %v477_v12  ;;  %v1443_v16 = vld [vmem:[#allocation8] sm:$0xff]   ;;  %v1448_v19 = vld [vmem:[%s408_s21 + $0x8] sm:$0xff]   ;;  %v1152_v20 = vcombine.low %v478_v17, %v478_v17  ;;  %v1141_v22 = vcombine.low %v475_v18, %v476_v11  ;;  %v1450_v24 = vld [vmem:[#allocation8 + $0x10] sm:$0xff]   ;;  %s920_s23 = sshll.u32 %s464_s19, 4  ;;  %s2268_s23 = int_to_ptr.vmem [resolvable:$true] %s920_s23 }
 0x114   : > { %1214 = vmatprep.subr.bf16.mxu0 %v1434_v4  ;;  %1246 = vmatprep.subr.bf16.mxu1 %v1435_v5  ;;  %v1449_v21 = vld [vmem:[#allocation8 + $0x8] sm:$0xff]   ;;  %v1451_v25 = vld [vmem:[#allocation8 + $0x18] sm:$0xff]   ;;  %v1452_v26 = vld [vmem:[#allocation8 + $0x20] sm:$0xff]   ;;  %v1142_v28 = vcombine.low %v477_v12, %v478_v17  ;;  %s1167_s16 = sshll.u32 %s2409_s2, 2  ;;  %s1168_s27 = sshll.u32 %s2410_s24, 3 }
 0x115   : > { %1254 = vmatprep.mubr.msk.bf16.mxu1 %vm566_vm0, %v1151_v13  ;;  %v1453_v27 = vld [vmem:[#allocation8 + $0x28] sm:$0xff]   ;;  %v853_v29 = vld [vmem:[%s399_s20] sm:$0xf]  ;;  %v1161_v34 = vld [vmem:[#allocation13] ss:$0 sm:$0xff]  ;;  %s917_s15 = sadd.s32 %s1168_s27, %s1167_s16  ;;  %s1651_s12 = scalar_lea.vmem %s2268_s23, 256 }
 0x116   : > { %s1169_s7 = sshll.u32 %s917_s15, 6  ;;  %p1652_p6 = scmp.ne.s32.totalorder %s2268_s23, %s1651_s12 }
 0x117   : > { %1215 = vmatpush3.bf16.msra.mxu0 %v1434_v4  ;;  %1247 = vmatpush3.bf16.msra.mxu1 %v1435_v5  ;;  %s2266_s8 = scalar_lea.hbm %s2412_s14, %s1169_s7  ;;  %p2413_p13 = scmp.ne.s32.totalorder %s2411_s18, 0 }
 0x118   : > { %1216 = vmatprep.subr.bf16.mxu0 %v1436_v6  ;;  %1248 = vmatprep.subr.bf16.mxu1 %v1437_v7  ;;  %s1655_s20 = sshll.u32 %s1808_s9, 4  ;;  %s1656_s20 = int_to_ptr.vmem [resolvable:$false] %s1655_s20 }
 0x119   : > { %p1653_p10 = pnand %p1652_p6, %p2413_p13  ;;  %s1657_s21 = scalar_lea.vmem %s1656_s20, 512 }
 0x11a   : > { %p1658_p7 = scmp.lt.s32.totalorder %s2268_s23, %s1656_s20  ;;  %p1659_p2 = scmp.lt.s32.totalorder %s1657_s21, %s1651_s12 }
 0x11b   : > { %1217 = vmatpush3.bf16.msra.mxu0 %v1436_v6  ;;  %1249 = vmatpush3.bf16.msra.mxu1 %v1437_v7  ;;  %p1654_p0 = pneg %p1653_p10 }
 0x11c   : > { %1218 = vmatprep.subr.bf16.mxu0 %v1438_v8  ;;  %1250 = vmatprep.subr.bf16.mxu1 %v1439_v10  ;;  %p1660_p8 = por %p1659_p2, %p1658_p7 }
 0x11e   : > { %p1661_p12 = pnand %p1660_p8, %p1654_p0 }
 0x11f   : > { %1219 = vmatpush3.bf16.msra.mxu0 %v1438_v8  ;;  %1251 = vmatpush3.bf16.msra.mxu1 %v1439_v10 }
 0x120   : > { %1220 = vmatprep.subr.bf16.mxu0 %v1440_v14  ;;  %1252 = vmatprep.subr.bf16.mxu1 %v1441_v15 }
 0x123   : > { %1221 = vmatpush3.bf16.msra.mxu0 %v1440_v14  ;;  %1253 = vmatpush3.bf16.msra.mxu1 %v1441_v15 }
 0x124   : > { %1226 = vmatprep.subr.bf16.mxu0 %v1443_v16  ;;  %1258 = vmatprep.subr.bf16.mxu1 %v1806_v23 }
 0x126   : > { %1223 = vmatmul.mubr.msk.bf16.vlgmr.msra.gmra.mrb[0].mxu0 %vm566_vm0, %v1448_v19  ;;  %1255 = vmatmul.mubr.msk.bf16.vlgmr.msra.gmra.mrb[0].mxu1 %vm566_vm0, %v1152_v20 }
 0x127   : > { %1227 = vmatpush3.bf16.msra.mxu0 %v1443_v16  ;;  %1259 = vmatpush3.bf16.msra.mxu1 %v1431_v1 }
 0x128   : > { %1228 = vmatprep.subr.bf16.mxu0 %v1449_v21  ;;  %1260 = vmatprep.subr.bf16.mxu1 %v1806_v23 }
 0x129   : > { %1238 = vmatprep.mubr.msk.bf16.mxu0 %vm566_vm0, %v1141_v22  ;;  %1270 = vmatprep.mubr.msk.bf16.mxu1 %vm1807_vm1, %v1806_v23 }
 0x12b   : > { %1229 = vmatpush3.bf16.msra.mxu0 %v1449_v21  ;;  %1261 = vmatpush3.bf16.msra.mxu1 %v1433_v3 }
 0x12c   : > { %1230 = vmatprep.subr.bf16.mxu0 %v1450_v24  ;;  %1262 = vmatprep.subr.bf16.mxu1 %v1806_v23 }
 0x12f   : > { %1231 = vmatpush3.bf16.msra.mxu0 %v1450_v24  ;;  %1263 = vmatpush3.bf16.msra.mxu1 %v1435_v5 }
 0x130   : > { %1232 = vmatprep.subr.bf16.mxu0 %v1451_v25  ;;  %1264 = vmatprep.subr.bf16.mxu1 %v1806_v23 }
 0x133   : > { %1233 = vmatpush3.bf16.msra.mxu0 %v1451_v25  ;;  %1265 = vmatpush3.bf16.msra.mxu1 %v1437_v7 }
 0x134   : > { %1234 = vmatprep.subr.bf16.mxu0 %v1452_v26  ;;  %1266 = vmatprep.subr.bf16.mxu1 %v1806_v23 }
 0x137   : > { %1235 = vmatpush3.bf16.msra.mxu0 %v1452_v26  ;;  %1267 = vmatpush3.bf16.msra.mxu1 %v1439_v10 }
 0x138   : > { %1236 = vmatprep.subr.bf16.mxu0 %v1453_v27  ;;  %1268 = vmatprep.subr.bf16.mxu1 %v1806_v23 }
 0x13b   : > { %1237 = vmatpush3.bf16.msra.mxu0 %v1453_v27  ;;  %1269 = vmatpush3.bf16.msra.mxu1 %v1441_v15 }
 0x13e   : > { %1239 = vmatmul.mubr.msk.bf16.vlgmr.msra.gmra.mrb[0].mxu0 %vm566_vm0, %v1142_v28  ;;  %1271 = vmatmul.mubr.msk.bf16.vlgmr.msra.gmra.mrb[4].mxu1 %vm566_vm0, %v853_v29 }
 0x1f9   : > { %v1256_v30 = vpop.f32.mrb[0].mxu1 }
 0x1fa   : > { %v801_v31 = vpop.f32.mrb[1].mxu1 }
 0x1fb   : > { %v1257_v32 = vpop.f32.mrb[2].mxu1 }
 0x1fc   : > { %v804_v33 = vpop.f32.mrb[3].mxu1 }
 0x211   : > { %v1240_v35 = vpop.f32.mrb[0].mxu0  ;;  %v891_v37 = vpop.f32.mrb[4].mxu1 }
 0x212   : > { %v817_v36 = vadd.f32 %v1256_v30, %v1240_v35  ;;  %v708_v38 = vpop.f32.mrb[1].mxu0  ;;  %v1272_v40 = vpop.f32.mrb[5].mxu1 }
 0x213   : > { %v815_v39 = vadd.f32 %v801_v31, %v708_v38  ;;  %v1241_v41 = vpop.f32.mrb[2].mxu0  ;;  %v894_v44 = vpop.f32.mrb[6].mxu1 }
 0x214   : > { %v826_v42 = vadd.f32 %v1161_v34, %v817_v36  ;;  %v897_v43 = vadd.f32 %v1241_v41, %v891_v37  ;;  %v711_v45 = vpop.f32.mrb[3].mxu0  ;;  %v1273_v48 = vpop.f32.mrb[7].mxu1 }
 0x215   : > { %v824_v46 = vadd.f32 %v1161_v34, %v815_v39  ;;  %v816_v47 = vadd.f32 %v804_v33, %v711_v45 }
 0x216   : > { %vm829_vm2 = vcmp.ge.f32.partialorder %v826_v42, 0.0  ;;  %v832_v49 = vmul.f32 0.1, %v826_v42  ;;  %v898_v50 = vadd.f32 %v1161_v34, %v897_v43 }
 0x217   : > { %vm827_vm3 = vcmp.ge.f32.partialorder %v824_v46, 0.0  ;;  %v830_v51 = vmul.f32 0.1, %v824_v46  ;;  %v825_v52 = vadd.f32 %v1161_v34, %v816_v47 }
 0x218   : > { %v835_v53 = vsel %vm829_vm2, %v826_v42, %v832_v49  ;;  %vm899_vm5 = vcmp.ge.f32.partialorder %v898_v50, 0.0  ;;  %v900_v54 = vmul.f32 0.1, %v898_v50 }
 0x219   : > { %v1178_v55 = vpack.c.bf16 %v835_v53, %v835_v53  ;;  %v833_v56 = vsel %vm827_vm3, %v824_v46, %v830_v51  ;;  %vm828_vm6 = vcmp.ge.f32.partialorder %v825_v52, 0.0  ;;  %v831_v57 = vmul.f32 0.1, %v825_v52 }
 0x21a   : > { %v1176_v58 = vpack.c.bf16 %v833_v56, %v833_v56  ;;  %v901_v59 = vsel %vm899_vm5, %v898_v50, %v900_v54 }
 0x21b   : > { %852 = vst.msk [vmem:[%s464_s19 + $0x8] sm:$0xf] %vm849_vm4, %v1178_v55  ;;  %v902_v60 = vpack.c.bf16 %v901_v59, %v901_v59  ;;  %v834_v61 = vsel %vm828_vm6, %v825_v52, %v831_v57 }
 0x21c   : > { %850 = vst.msk [vmem:[%s464_s19] sm:$0xf] %vm849_vm4, %v1176_v58  ;;  %v1177_v62 = vpack.c.bf16 %v834_v61, %v834_v61 }
 0x21d   : > { %903 = vst.msk [vmem:[%s464_s19 + $0xc] sm:$0xf] %vm849_vm4, %v902_v60 }
 0x21e   : > { %851 = vst.msk [vmem:[%s464_s19 + $0x4] sm:$0xf] %vm849_vm4, %v1177_v62 }
 0x21f   : > { %1664 = shalt.err (!%p1661_p12)
}
 0x220   : > { %s1665_s2 = scalar_lea.hbm %s2266_s8, 256  ;;  %s1669_s27 = scalar_lea.hbm %s2412_s14, 1024 }
 0x221   : > { %p1666_p9 = scmp.ne.s32.totalorder %s2266_s8, %s1665_s2  ;;  %p1670_p5 = scmp.lt.u32.totalorder %s2266_s8, %s2412_s14 }
 0x222   : > { %p1671_p11 = scmp.lt.u32.totalorder %s1669_s27, %s1665_s2  ;;  %p1673_p6 = scmp.lt.u32.totalorder %s1665_s2, %s2266_s8 }
 0x223   : > { %p1667_p4 = pnand %p1666_p9, %p2413_p13 }
 0x224   : > { %p1672_p3 = por %p1671_p11, %p1670_p5 }
 0x225   : > { %p1668_p1 = pneg %p1667_p4 }
 0x226   : > { %p1674_p10 = por %p1673_p6, %p1672_p3 }
 0x228   : > { %p1675_p0 = pnand %p1674_p10, %p1668_p1 }
 0x22a   : > { %1678 = shalt.err (!%p1675_p0)
}
 0x22b   : > { %s1809_s19 = smov 64   ;;  %s1810_s30 = smov 4  }
 0x22c   : > { %1300 = dma.vmem_to_hbm [thread:$0]  (%p2413_p13), %s2268_s23, 256, %s2266_s8, %s905_s17, %s1809_s19, %s1809_s19, %s1810_s30  }
 0x22d PF: > { %s2414_s22 = sld [smem:[#allocation22_spill]]  ;;  %s2415_s12 = sld [smem:[#allocation34_spill]] }
 0x22e   : > { %p1327_p7 = scmp.ge.s32.totalorder %s1791_s11, 2 }
 0x233   : > { %s935_s9 = sand.u32 1, %s2414_s22   ;;  %p2416_p2 = scmp.ne.s32.totalorder %s2415_s12, 0 }
 0x234   : > { %s936_s20 = scalar_lea.sflag [#allocation4], %s935_s9 }
 0x235   : > { %p1316_p8 = pnand %p1327_p7, %p2416_p2 }
 0x237   : > { %1744 = dma.done.wait (!%p1316_p8), %s936_s20, 256  }
 0x238   : > { %1746 = vsyncadd (!%p1316_p8), %s936_s20, 4294967040  ;;  %s28_s11 = sadd.s32 1, %s1791_s11   ;;  %s2417_s24 = sld [smem:[#allocation21_spill]] }
 0x239   : > { %p25_p12 = scmp.ge.s32.totalorder %s28_s11, 6   ;;  %s2418_s21 = sld [smem:[#allocation31_spill]] }
 0x23a   : > { %s2419_s23 = sld [smem:[#allocation30_spill]]  ;;  %s2420_s30 = sld [smem:[#allocation25_spill]] }
 0x23b   : > { %s2421_s9 = sld [smem:[#allocation27_spill]]  ;;  %s2422_s18 = sld [smem:[#allocation28_spill]] }
 0x23c   : > { %s2423_s25 = smov %s1759_s26  ;;  %s2425_s27 = smov %s1767_s28 }
 0x23d   : > { %s2426_s28 = smov %s1771_s29  ;;  %s2428_s8 = smov %s1787_s10 }
 0x23e   :  { %27 = sbr.rel (!%p25_p12) target bundleno = 16 (0x10), region = 133 }
 0x23f   : > { %s2424_s26 = smov %s2418_s21 }
 0x240   : > { %s2427_s29 = smov %s2419_s23 }
 0x241   : > { %s2429_s10 = smov %s2422_s18 }
 0x245   :  { %941 = vsyncpa [#allocation3], 1 }
 0x246   :  { %943 = vsyncpa [#allocation3 + $0x1], 1 }
 0x247   :  { %944 = vsyncpa [#allocation6], 1 }
 0x248   :  { %946 = vsyncpa [#allocation6 + $0x1], 1 }
 0x249   :  { %947 = vsyncpa [#allocation9], 1 }
 0x24a   :  { %948 = vsyncpa [#allocation12], 1 }
 0x24b   :  { %949 = vsyncpa [#allocation4], 1 }
 0x24c   :  { %951 = vsyncpa [#allocation4 + $0x1], 1 }

// kernel: _lambda_.5
= control target key start
LH: loop header
LB: loop body
LE: loop exit
PB: predicated region body
PF: predicated region fallthrough
CT: control target
= control target key end

     0   :  { %s2787_s0 = inlined_call_operand.hbm [shape: bf16[2,40,96], index: 0, kind: input, shape index: {}, may-alias: {0,1}]   ;;  %s2788_s1 = inlined_call_operand.hbm [shape: bf16[2,40,96], index: 1, kind: input, shape index: {}, may-alias: {0,1}]   ;;  %s2789_s2 = inlined_call_operand.hbm [shape: bf16[2,32,96], index: 2, kind: input, shape index: {}]   ;;  %s2790_s3 = inlined_call_operand.hbm [shape: bf16[96,64], index: 3, kind: input, shape index: {}]   ;;  %s2791_s4 = inlined_call_operand.hbm [shape: bf16[96,64], index: 4, kind: input, shape index: {}]   ;;  %s2792_s5 = inlined_call_operand.hbm [shape: bf16[96,64], index: 5, kind: input, shape index: {}]   ;;  %s2793_s6 = inlined_call_operand.hbm [shape: f32[1,64], index: 6, kind: input, shape index: {}]   ;;  %s2794_s7 = inlined_call_operand.hbm [shape: f32[64,64], index: 7, kind: input, shape index: {}]   ;;  %s2795_s8 = inlined_call_operand.hbm [shape: f32[1,64], index: 8, kind: input, shape index: {}]   ;;  %s2796_s9 = inlined_call_operand.hbm [shape: f32[2,32,64], index: 9, kind: output, shape index: {}]  }
   0x1   :  { %2825 = sst [smem:[#allocation39_spill]] %s2787_s0 }
   0x2   :  { %2826 = sst [smem:[#allocation40_spill]] %s2788_s1 }
   0x3   :  { %2827 = sst [smem:[#allocation41_spill]] %s2789_s2 }
   0x4   :  { %2828 = sst [smem:[#allocation42_spill]] %s2790_s3 }
   0x5   :  { %2829 = sst [smem:[#allocation43_spill]] %s2792_s5 }
   0x6   :  { %2830 = sst [smem:[#allocation44_spill]] %s2796_s9 }
   0x7   :  { %14 = vsyncpa [#allocation3], 0 }
   0x8   :  { %16 = vsyncpa [#allocation3 + $0x1], 0 }
   0x9   :  { %17 = vsyncpa [#allocation6], 0 }
   0xa   :  { %19 = vsyncpa [#allocation6 + $0x1], 0 }
   0xb   :  { %20 = vsyncpa [#allocation9], 0 }
   0xc   :  { %21 = vsyncpa [#allocation12], 0 }
   0xd   :  { %22 = vsyncpa [#allocation15], 0 }
   0xe   :  { %23 = vsyncpa [#allocation4], 0 }
   0xf   :  { %25 = vsyncpa [#allocation4 + $0x1], 0  ;;  %s2214_s30 = smov 0   ;;  %s2216_s10 = smov 0  }
  0x10   :  { %s2218_s11 = smov 0   ;;  %s2220_s12 = smov 0  }
  0x11   :  { %s2222_s13 = smov 0   ;;  %s2224_s14 = smov 0  }
  0x12   :  { %s2226_s15 = smov 0   ;;  %s2228_s16 = smov 0  }
  0x13   :  { %s2230_s17 = smov 0   ;;  %s2232_s18 = smov 0  }
  0x14   :  { %s2234_s19 = smov 0  }
  0x15 LB: > { %2831 = sst [smem:[#allocation25_spill]] %s2103_s10  ;;  %s2270_s20 = sadd.s32 4294967295, %s2139_s19   ;;  %s2139_s19 = sphi %s2234_s19, %s31_s19   ;;  %s2135_s18 = sphi %s2232_s18, %s2903_s18   ;;  %s2131_s17 = sphi %s2230_s17, %s2894_s17   ;;  %s2127_s16 = sphi %s2228_s16, %s2902_s16   ;;  %s2123_s15 = sphi %s2226_s15, %s2901_s15   ;;  %s2119_s14 = sphi %s2224_s14, %s2900_s14   ;;  %s2115_s13 = sphi %s2222_s13, %s2899_s13   ;;  %s2111_s12 = sphi %s2220_s12, %s2898_s12   ;;  %s2107_s11 = sphi %s2218_s11, %s2897_s11   ;;  %s2103_s10 = sphi %s2216_s10, %s2896_s10   ;;  %s2099_s30 = sphi %s2214_s30, %s2890_s30  }
  0x16   : > { %2832 = sst [smem:[#allocation26_spill]] %s2111_s12  ;;  %s40_s22 = sadd.s32 1, %s2131_s17 }
  0x17   : > { %2833 = sst [smem:[#allocation27_spill]] %s2123_s15  ;;  %s43_s23 = sadd.s32 1, %s2135_s18 }
  0x18   : > { %2834 = sst [smem:[#allocation28_spill]] %s2127_s16  ;;  %p41_p0 = scmp.ge.s32.totalorder %s40_s22, 2 }
  0x19   : > { %2835 = sst [smem:[#allocation29_spill]] %s2131_s17  ;;  %s52_s24 = sadd.s32 1, %s2119_s14 }
  0x1a   : > { %2836 = sst [smem:[#allocation30_spill]] %s2270_s20  ;;  %p59_p1 = scmp.ne.s32.totalorder %s2119_s14, %s2115_s13 }
  0x1b   : > { %p60_p2 = scmp.eq.s32.totalorder %s2139_s19, 0  ;;  %s2905_s22 = smov (%p41_p0, %s40_s22), 0 }
  0x1c   : > { %2837 = sst [smem:[#allocation31_spill]] %s2905_s22  ;;  %s2907_s23 = smov (!%p41_p0, %s43_s23), %s2135_s18 }
  0x1d   : > { %s48_s25 = ssub.s32 %s2131_s17, %s2905_s22  ;;  %p2289_p3 = por %p60_p2, %p59_p1 }
  0x1e   : > { %p45_p4 = scmp.ge.s32.totalorder %s2907_s23, 2  ;;  %p2803_p5 = scmp.ne.s32.totalorder %s2115_s13, %s2111_s12 }
  0x1f   : > { %s2838_s26 = scalar_select %p2289_p3, 1, 0 }
  0x20   : > { %p2811_p6 = scmp.eq.s32.totalorder %s2270_s20, 0  ;;  %s2297_s27 = sshll.u32 %s2131_s17, 1 }
  0x21   : > { %s2909_s23 = smov (%p45_p4, %s2907_s23), 0  ;;  %s1372_s29 = sadd.s32 2, %s2297_s27 }
  0x22   : > { %2839 = sst [smem:[#allocation32_spill]] %s2909_s23  ;;  %p2306_p7 = por %p2811_p6, %p2803_p5 }
  0x23   : > { %s47_s21 = ssub.s32 %s2135_s18, %s2909_s23  ;;  %s1373_s17 = sshll.u32 %s2905_s22, 1 }
  0x24   : > { %s2840_s28 = scalar_select %p2306_p7, 1, 0 }
  0x25   : > { %s49_s9 = sor.u32 %s48_s25, %s47_s21  ;;  %s1374_s16 = sadd.s32 2, %s1373_s17 }
  0x26   : > { %2841 = sst [smem:[#allocation33_spill]] %s2840_s28  ;;  %p50_p8 = scmp.eq.s32.totalorder %s49_s9, 0 }
  0x27   : > { %s80_s15 = ssub.s32 %s1372_s29, %s1374_s16  ;;  %s84_s1 = sadd.s32 1, %s2107_s11 }
  0x28   : > { %s81_s2 = sor.u32 %s80_s15, %s47_s21  ;;  %p91_p10 = scmp.ne.s32.totalorder %s2107_s11, %s2103_s10 }
  0x29   : > { %s2316_s0 = scalar_select %p50_p8, %s2119_s14, %s52_s24  }
  0x2a   : > { %p82_p9 = scmp.eq.s32.totalorder %s81_s2, 0  ;;  %p97_p11 = scmp.ne.s32.totalorder %s2103_s10, %s2099_s30 }
  0x2b   : > { %2842 = sst [smem:[#allocation34_spill]] %s2316_s0  ;;  %p277_p12 = scmp.eq.s32.totalorder %s2270_s20, 3 }
  0x2c   : > { %s2324_s23 = scalar_select %p82_p9, %s2107_s11, %s84_s1  }
  0x2d   : > { %p2328_p13 = por %p91_p10, %p60_p2  ;;  %p2334_p0 = por %p97_p11, %p2811_p6 }
  0x2e   : > { %2843 = sst [smem:[#allocation35_spill]] %s2324_s23  ;;  %p2341_p4 = por %p277_p12, %p59_p1 }
  0x2f   : > { %s2844_s25 = scalar_select %p2328_p13, 1, 0 }
  0x30   : > { %s2845_s9 = scalar_select %p2334_p0, 1, 0 }
  0x31   : > { %s2847_s15 = scalar_select %p2341_p4, 1, 0 }
  0x32   : > { %2846 = sst [smem:[#allocation36_spill]] %s2845_s9  ;;  %s2849_s2 = sadd.s32 4294967294, %s2139_s19  }
  0x33   : > { %2848 = sst [smem:[#allocation37_spill]] %s2847_s15  ;;  %p283_p8 = scmp.eq.s32.totalorder %s2849_s2, 3 }
  0x34   : > { %p1303_p5 = scmp.ge.s32.totalorder %s2139_s19, 1  ;;  %p290_p9 = scmp.lt.s32.totalorder %s2139_s19, 5 }
  0x35   : > { %p2850_p7 = scmp.ne.s32.totalorder %s2115_s13, %s2111_s12  ;;  %s2141_s16 = smov [#allocation8]  }
  0x36   : > { %p2356_p2 = pnand %p1303_p5, %p290_p9  ;;  %s302_s17 = sshll.u32 %s2141_s16, 4  ;;  %s2362_s17 = int_to_ptr.vmem [resolvable:$true] %s302_s17 }
  0x37   : > { %p2352_p3 = por %p283_p8, %p2850_p7  ;;  %s2142_s24 = smov [#allocation11]  }
  0x38   : > { %s2853_s30 = scalar_select %p2356_p2, 1, 0 }
  0x39   : > { %s2851_s1 = scalar_select %p2352_p3, 1, 0 }
  0x3a   : > { %p1579_p1 = pneg %p2356_p2  ;;  %s328_s29 = sshll.u32 %s2142_s24, 4  ;;  %s2370_s29 = int_to_ptr.vmem [resolvable:$true] %s328_s29 }
  0x3b   : > { %2852 = sst [smem:[#allocation38_spill]] %s2851_s1  ;;  %s2143_s2 = smov [#allocation14]  }
  0x3c   : > { %p2366_p10 = pnand %p1579_p1, %p2811_p6  ;;  %s2372_s22 = sshll.u32 %s2143_s2, 4  ;;  %s353_s22 = int_to_ptr.vmem [resolvable:$true] %s2372_s22 }
  0x3d   : > { %s2855_s3 = sld [smem:[#allocation42_spill]] }
  0x3e   : > { %p2382_p7 = pneg %p2366_p10 }
  0x43   : > { %s1742_s16 = scalar_lea.hbm %s2855_s3, 768 }
  0x44   : > { %p1743_p5 = scmp.ne.s32.totalorder %s2855_s3, %s1742_s16  ;;  %p1749_p8 = scmp.lt.u32.totalorder %s1742_s16, %s2855_s3 }
  0x46   : > { %p1745_p11 = pnand %p2382_p7, %p1743_p5 }
  0x48   : > { %p1746_p12 = pneg %p1745_p11 }
  0x4a   : > { %p1751_p9 = pnand %p1749_p8, %p1746_p12 }
  0x4c   : > { %1754 = shalt.err (!%p1751_p9)
}
  0x4d   : > { %s1755_s0 = scalar_lea.vmem %s2362_s17, 768  ;;  %p1763_p4 = scmp.lt.s32.totalorder %s2362_s17, %s2362_s17 }
  0x4e   : > { %p1756_p1 = scmp.ne.s32.totalorder %s2362_s17, %s1755_s0  ;;  %p1764_p0 = scmp.lt.s32.totalorder %s1755_s0, %s1755_s0 }
  0x50   : > { %p1758_p6 = pnand %p1756_p1, %p2382_p7  ;;  %p1765_p5 = por %p1764_p0, %p1763_p4 }
  0x52   : > { %p1759_p3 = pneg %p1758_p6 }
  0x54   : > { %p1766_p11 = pnand %p1765_p5, %p1759_p3 }
  0x56   : > { %1769 = shalt.err (!%p1766_p11)
}
  0x57   : > { %s2823_s12 = smov 64   ;;  %s2824_s23 = smov 4  }
  0x58   : > { %1582 = dma.hbm_to_vmem [thread:$0]  (!%p2366_p10), %s2855_s3, 768, %s2362_s17, [#allocation9], %s2823_s12, %s2823_s12, %s2824_s23  }
  0x59   : > { %s2857_s5 = sld [smem:[#allocation43_spill]] }
  0x5f   : > { %s1770_s0 = scalar_lea.hbm %s2857_s5, 768 }
  0x60   : > { %p1771_p3 = scmp.ne.s32.totalorder %s2857_s5, %s1770_s0  ;;  %p1777_p4 = scmp.lt.u32.totalorder %s1770_s0, %s2857_s5 }
  0x62   : > { %p1773_p6 = pnand %p1771_p3, %p2382_p7 }
  0x64   : > { %p1774_p0 = pneg %p1773_p6 }
  0x66   : > { %p1779_p12 = pnand %p1777_p4, %p1774_p0 }
  0x68   : > { %1782 = shalt.err (!%p1779_p12)
}
  0x69   : > { %s1783_s17 = scalar_lea.vmem %s2370_s29, 768  ;;  %p1791_p5 = scmp.lt.s32.totalorder %s2370_s29, %s2370_s29 }
  0x6a   : > { %p1784_p8 = scmp.ne.s32.totalorder %s2370_s29, %s1783_s17  ;;  %p1792_p11 = scmp.lt.s32.totalorder %s1783_s17, %s1783_s17 }
  0x6c   : > { %p1786_p9 = pnand %p1784_p8, %p2382_p7  ;;  %p1793_p3 = por %p1792_p11, %p1791_p5 }
  0x6e   : > { %p1787_p1 = pneg %p1786_p9 }
  0x70   : > { %p1794_p6 = pnand %p1793_p3, %p1787_p1 }
  0x72   : > { %1797 = shalt.err (!%p1794_p6)
}
  0x73   : > { %1588 = dma.hbm_to_vmem [thread:$0]  (!%p2366_p10), %s2857_s5, 768, %s2370_s29, [#allocation12], %s2823_s12, %s2823_s12, %s2824_s23  }
  0x74   : > { %s1798_s1 = scalar_lea.hbm %s2794_s7, 1024 }
  0x75   : > { %p1799_p0 = scmp.ne.s32.totalorder %s2794_s7, %s1798_s1  ;;  %p1805_p8 = scmp.lt.u32.totalorder %s1798_s1, %s2794_s7 }
  0x77   : > { %p1801_p4 = pnand %p1799_p0, %p2382_p7 }
  0x79   : > { %p1802_p12 = pneg %p1801_p4 }
  0x7b   : > { %p1807_p9 = pnand %p1805_p8, %p1802_p12 }
  0x7d   : > { %1810 = shalt.err (!%p1807_p9)
}
  0x7e   : > { %s1811_s17 = scalar_lea.vmem %s353_s22, 1024  ;;  %p1819_p3 = scmp.lt.s32.totalorder %s353_s22, %s353_s22 }
  0x7f   : > { %p1812_p1 = scmp.ne.s32.totalorder %s353_s22, %s1811_s17  ;;  %p1820_p6 = scmp.lt.s32.totalorder %s1811_s17, %s1811_s17 }
  0x81   : > { %p1814_p5 = pnand %p1812_p1, %p2382_p7  ;;  %p1821_p2 = por %p1820_p6, %p1819_p3 }
  0x83   : > { %p1815_p11 = pneg %p1814_p5 }
  0x85   : > { %p1822_p13 = pnand %p1821_p2, %p1815_p11 }
  0x87   : > { %1825 = shalt.err (!%p1822_p13)
}
  0x88   : > { %s2146_s29 = smov 128   ;;  %s2147_s10 = smov 8  }
  0x89   : > { %1594 = dma.hbm_to_vmem [thread:$0]  (!%p2366_p10), %s2794_s7, 1024, %s353_s22, [#allocation15], %s2146_s29, %s2146_s29, %s2147_s10  }
  0x8a   : > { %s2148_s9 = smov [#allocation10]   ;;  %s2149_s16 = smov [#allocation13]  }
  0x8b   : > { %s315_s1 = sshll.u32 %s2148_s9, 4  ;;  %s342_s24 = sshll.u32 %s2149_s16, 4  ;;  %s316_s1 = int_to_ptr.vmem [resolvable:$true] %s315_s1  ;;  %s343_s24 = int_to_ptr.vmem [resolvable:$true] %s342_s24 }
  0x8c   : > { %s1826_s17 = scalar_lea.hbm %s2791_s4, 768 }
  0x8d   : > { %p1827_p13 = scmp.ne.s32.totalorder %s2791_s4, %s1826_s17  ;;  %p1833_p4 = scmp.lt.u32.totalorder %s1826_s17, %s2791_s4 }
  0x8f   : > { %p1829_p2 = pnand %p1827_p13, %p2382_p7 }
  0x91   : > { %p1830_p0 = pneg %p1829_p2 }
  0x93   : > { %p1835_p12 = pnand %p1833_p4, %p1830_p0 }
  0x95   : > { %1838 = shalt.err (!%p1835_p12)
}
  0x96   : > { %s1839_s22 = scalar_lea.vmem %s316_s1, 768  ;;  %p1847_p5 = scmp.lt.s32.totalorder %s316_s1, %s316_s1 }
  0x97   : > { %p1840_p8 = scmp.ne.s32.totalorder %s316_s1, %s1839_s22  ;;  %p1848_p11 = scmp.lt.s32.totalorder %s1839_s22, %s1839_s22 }
  0x99   : > { %p1842_p9 = pnand %p1840_p8, %p2382_p7  ;;  %p1849_p3 = por %p1848_p11, %p1847_p5 }
  0x9b   : > { %p1843_p1 = pneg %p1842_p9 }
  0x9d   : > { %p1850_p6 = pnand %p1849_p3, %p1843_p1 }
  0x9f   : > { %1853 = shalt.err (!%p1850_p6)
}
  0xa0   : > { %s2858_s12 = smov 4   ;;  %s2859_s23 = smov 64  }
  0xa1   : > { %1585 = dma.hbm_to_vmem [thread:$0]  (!%p2366_p10), %s2791_s4, 768, %s316_s1, [#allocation9], %s2859_s23, %s2859_s23, %s2858_s12  }
  0xa2   : > { %s1854_s20 = scalar_lea.hbm %s2793_s6, 16 }
  0xa3   : > { %p1855_p13 = scmp.ne.s32.totalorder %s2793_s6, %s1854_s20  ;;  %p1861_p4 = scmp.lt.u32.totalorder %s1854_s20, %s2793_s6 }
  0xa5   : > { %p1857_p2 = pnand %p1855_p13, %p2382_p7 }
  0xa7   : > { %p1858_p0 = pneg %p1857_p2 }
  0xa9   : > { %p1863_p12 = pnand %p1861_p4, %p1858_p0 }
  0xab   : > { %1866 = shalt.err (!%p1863_p12)
}
  0xac   : > { %s1867_s0 = scalar_lea.vmem %s343_s24, 16  ;;  %s1874_s1 = scalar_lea.vmem %s343_s24, 32 }
  0xad   : > { %p1868_p8 = scmp.ne.s32.totalorder %s343_s24, %s1867_s0  ;;  %p1875_p5 = scmp.lt.s32.totalorder %s343_s24, %s343_s24 }
  0xae   : > { %p1876_p11 = scmp.lt.s32.totalorder %s1874_s1, %s1867_s0 }
  0xaf   : > { %p1870_p9 = pnand %p1868_p8, %p2382_p7 }
  0xb0   : > { %p1877_p3 = por %p1876_p11, %p1875_p5 }
  0xb1   : > { %p1871_p1 = pneg %p1870_p9 }
  0xb3   : > { %p1878_p6 = pnand %p1877_p3, %p1871_p1 }
  0xb5   : > { %1881 = shalt.err (!%p1878_p6)
}
  0xb6   : > { %1591 = dma.hbm_to_vmem [thread:$0]  (!%p2366_p10), %s2793_s6, 16, %s343_s24, [#allocation12]  }
  0xb7   : > { %s2150_s12 = smov [#allocation16]   ;;  %s1882_s29 = scalar_lea.hbm %s2795_s8, 16 }
  0xb8   : > { %s366_s23 = sshll.u32 %s2150_s12, 4  ;;  %p1883_p13 = scmp.ne.s32.totalorder %s2795_s8, %s1882_s29  ;;  %s367_s23 = int_to_ptr.vmem [resolvable:$true] %s366_s23 }
  0xb9   : > { %p1889_p4 = scmp.lt.u32.totalorder %s1882_s29, %s2795_s8 }
  0xba   : > { %p1885_p2 = pnand %p1883_p13, %p2382_p7 }
  0xbc   : > { %p1886_p0 = pneg %p1885_p2 }
  0xbe   : > { %p1891_p12 = pnand %p1889_p4, %p1886_p0 }
  0xc0   : > { %1894 = shalt.err (!%p1891_p12)
}
  0xc1   : > { %s1895_s24 = scalar_lea.vmem %s367_s23, 16  ;;  %s1902_s16 = scalar_lea.vmem %s367_s23, 32 }
  0xc2   : > { %p1896_p8 = scmp.ne.s32.totalorder %s367_s23, %s1895_s24  ;;  %p1903_p5 = scmp.lt.s32.totalorder %s367_s23, %s367_s23 }
  0xc3   : > { %p1904_p11 = scmp.lt.s32.totalorder %s1902_s16, %s1895_s24 }
  0xc4   : > { %p1898_p9 = pnand %p1896_p8, %p2382_p7 }
  0xc5   : > { %p1905_p3 = por %p1904_p11, %p1903_p5 }
  0xc6   : > { %p1899_p1 = pneg %p1898_p9 }
  0xc8   : > { %p1906_p6 = pnand %p1905_p3, %p1899_p1 }
  0xca   : > { %1909 = shalt.err (!%p1906_p6)
}
  0xcb   : > { %1597 = dma.hbm_to_vmem [thread:$0]  (!%p2366_p10), %s2795_s8, 16, %s367_s23, [#allocation15]  }
  0xcc   : > { %p1310_p13 = scmp.ge.s32.totalorder %s2139_s19, 4 }
  0xcd   : > { %p2860_p2 = scmp.ne.s32.totalorder (!%p1310_p13), %s2838_s26, 0 }
  0xce   : > { %373 = sbr.rel (%p1310_p13) target bundleno = 312 (0x138), region = 40 }
  0xd5   : > { %376 = sbr.rel (!%p2860_p2) target bundleno = 246 (0xf6), region = 44  ;;  %s377_s15 = sand.u32 (%p2860_p2), 1, %s2119_s14  }
  0xd6   : > { %s1311_s1 = sshll.u32 (%p2860_p2), %s377_s15, 3  ;;  %s2512_s17 = scalar_lea.sflag (%p2860_p2), [#allocation3], %s377_s15 }
  0xd7   : > { %s381_s22 = scalar_lea.vmem (%p2860_p2), [#allocation2], %s1311_s1  ;;  %s1547_s12 = smul.u32 (%p2860_p2), 5, %s2135_s18 }
  0xd8   : > { %s396_s21 = sshll.u32 (%p2860_p2), %s381_s22, 4  ;;  %s2861_s10 = sld [smem:[#allocation39_spill]] (%p2860_p2)  ;;  %s2516_s21 = int_to_ptr.vmem [resolvable:$true] %s396_s21 }
  0xd9   : > { %s392_s3 = sadd.s32 (%p2860_p2), %s1547_s12, %s2297_s27 }
  0xda   : > { %s1315_s23 = sshll.u32 (%p2860_p2), %s392_s3, 6 }
  0xde   : > { %s2862_s20 = smov %s2861_s10  ;;  %s394_s28 = scalar_lea.hbm %s2861_s10, %s1315_s23 }
  0xdf   : > { %s1910_s9 = scalar_lea.hbm %s394_s28, 128  ;;  %s1914_s2 = scalar_lea.hbm %s2862_s20, 640 }
  0xe0   : > { %p1911_p10 = scmp.ne.s32.totalorder %s394_s28, %s1910_s9  ;;  %p1915_p7 = scmp.lt.u32.totalorder %s394_s28, %s2862_s20 }
  0xe1   : > { %p1916_p0 = scmp.lt.u32.totalorder %s1914_s2, %s1910_s9  ;;  %p1918_p12 = scmp.lt.u32.totalorder %s1910_s9, %s394_s28 }
  0xe3   : > { %p1917_p4 = por %p1916_p0, %p1915_p7 }
  0xe5   : > { %p1919_p8 = por %p1918_p12, %p1917_p4 }
  0xe7   : > { %p1920_p9 = pnand %p1919_p8, %p1911_p10 }
  0xe9   : > { %1923 = shalt.err (!%p1920_p9)
}
  0xea   : > { %s1924_s1 = scalar_lea.vmem %s2516_s21, 128  ;;  %s2151_s22 = smov [#allocation2]  }
  0xeb   : > { %p1925_p1 = scmp.ne.s32.totalorder %s2516_s21, %s1924_s1  ;;  %s1928_s12 = sshll.u32 %s2151_s22, 4  ;;  %s1929_s12 = int_to_ptr.vmem [resolvable:$false] %s1928_s12 }
  0xec   : > { %s1930_s3 = scalar_lea.vmem %s1929_s12, 256  ;;  %p1931_p5 = scmp.lt.s32.totalorder %s2516_s21, %s1929_s12 }
  0xed   : > { %p1932_p11 = scmp.lt.s32.totalorder %s1930_s3, %s1924_s1 }
  0xef   : > { %p1933_p3 = por %p1932_p11, %p1931_p5 }
  0xf1   : > { %p1934_p6 = pnand %p1933_p3, %p1925_p1 }
  0xf3   : > { %1937 = shalt.err (!%p1934_p6)
}
  0xf4   : > { %s2152_s23 = smov 64   ;;  %s2153_s5 = smov 4  }
  0xf5   : > { %402 = dma.hbm_to_vmem [thread:$0]  %s394_s28, 128, %s2516_s21, %s2512_s17, %s2152_s23, %s2152_s23, %s2153_s5  }
  0xf6 PF: > { %s406_s29 = sand.u32 1, %s2139_s19   ;;  %s408_s10 = sand.u32 1, %s2107_s11  }
  0xf7   : > { %s1318_s9 = sshll.u32 %s408_s10, 2  ;;  %s1147_s24 = smul.u32 5, %s2135_s18 }
  0xf8   : > { %s410_s16 = scalar_lea.vmem [#allocation5], %s1318_s9  ;;  %s430_s0 = sand.u32 1, %s2119_s14  }
  0xf9   : > { %s421_s2 = sshll.u32 %s410_s16, 4  ;;  %s1148_s15 = sadd.s32 %s2297_s27, %s1147_s24  ;;  %s2537_s2 = int_to_ptr.vmem [resolvable:$true] %s421_s2 }
  0xfa   : > { %s1320_s1 = sshll.u32 %s1148_s15, 6  ;;  %s2539_s17 = sshll.u32 %s430_s0, 3 }
  0xfb   : > { %s2863_s22 = sld [smem:[#allocation40_spill]]  ;;  %s1323_s23 = sshll.u32 %s2135_s18, 2 }
  0xfc   : > { %s2547_s5 = scalar_lea.sflag [#allocation6], %s406_s29  ;;  %p2864_p2 = scmp.ne.s32.totalorder %s2844_s25, 0 }
 0x101   : > { %s1150_s12 = scalar_lea.hbm %s2863_s22, %s1320_s1  ;;  %s1942_s16 = scalar_lea.hbm %s2863_s22, 640 }
 0x102   : > { %s2544_s3 = scalar_lea.hbm %s1150_s12, 128  ;;  %s1966_s10 = scalar_lea.hbm %s1150_s12, 192 }
 0x103   : > { %p1939_p13 = scmp.ne.s32.totalorder %s2544_s3, %s1966_s10  ;;  %p1943_p0 = scmp.lt.u32.totalorder %s2544_s3, %s2863_s22 }
 0x104   : > { %p1944_p4 = scmp.lt.u32.totalorder %s1942_s16, %s1966_s10  ;;  %p1946_p8 = scmp.lt.u32.totalorder %s1966_s10, %s2544_s3 }
 0x105   : > { %p1940_p10 = pnand %p1939_p13, %p2864_p2 }
 0x106   : > { %p1945_p12 = por %p1944_p4, %p1943_p0 }
 0x107   : > { %p1941_p7 = pneg %p1940_p10 }
 0x108   : > { %p1947_p9 = por %p1946_p8, %p1945_p12 }
 0x10a   : > { %p1948_p1 = pnand %p1947_p9, %p1941_p7 }
 0x10c   : > { %1951 = shalt.err (!%p1948_p1)
}
 0x10d   : > { %s1952_s29 = scalar_lea.vmem %s2537_s2, 64  ;;  %s2154_s1 = smov [#allocation5]  }
 0x10e   : > { %p1953_p5 = scmp.ne.s32.totalorder %s2537_s2, %s1952_s29  ;;  %s1956_s21 = sshll.u32 %s2154_s1, 4  ;;  %s1957_s21 = int_to_ptr.vmem [resolvable:$false] %s1956_s21 }
 0x10f   : > { %s1958_s28 = scalar_lea.vmem %s1957_s21, 128  ;;  %p1959_p6 = scmp.lt.s32.totalorder %s2537_s2, %s1957_s21 }
 0x110   : > { %p1954_p11 = pnand %p1953_p5, %p2864_p2  ;;  %p1960_p13 = scmp.lt.s32.totalorder %s1958_s28, %s1952_s29 }
 0x112   : > { %p1955_p3 = pneg %p1954_p11  ;;  %p1961_p10 = por %p1960_p13, %p1959_p6 }
 0x114   : > { %p1962_p0 = pnand %p1961_p10, %p1955_p3 }
 0x116   : > { %1965 = shalt.err (!%p1962_p0)
}
 0x117   : > { %1560 = dma.hbm_to_vmem [thread:$0]  (%p2864_p2), %s2544_s3, 64, %s2537_s2, %s2547_s5  }
 0x118   : > { %s438_s12 = sadd.s32 %s2297_s27, %s1323_s23  ;;  %s432_s10 = scalar_lea.vmem [#allocation7], %s2539_s17 }
 0x119   : > { %s441_s9 = sshll.u32 %s432_s10, 4  ;;  %s1324_s24 = sshll.u32 %s438_s12, 6  ;;  %s2574_s9 = int_to_ptr.vmem [resolvable:$true] %s441_s9 }
 0x11a   : > { %s2865_s15 = sld [smem:[#allocation41_spill]]  ;;  %p2867_p4 = scmp.ne.s32.totalorder %s2838_s26, 0 }
 0x120   : > { %s2866_s29 = smov %s2865_s15  ;;  %s2579_s1 = scalar_lea.hbm %s2865_s15, %s1324_s24 }
 0x121   : > { %s1967_s25 = scalar_lea.hbm %s2579_s1, 128  ;;  %s1971_s17 = scalar_lea.hbm %s2866_s29, 512 }
 0x122   : > { %p1968_p7 = scmp.ne.s32.totalorder %s2579_s1, %s1967_s25  ;;  %p1972_p8 = scmp.lt.u32.totalorder %s2579_s1, %s2866_s29 }
 0x123   : > { %p1973_p9 = scmp.lt.u32.totalorder %s1971_s17, %s1967_s25  ;;  %p1975_p5 = scmp.lt.u32.totalorder %s1967_s25, %s2579_s1 }
 0x124   : > { %p1969_p2 = pnand %p1968_p7, %p2867_p4 }
 0x125   : > { %p1974_p1 = por %p1973_p9, %p1972_p8 }
 0x126   : > { %p1970_p12 = pneg %p1969_p2 }
 0x127   : > { %p1976_p11 = por %p1975_p5, %p1974_p1 }
 0x129   : > { %p1977_p3 = pnand %p1976_p11, %p1970_p12 }
 0x12b   : > { %1980 = shalt.err (!%p1977_p3)
}
 0x12c   : > { %s1981_s21 = scalar_lea.vmem %s2574_s9, 128  ;;  %s2155_s28 = smov [#allocation7]  }
 0x12d   : > { %p1982_p6 = scmp.ne.s32.totalorder %s2574_s9, %s1981_s21  ;;  %s1985_s12 = sshll.u32 %s2155_s28, 4  ;;  %s1986_s12 = int_to_ptr.vmem [resolvable:$false] %s1985_s12 }
 0x12e   : > { %s1987_s10 = scalar_lea.vmem %s1986_s12, 256  ;;  %p1988_p0 = scmp.lt.s32.totalorder %s2574_s9, %s1986_s12 }
 0x12f   : > { %p1983_p13 = pnand %p1982_p6, %p2867_p4  ;;  %p1989_p7 = scmp.lt.s32.totalorder %s1987_s10, %s1981_s21 }
 0x131   : > { %p1984_p10 = pneg %p1983_p13  ;;  %p1990_p2 = por %p1989_p7, %p1988_p0 }
 0x133   : > { %p1991_p8 = pnand %p1990_p2, %p1984_p10 }
 0x135   : > { %1994 = shalt.err (!%p1991_p8)
}
 0x136   : > { %s2156_s24 = smov 64   ;;  %s2157_s16 = smov 4  }
 0x137   : > { %1561 = dma.hbm_to_vmem [thread:$0]  (%p2867_p4), %s2579_s1, 128, %s2574_s9, %s2547_s5, %s2156_s24, %s2156_s24, %s2157_s16  }
 0x138 PF: > { %p2868_p12 = scmp.ne.s32.totalorder %s2853_s30, 0 }
 0x139   : > { %s2869_s0 = sld [smem:[#allocation33_spill]] (!%p2868_p12)  ;;  %s2606_s15 = sand.u32 (!%p2868_p12), 1, %s2115_s13  }
 0x13a   : > { %453 = sbr.rel (%p2868_p12) target bundleno = 1085 (0x43d), region = 56  ;;  %s1326_s25 = sshll.u32 (!%p2868_p12), %s2606_s15, 3 }
 0x13b   : > { %s456_s27 = scalar_lea.sflag (!%p2868_p12), [#allocation3], %s2606_s15  ;;  %s2610_s2 = scalar_lea.vmem (!%p2868_p12), [#allocation2], %s1326_s25 }
 0x13f   : > { %p2870_p9 = scmp.ne.s32.totalorder (!%p2868_p12), %s2869_s0, 0 }
 0x141   : > { %2068 = dma.done.wait (%p2870_p9), %s456_s27, 128  }
 0x142   : > { %2070 = vsyncadd (%p2870_p9), %s456_s27, 4294967168  ;;  %s2871_s26 = sld [smem:[#allocation30_spill]]  ;;  %s2872_s5 = sld [smem:[#allocation25_spill]] }
 0x143   : > { %s2873_s9 = sld [smem:[#allocation36_spill]] }
 0x148   : > { %s464_s30 = sand.u32 1, %s2871_s26   ;;  %s466_s1 = sand.u32 1, %s2872_s5  }
 0x149   : > { %s2618_s17 = sshll.u32 %s466_s1, 2  ;;  %s465_s3 = scalar_lea.sflag [#allocation6], %s464_s30 }
 0x14a   : > { %s468_s23 = scalar_lea.vmem [#allocation5], %s2618_s17  ;;  %p2874_p4 = scmp.ne.s32.totalorder %s2873_s9, 0 }
 0x14c   : > { %2072 = dma.done.wait (%p2874_p4), %s465_s3, 64  }
 0x14d   : > { %2074 = vsyncadd (%p2874_p4), %s465_s3, 4294967232  ;;  %s2625_s21 = scalar_lea.vmem [#allocation7], %s1326_s25 }
 0x14e   : > { %2076 = dma.done.wait (%p2870_p9), %s465_s3, 128  }
 0x14f   : > { %2078 = vsyncadd (%p2870_p9), %s465_s3, 4294967168  ;;  %p2875_p1 = scmp.eq.s32.totalorder %s2871_s26, 0 }
 0x151   : > { %2080 = dma.done.wait (%p2875_p1), [#allocation9], 1536   ;;  %p2876_p5 = pmov %p2875_p1 }
 0x152   : > { %p2877_p11 = pmov %p2875_p1 }
 0x153   : > { %2082 = vsyncadd (%p2876_p5), [#allocation9], 4294965760 }
 0x154   : > { %2084 = dma.done.wait (%p2877_p11), [#allocation12], 784   ;;  %p2878_p3 = pmov %p2875_p1 }
 0x155   : > { %p2879_p6 = pmov %p2875_p1 }
 0x156   : > { %2086 = vsyncadd (%p2878_p3), [#allocation12], 4294966512 }
 0x157   : > { %2088 = dma.done.wait (%p2879_p6), [#allocation15], 1040   ;;  %p2880_p13 = pmov %p2875_p1 }
 0x158   : > { %v2158_v0 = vmov 0.0   ;;  %vm2159_vm0 = vmmov 0   ;;  %v1722_v1 = vld [vmem:[#allocation10] sm:$0xff]   ;;  %v1723_v2 = vld [vmem:[#allocation8] sm:$0xff]   ;;  %v1724_v3 = vld [vmem:[#allocation10 + $0x8] sm:$0xff]   ;;  %vm638_vm1 = vcmask 785408  }
 0x159   : > { %2090 = vsyncadd (%p2880_p13), [#allocation15], 4294966256  ;;  %1421 = vmatprep.subr.bf16.mxu0 %v2158_v0  ;;  %1437 = vmatprep.subr.bf16.mxu1 %v2158_v0  ;;  %v1725_v4 = vld [vmem:[#allocation8 + $0x8] sm:$0xff]   ;;  %v1726_v5 = vld [vmem:[#allocation10 + $0x10] sm:$0xff]   ;;  %v2160_v26 = vmov 0.0|0.0   ;;  %vm873_vm3 = vcmask 523264  }
 0x15a   : > { %1433 = vmatprep.mubr.msk.bf16.mxu0 %vm2159_vm0, %v2158_v0  ;;  %1449 = vmatprep.mubr.msk.bf16.mxu1 %vm2159_vm0, %v2158_v0  ;;  %v1727_v6 = vld [vmem:[#allocation8 + $0x10] sm:$0xff]   ;;  %v1728_v7 = vld [vmem:[#allocation10 + $0x18] sm:$0xff]   ;;  %v1729_v8 = vld [vmem:[#allocation8 + $0x18] sm:$0xff]   ;;  %s1335_s28 = sshll.u32 %s2606_s15, 4  ;;  %s2881_s12 = sld [smem:[#allocation27_spill]] }
 0x15b   : > { %1422 = vmatpush3.bf16.msra.mxu0 %v1722_v1  ;;  %1438 = vmatpush3.bf16.msra.mxu1 %v1723_v2  ;;  %v1730_v9 = vld [vmem:[#allocation10 + $0x20] sm:$0xff]   ;;  %v1731_v10 = vld [vmem:[#allocation8 + $0x20] sm:$0xff]   ;;  %v1732_v11 = vld [vmem:[#allocation10 + $0x28] sm:$0xff]   ;;  %s2882_s10 = sld [smem:[#allocation28_spill]]  ;;  %s545_s24 = scalar_lea.vmem [#allocation17], %s1335_s28 }
 0x15c   : > { %1423 = vmatprep.subr.bf16.mxu0 %v2158_v0  ;;  %1439 = vmatprep.subr.bf16.mxu1 %v2158_v0  ;;  %v1733_v12 = vld [vmem:[#allocation8 + $0x28] sm:$0xff]   ;;  %v556_v13 = vld [vmem:[%s2610_s2] sm:$0xf]  ;;  %v557_v14 = vld [vmem:[%s2610_s2 + $0x4] sm:$0xf]  ;;  %s2883_s16 = sld [smem:[#allocation37_spill]] }
 0x15d   : > { %v1734_v15 = vld [vmem:[%s2625_s21] sm:$0xff]   ;;  %v1344_v16 = vcombine.low %v556_v13, %v557_v14  ;;  %v2662_v17 = vld [vmem:[#allocation11] sm:$0xff]   ;;  %v2668_v18 = vld [vmem:[#allocation11 + $0x8] sm:$0xff]   ;;  %s1102_s2 = sshll.u32 %s545_s24, 4  ;;  %s2884_s30 = sld [smem:[#allocation44_spill]]  ;;  %s2718_s2 = int_to_ptr.vmem [resolvable:$true] %s1102_s2 }
 0x15e   : > { %v2676_v19 = vld [vmem:[#allocation11 + $0x10] sm:$0xff]   ;;  %v2680_v20 = vld [vmem:[#allocation11 + $0x18] sm:$0xff]   ;;  %v2684_v21 = vld [vmem:[#allocation11 + $0x20] sm:$0xff]   ;;  %s1087_s3 = scalar_lea.sflag [#allocation4], %s2606_s15  ;;  %s2161_s21 = smov [#allocation17]  }
 0x15f   : > { %1424 = vmatpush3.bf16.msra.mxu0 %v1724_v3  ;;  %1440 = vmatpush3.bf16.msra.mxu1 %v1725_v4  ;;  %v2688_v22 = vld [vmem:[#allocation11 + $0x28] sm:$0xff]   ;;  %v858_v23 = vld [vmem:[#allocation14] sm:$0xff]  ;;  %v859_v24 = vld [vmem:[#allocation14 + $0x8] sm:$0xff]  ;;  %s1999_s28 = sshll.u32 %s2161_s21, 4  ;;  %s2000_s28 = int_to_ptr.vmem [resolvable:$false] %s1999_s28 }
 0x160   : > { %1425 = vmatprep.subr.bf16.mxu0 %v2158_v0  ;;  %1441 = vmatprep.subr.bf16.mxu1 %v2158_v0  ;;  %v860_v25 = vld [vmem:[#allocation14 + $0x10] sm:$0xff]  ;;  %v1524_v27 = vpack.c.bf16 %v859_v24, %v858_v23  ;;  %v861_v28 = vld [vmem:[#allocation14 + $0x18] sm:$0xff]  ;;  %v862_v30 = vld [vmem:[#allocation14 + $0x20] sm:$0xff]  ;;  %s1366_s0 = sshll.u32 %s2881_s12, 1  ;;  %s2001_s12 = scalar_lea.vmem %s2000_s28, 512 }
 0x161   : > { %v1527_v29 = vpack.c.bf16 %v861_v28, %v860_v25  ;;  %v863_v31 = vld [vmem:[#allocation14 + $0x28] sm:$0xff]  ;;  %v864_v33 = vld [vmem:[#allocation14 + $0x30] sm:$0xff]  ;;  %v865_v34 = vld [vmem:[#allocation14 + $0x38] sm:$0xff]  ;;  %s1367_s25 = sshll.u32 %s2882_s10, 2  ;;  %p2002_p8 = scmp.lt.s32.totalorder %s2718_s2, %s2000_s28 }
 0x162   : > { %v1530_v32 = vpack.c.bf16 %v863_v31, %v862_v30  ;;  %v1533_v35 = vpack.c.bf16 %v865_v34, %v864_v33  ;;  %v1359_v46 = vld [vmem:[#allocation13] ss:$0 sm:$0xff]  ;;  %v948_v55 = vld [vmem:[%s468_s23] sm:$0xf]  ;;  %v1360_v56 = vld [vmem:[#allocation16] ss:$0 sm:$0xff]  ;;  %s1099_s27 = sadd.s32 %s1367_s25, %s1366_s0 }
 0x163   : > { %1426 = vmatpush3.bf16.msra.mxu0 %v1726_v5  ;;  %1442 = vmatpush3.bf16.msra.mxu1 %v1727_v6  ;;  %s1368_s26 = sshll.u32 %s1099_s27, 7  ;;  %s2885_s1 = smov %s2884_s30 }
 0x164   : > { %1427 = vmatprep.subr.bf16.mxu0 %v2158_v0  ;;  %1443 = vmatprep.subr.bf16.mxu1 %v2158_v0  ;;  %s2723_s17 = scalar_lea.hbm %s2884_s30, %s1368_s26  ;;  %s1995_s23 = scalar_lea.vmem %s2718_s2, 256 }
 0x165   : > { %p1996_p10 = scmp.ne.s32.totalorder %s2718_s2, %s1995_s23  ;;  %p2886_p0 = scmp.ne.s32.totalorder %s2883_s16, 0 }
 0x166   : > { %p2003_p12 = scmp.lt.s32.totalorder %s2001_s12, %s1995_s23 }
 0x167   : > { %1428 = vmatpush3.bf16.msra.mxu0 %v1728_v7  ;;  %1444 = vmatpush3.bf16.msra.mxu1 %v1729_v8  ;;  %p1997_p7 = pnand %p1996_p10, %p2886_p0 }
 0x168   : > { %1429 = vmatprep.subr.bf16.mxu0 %v2158_v0  ;;  %1445 = vmatprep.subr.bf16.mxu1 %v2158_v0  ;;  %p2004_p9 = por %p2003_p12, %p2002_p8 }
 0x169   : > { %p1998_p2 = pneg %p1997_p7 }
 0x16b   : > { %1430 = vmatpush3.bf16.msra.mxu0 %v1730_v9  ;;  %1446 = vmatpush3.bf16.msra.mxu1 %v1731_v10  ;;  %p2005_p4 = pnand %p2004_p9, %p1998_p2 }
 0x16c   : > { %1431 = vmatprep.subr.bf16.mxu0 %v2158_v0  ;;  %1447 = vmatprep.subr.bf16.mxu1 %v2158_v0 }
 0x16f   : > { %1432 = vmatpush3.bf16.msra.mxu0 %v1732_v11  ;;  %1448 = vmatpush3.bf16.msra.mxu1 %v1733_v12 }
 0x170   : > { %1453 = vmatprep.subr.bf16.mxu0 %v2158_v0  ;;  %1523 = vmatprep.subr.bf16.mxu1 %v2160_v26 }
 0x172   : > { %1434 = vmatmul.mubr.msk.bf16.vlgmr.msra.gmra.mrb[0].mxu0 %vm638_vm1, %v1734_v15  ;;  %1450 = vmatmul.mubr.msk.bf16.vlgmr.msra.gmra.mrb[0].mxu1 %vm638_vm1, %v1344_v16 }
 0x173   : > { %1454 = vmatpush3.bf16.msra.mxu0 %v2662_v17  ;;  %1465 = vmatprep.mubr.msk.bf16.mxu0 %vm2159_vm0, %v2158_v0 }
 0x174   : > { %1455 = vmatprep.subr.bf16.mxu0 %v2158_v0  ;;  %1485 = vmatprep.mubr.msk.f32.mxu1 %vm2159_vm0, %v2158_v0 }
 0x175   : > { %1525 = vmatpush3.bf16.msra.mxu1 %v1524_v27 }
 0x176   : > { %1526 = vmatprep.subr.bf16.mxu1 %v2160_v26 }
 0x177   : > { %1456 = vmatpush3.bf16.msra.mxu0 %v2668_v18 }
 0x178   : > { %1457 = vmatprep.subr.bf16.mxu0 %v2158_v0 }
 0x179   : > { %1528 = vmatpush3.bf16.msra.mxu1 %v1527_v29 }
 0x17a   : > { %1529 = vmatprep.subr.bf16.mxu1 %v2160_v26 }
 0x17b   : > { %1458 = vmatpush3.bf16.msra.mxu0 %v2676_v19 }
 0x17c   : > { %1459 = vmatprep.subr.bf16.mxu0 %v2158_v0 }
 0x17d   : > { %1531 = vmatpush3.bf16.msra.mxu1 %v1530_v32 }
 0x17e   : > { %1532 = vmatprep.subr.bf16.mxu1 %v2160_v26 }
 0x17f   : > { %1460 = vmatpush3.bf16.msra.mxu0 %v2680_v20 }
 0x180   : > { %1461 = vmatprep.subr.bf16.mxu0 %v2158_v0 }
 0x181   : > { %1534 = vmatpush3.bf16.msra.mxu1 %v1533_v35 }
 0x182   : > { %1488 = vmatprep.subr.bf16.mxu1 %v2158_v0 }
 0x183   : > { %1462 = vmatpush3.bf16.msra.mxu0 %v2684_v21 }
 0x184   : > { %1463 = vmatprep.subr.bf16.mxu0 %v2158_v0 }
 0x187   : > { %1464 = vmatpush3.bf16.msra.mxu0 %v2688_v22 }
 0x188   : > { %1535 = vmatprep.subr.bf16.mxu0 %v2160_v26 }
 0x18a   : > { %1466 = vmatmul.mubr.msk.bf16.vlgmr.msra.gmra.mrb[4].mxu0 %vm638_vm1, %v557_v14 }
 0x18b   : > { %1520 = vmatprep.mubr.msk.f32.mxu0 %vm2159_vm0, %v2158_v0  ;;  %1537 = vmatpush3.bf16.msra.mxu0 %v1524_v27 }
 0x18c   : > { %1538 = vmatprep.subr.bf16.mxu0 %v2160_v26 }
 0x18f   : > { %1540 = vmatpush3.bf16.msra.mxu0 %v1527_v29 }
 0x190   : > { %1541 = vmatprep.subr.bf16.mxu0 %v2160_v26 }
 0x193   : > { %1543 = vmatpush3.bf16.msra.mxu0 %v1530_v32 }
 0x194   : > { %1544 = vmatprep.subr.bf16.mxu0 %v2160_v26 }
 0x197   : > { %1546 = vmatpush3.bf16.msra.mxu0 %v1533_v35 }
 0x245   : > { %v676_v36 = vpop.f32.mrb[0].mxu0  ;;  %v761_v37 = vpop.f32.mrb[0].mxu1 }
 0x246   : > { %v1435_v38 = vpop.f32.mrb[1].mxu0  ;;  %v762_v39 = vadd.f32 %v761_v37, %v676_v36  ;;  %v1451_v40 = vpop.f32.mrb[1].mxu1 }
 0x247   : > { %v679_v41 = vpop.f32.mrb[2].mxu0  ;;  %v764_v42 = vpop.f32.mrb[2].mxu1 }
 0x248   : > { %v1436_v43 = vpop.f32.mrb[3].mxu0  ;;  %v765_v44 = vadd.f32 %v764_v42, %v679_v41  ;;  %v1452_v45 = vpop.f32.mrb[3].mxu1 }
 0x25d   : > { %v841_v47 = vpop.f32.mrb[4].mxu0 }
 0x25e   : > { %v847_v48 = vadd.f32 %v841_v47, %v762_v39  ;;  %v1467_v49 = vpop.f32.mrb[5].mxu0 }
 0x25f   : > { %v844_v50 = vpop.f32.mrb[6].mxu0 }
 0x260   : > { %v854_v51 = vadd.f32 %v1359_v46, %v847_v48  ;;  %v1468_v52 = vpop.f32.mrb[7].mxu0 }
 0x262   : > { %vm855_vm2 = vcmp.ge.f32.partialorder %v854_v51, 0.0  ;;  %v856_v53 = vmul.f32 0.1, %v854_v51 }
 0x264   : > { %v857_v54 = vsel %vm855_vm2, %v854_v51, %v856_v53 }
 0x265   : > { %1486 = vmatmul.mubr.msk.f32.vlgmr.msra.gmra.mrb[4].mxu1 %vm873_vm3, %v857_v54 }
 0x266   : > { %1489 = vmatpush3.bf16.msra.mxu1 %v2662_v17  ;;  %1500 = vmatprep.mubr.msk.bf16.mxu1 %vm2159_vm0, %v2158_v0 }
 0x267   : > { %1490 = vmatprep.subr.bf16.mxu1 %v2158_v0 }
 0x26a   : > { %1491 = vmatpush3.bf16.msra.mxu1 %v2668_v18 }
 0x26b   : > { %1492 = vmatprep.subr.bf16.mxu1 %v2158_v0 }
 0x26e   : > { %1493 = vmatpush3.bf16.msra.mxu1 %v2676_v19 }
 0x26f   : > { %1494 = vmatprep.subr.bf16.mxu1 %v2158_v0 }
 0x272   : > { %1495 = vmatpush3.bf16.msra.mxu1 %v2680_v20 }
 0x273   : > { %1496 = vmatprep.subr.bf16.mxu1 %v2158_v0 }
 0x276   : > { %1497 = vmatpush3.bf16.msra.mxu1 %v2684_v21 }
 0x277   : > { %1498 = vmatprep.subr.bf16.mxu1 %v2158_v0 }
 0x27a   : > { %1499 = vmatpush3.bf16.msra.mxu1 %v2688_v22 }
 0x27d   : > { %1501 = vmatmul.mubr.msk.bf16.vlgmr.msra.gmra.mrb[8].mxu1 %vm638_vm1, %v948_v55 }
 0x338   : > { %v943_v57 = vpop.f32.mrb[4].mxu1 }
 0x339   : > { %v944_v58 = vadd.f32 %v1360_v56, %v943_v57  ;;  %v1487_v59 = vpop.f32.mrb[5].mxu1 }
 0x33b   : > { %947 = vst.msk [vmem:[%s545_s24] sm:$0xff] %vm873_vm3, %v944_v58 }
 0x350   : > { %v986_v60 = vpop.f32.mrb[8].mxu1 }
 0x351   : > { %v992_v61 = vadd.f32 %v986_v60, %v765_v44  ;;  %v1502_v62 = vpop.f32.mrb[9].mxu1 }
 0x352   : > { %v989_v63 = vpop.f32.mrb[10].mxu1 }
 0x353   : > { %v993_v0 = vadd.f32 %v1359_v46, %v992_v61  ;;  %v1503_v1 = vpop.f32.mrb[11].mxu1 }
 0x355   : > { %vm994_vm4 = vcmp.ge.f32.partialorder %v993_v0, 0.0  ;;  %v995_v2 = vmul.f32 0.1, %v993_v0 }
 0x357   : > { %v996_v3 = vsel %vm994_vm4, %v993_v0, %v995_v2 }
 0x358   : > { %1521 = vmatmul.mubr.msk.f32.vlgmr.msra.gmra.mrb[8].mxu0 %vm873_vm3, %v996_v3 }
 0x42b   : > { %v1081_v4 = vpop.f32.mrb[8].mxu0 }
 0x42c   : > { %v1082_v5 = vadd.f32 %v1360_v56, %v1081_v4  ;;  %v1522_v6 = vpop.f32.mrb[9].mxu0 }
 0x42e   : > { %1085 = vst.msk [vmem:[%s545_s24 + $0x8] sm:$0xff] %vm873_vm3, %v1082_v5 }
 0x42f   : > { %2008 = shalt.err (!%p2005_p4)
}
 0x430   : > { %s2009_s10 = scalar_lea.hbm %s2723_s17, 256  ;;  %s2013_s25 = scalar_lea.hbm %s2885_s1, 1024 }
 0x431   : > { %p2010_p1 = scmp.ne.s32.totalorder %s2723_s17, %s2009_s10  ;;  %p2014_p3 = scmp.lt.u32.totalorder %s2723_s17, %s2885_s1 }
 0x432   : > { %p2015_p6 = scmp.lt.u32.totalorder %s2013_s25, %s2009_s10  ;;  %p2017_p10 = scmp.lt.u32.totalorder %s2009_s10, %s2723_s17 }
 0x433   : > { %p2011_p5 = pnand %p2010_p1, %p2886_p0 }
 0x434   : > { %p2016_p13 = por %p2015_p6, %p2014_p3 }
 0x435   : > { %p2012_p11 = pneg %p2011_p5 }
 0x436   : > { %p2018_p7 = por %p2017_p10, %p2016_p13 }
 0x438   : > { %p2019_p2 = pnand %p2018_p7, %p2012_p11 }
 0x43a   : > { %2022 = shalt.err (!%p2019_p2)
}
 0x43b   : > { %s2162_s5 = smov 128   ;;  %s2163_s9 = smov 8  }
 0x43c   : > { %1577 = dma.vmem_to_hbm [thread:$0]  (%p2886_p0), %s2718_s2, 256, %s2723_s17, %s1087_s3, %s2162_s5, %s2162_s5, %s2163_s9  }
 0x43d PF: > { %s2887_s30 = sld [smem:[#allocation26_spill]]  ;;  %s2888_s23 = sld [smem:[#allocation38_spill]] }
 0x43e   : > { %p1614_p8 = scmp.ge.s32.totalorder %s2139_s19, 2 }
 0x443   : > { %s1117_s21 = sand.u32 1, %s2887_s30   ;;  %p2889_p12 = scmp.ne.s32.totalorder %s2888_s23, 0 }
 0x444   : > { %s1118_s28 = scalar_lea.sflag [#allocation4], %s1117_s21 }
 0x445   : > { %p1599_p9 = pnand %p1614_p8, %p2889_p12 }
 0x447   : > { %2092 = dma.done.wait (!%p1599_p9), %s1118_s28, 256  }
 0x448   : > { %2094 = vsyncadd (!%p1599_p9), %s1118_s28, 4294967040  ;;  %s31_s19 = sadd.s32 1, %s2139_s19   ;;  %s2890_s30 = sld [smem:[#allocation25_spill]] }
 0x449   : > { %p28_p4 = scmp.ge.s32.totalorder %s31_s19, 6   ;;  %s2891_s12 = sld [smem:[#allocation35_spill]] }
 0x44a   : > { %s2892_s15 = sld [smem:[#allocation34_spill]]  ;;  %s2893_s16 = sld [smem:[#allocation29_spill]] }
 0x44b   : > { %s2894_s17 = sld [smem:[#allocation31_spill]]  ;;  %s2895_s2 = sld [smem:[#allocation32_spill]] }
 0x44c   : > { %s2896_s10 = smov %s2107_s11  ;;  %30 = sbr.rel (!%p28_p4) target bundleno = 21 (0x15), region = 149 }
 0x44f   : > { %s2897_s11 = smov %s2891_s12  ;;  %s2898_s12 = smov %s2115_s13 }
 0x450   : > { %s2899_s13 = smov %s2119_s14  ;;  %s2900_s14 = smov %s2892_s15 }
 0x451   : > { %s2901_s15 = smov %s2893_s16  ;;  %s2902_s16 = smov %s2135_s18 }
 0x452   : > { %s2903_s18 = smov %s2895_s2 }
 0x453   :  { %1123 = vsyncpa [#allocation3], 1 }
 0x454   :  { %1125 = vsyncpa [#allocation3 + $0x1], 1 }
 0x455   :  { %1126 = vsyncpa [#allocation6], 1 }
 0x456   :  { %1128 = vsyncpa [#allocation6 + $0x1], 1 }
 0x457   :  { %1129 = vsyncpa [#allocation9], 1 }
 0x458   :  { %1130 = vsyncpa [#allocation12], 1 }
 0x459   :  { %1131 = vsyncpa [#allocation15], 1 }
 0x45a   :  { %1132 = vsyncpa [#allocation4], 1 }
 0x45b   :  { %1134 = vsyncpa [#allocation4 + $0x1], 1 }

</bundles_post_ra>
